<compile_context>
chip_gen: v7x
topology: tpu7x:2x2x1
jax: 0.10.0
libtpu: 0.0.40
codegen_flags: <defaults>
</compile_context>

<pallas_src>
import jax
import jax.numpy as jnp
from jax.experimental import pallas as pl
from jax.experimental.pallas import tpu as pltpu

_EPS = 1e-5


# ---------------------------------------------------------------------------
# Fused forward kernel (one batch element per grid step)
# ---------------------------------------------------------------------------

def _cnn1d_fused_kernel(x_ref, p1_ref, p2_ref, p3_ref,
                        w1_ref, ss1_ref, wi_ref, ssi_ref,
                        w2_ref, ss2_ref, w3_ref, ss3_ref,
                        wf_ref, ssf_ref, wc_ref, bc_ref, o_ref):
    f32 = jnp.float32

    def conv_bn_relu(x, w_ref, ss_ref, k):
        # Conv1d(kernel_size=k) + folded BatchNorm + ReLU.
        # x: (L_in, C_in); w_ref: (k*C_in, C_out), row block i holds tap i.
        c_in = x.shape[1]
        l_out = x.shape[0] - k + 1
        w = w_ref[...]
        acc = jnp.dot(x[0:l_out, :], w[0:c_in, :], preferred_element_type=f32)
        for i in range(1, k):
            acc = acc + jnp.dot(x[i:i + l_out, :],
                                w[i * c_in:(i + 1) * c_in, :],
                                preferred_element_type=f32)
        ss = ss_ref[...]
        return jnp.maximum(acc * ss[0:1, :] + ss[1:2, :], 0.0)

    x = x_ref[0].astype(f32)                                     # (L, C_in)

    h = conv_bn_relu(x, w1_ref, ss1_ref, 3)                      # (L-2, 64)
    # AvgPool1d(2,2) fused with the zero padding required by the k=5 inception
    # branch: p1's first/last rows are all-zero, interior rows average pairs.
    h = jnp.dot(p1_ref[...], h, preferred_element_type=f32)      # (Lp+2, 64)
    # Both inception branches + torch.cat in ONE weight: output cols 0:128 are
    # the k=3 branch (taps 1..3 of the padded input), cols 128:256 the k=5 one.
    h = conv_bn_relu(h, wi_ref, ssi_ref, 5)                      # (Lp-2, 256)
    h = jnp.dot(p2_ref[...], h, preferred_element_type=f32)      # pool
    # dropout1 / dropout2: identity in inference.
    h = conv_bn_relu(h, w2_ref, ss2_ref, 3)                      # conv2
    h = conv_bn_relu(h, w3_ref, ss3_ref, 3)                      # conv3
    h = jnp.dot(p3_ref[...], h, preferred_element_type=f32)      # (9, 128)

    # fc (Linear + BN + ReLU): torch's channel-major x.view(B, -1) order is
    # folded into wf at init, so we only accumulate over length positions.
    lf, cf = h.shape
    wf = wf_ref[...]
    g = jnp.dot(h[0:1, :], wf[0:cf, :], preferred_element_type=f32)
    for l in range(1, lf):
        g = g + jnp.dot(h[l:l + 1, :], wf[l * cf:(l + 1) * cf, :],
                        preferred_element_type=f32)
    ssf = ssf_ref[...]
    g = jnp.maximum(g * ssf[0:1, :] + ssf[1:2, :], 0.0)          # (1, 512)

    out = jnp.dot(g, wc_ref[...], preferred_element_type=f32) + bc_ref[...]
    o_ref[0] = out.astype(o_ref.dtype)                           # (1, n_cls)


# ---------------------------------------------------------------------------
# Host-side helpers: pooling-as-matmul, BN folding, weight preprocessing
# ---------------------------------------------------------------------------

def _pool_matrix(l_in, pad=False):
    """Matrix M so that M @ x == AvgPool1d(2, 2)(x) along the length axis.

    With pad=True an all-zero row is added on both ends, which is exactly the
    zero padding the padding=1 / kernel_size=5 inception branch needs.
    """
    l_out = l_in // 2
    off = 1 if pad else 0
    i = jnp.arange(l_out + 2 * off)[:, None] - off
    j = jnp.arange(l_in)[None, :]
    hit = ((j == 2 * i) | (j == 2 * i + 1)) & (i >= 0) & (i < l_out)
    return jnp.where(hit, 0.5, 0.0).astype(jnp.float32)


def _conv_im2col(w_pt):
    # PyTorch Conv1d weight (C_out, C_in, K) -> (K*C_in, C_out); row block k = tap k.
    c_out, c_in, k = w_pt.shape
    return jnp.transpose(w_pt, (2, 1, 0)).reshape(k * c_in, c_out).astype(jnp.float32)


def _bn_fold(bias, gamma, beta, mean, var):
    # (z + bias) followed by BatchNorm (running stats)  ==  z * s + t
    s = gamma / jnp.sqrt(var + _EPS)
    return s, (bias - mean) * s + beta


def _pack(s, t):
    return jnp.stack([s, t]).astype(jnp.float32)   # (2, C): row 0 scale, row 1 shift


def init_params(key, in_channel, out_channel):
    keys = iter(jax.random.split(key, 64))

    def conv_w(c_out, c_in, k):
        w = jax.random.normal(next(keys), (c_out, c_in, k), jnp.float32)
        w = w / jnp.sqrt(float(c_in * k))
        b = 0.01 * jax.random.normal(next(keys), (c_out,), jnp.float32)
        return w, b

    def bn(c):
        gamma = 1.0 + 0.1 * jax.random.normal(next(keys), (c,), jnp.float32)
        beta = 0.1 * jax.random.normal(next(keys), (c,), jnp.float32)
        mean = 0.1 * jax.random.normal(next(keys), (c,), jnp.float32)
        var = 1.0 + 0.5 * jax.random.uniform(next(keys), (c,), jnp.float32)
        return gamma, beta, mean, var

    def lin_w(c_out, c_in):
        w = jax.random.normal(next(keys), (c_out, c_in), jnp.float32)
        w = w / jnp.sqrt(float(c_in))
        b = 0.01 * jax.random.normal(next(keys), (c_out,), jnp.float32)
        return w, b

    p = {}

    # conv1: Conv1d(in_channel, 64, 3) + BN(64) + ReLU
    w, b = conv_w(64, in_channel, 3)
    s, t = _bn_fold(b, *bn(64))
    p['w1'], p['ss1'] = _conv_im2col(w), _pack(s, t)

    # Inception branches fused into one (5*64, 256) weight over the padded
    # pooled activation: cols 0:128 = inception_conv1 (k=3 -> taps 1..3),
    # cols 128:256 = inception_conv2 (k=5, padding=1 -> all 5 taps).
    wa, ba = conv_w(128, 64, 3)
    sa, ta = _bn_fold(ba, *bn(128))
    wb, bb = conv_w(128, 64, 5)
    sb, tb = _bn_fold(bb, *bn(128))
    wi = jnp.zeros((5 * 64, 256), jnp.float32)
    wi = wi.at[64:256, 0:128].set(_conv_im2col(wa))
    wi = wi.at[:, 128:256].set(_conv_im2col(wb))
    p['wi'] = wi
    p['ssi'] = _pack(jnp.concatenate([sa, sb]), jnp.concatenate([ta, tb]))

    # conv2: Conv1d(256, 256, 3) + BN(256) + ReLU
    w, b = conv_w(256, 256, 3)
    s, t = _bn_fold(b, *bn(256))
    p['w2'], p['ss2'] = _conv_im2col(w), _pack(s, t)

    # conv3: Conv1d(256, 128, 3) + BN(128) + ReLU
    w, b = conv_w(128, 256, 3)
    s, t = _bn_fold(b, *bn(128))
    p['w3'], p['ss3'] = _conv_im2col(w), _pack(s, t)

    # fc: Linear(1152, 512) + BN(512) + ReLU.  Fold torch's channel-major
    # flatten (feature index c*9 + l) into the weight so the kernel reads the
    # (9, 128) activation length-major (index l*128 + c) with no transpose.
    fw, fb = lin_w(512, 1152)
    s, t = _bn_fold(fb, *bn(512))
    wf = fw.T.reshape(128, 9, 512).transpose(1, 0, 2).reshape(1152, 512)
    p['wf'], p['ssf'] = wf.astype(jnp.float32), _pack(s, t)

    # classifier: Linear(512, out_channel)
    cw, cb = lin_w(out_channel, 512)
    p['wc'] = cw.T.astype(jnp.float32)
    p['bc'] = cb.reshape(1, out_channel).astype(jnp.float32)
    return p


# ---------------------------------------------------------------------------
# Forward pass (single fused pallas_call)
# ---------------------------------------------------------------------------

def cnn1d_forward(x, p):
    """x: (B, L, C_in) float32 — same input as the PyTorch module (pre-transpose)."""
    B, L, C_in = x.shape
    n_cls = p['wc'].shape[1]

    l1 = L - 2                 # after conv1
    l2 = l1 // 2 - 2           # after pool + inception branches
    l3 = l2 // 2 - 4           # after pool + conv2 + conv3
    lf = l3 // 2               # after the final pool
    assert lf * 128 == p['wf'].shape[0], "sequence length inconsistent with fc(1152, 512)"

    pool1 = _pool_matrix(l1, pad=True)      # (l1//2 + 2, l1): pool + k=5 padding
    pool2 = _pool_matrix(l2)                # (l2//2, l2)
    pool3 = _pool_matrix(l3)                # (lf, l3)

    operands = (x.astype(jnp.float32), pool1, pool2, pool3,
                p['w1'], p['ss1'], p['wi'], p['ssi'],
                p['w2'], p['ss2'], p['w3'], p['ss3'],
                p['wf'], p['ssf'], p['wc'], p['bc'])

    def rep(a):                 # whole array as one block, identical for every b
        nd = a.ndim
        return pl.BlockSpec(a.shape, lambda b: (0,) * nd)

    in_specs = ([pl.BlockSpec((1, L, C_in), lambda b: (b, 0, 0))]
                + [rep(a) for a in operands[1:]])

    out = pl.pallas_call(
        _cnn1d_fused_kernel,
        out_shape=jax.ShapeDtypeStruct((B, 1, n_cls), jnp.float32),
        grid=(B,),
        in_specs=in_specs,
        out_specs=pl.BlockSpec((1, 1, n_cls), lambda b: (b, 0, 0)),
        compiler_params=pltpu.CompilerParams(
            dimension_semantics=("parallel",),
            vmem_limit_bytes=32 * 1024 * 1024),
    )(*operands)
    return out.reshape(B, n_cls)


# ---------------------------------------------------------------------------

if __name__ == "__main__":
    key = jax.random.PRNGKey(0)
    kx, kp = jax.random.split(key)

    # Seq length 100 so the flatten produces 1152 = 128 * 9, matching
    # Linear(1152, 512). Small batch / channels otherwise.
    B, L, C_in, N_CLS = 2, 100, 4, 5

    x = jax.random.normal(kx, (B, L, C_in), jnp.float32)
    params = init_params(kp, C_in, N_CLS)

    fwd = jax.jit(cnn1d_forward)
    out = jax.block_until_ready(fwd(x, params))

    assert out.shape == (B, N_CLS), out.shape
    assert bool(jnp.all(jnp.isfinite(out))), "non-finite output"
    print("KERNEL_OK")
</pallas_src>

<mosaic_0001>
module attributes {stable_mosaic.version = 11 : i64} {
  func.func @_cnn1d_fused_kernel(%arg0: i32, %arg1: memref<1x100x4xf32, #tpu.memory_space<vmem>>, %arg2: memref<51x98xf32, #tpu.memory_space<vmem>>, %arg3: memref<23x47xf32, #tpu.memory_space<vmem>>, %arg4: memref<9x19xf32, #tpu.memory_space<vmem>>, %arg5: memref<12x64xf32, #tpu.memory_space<vmem>>, %arg6: memref<2x64xf32, #tpu.memory_space<vmem>>, %arg7: memref<320x256xf32, #tpu.memory_space<vmem>>, %arg8: memref<2x256xf32, #tpu.memory_space<vmem>>, %arg9: memref<768x256xf32, #tpu.memory_space<vmem>>, %arg10: memref<2x256xf32, #tpu.memory_space<vmem>>, %arg11: memref<768x128xf32, #tpu.memory_space<vmem>>, %arg12: memref<2x128xf32, #tpu.memory_space<vmem>>, %arg13: memref<1152x512xf32, #tpu.memory_space<vmem>>, %arg14: memref<2x512xf32, #tpu.memory_space<vmem>>, %arg15: memref<512x5xf32, #tpu.memory_space<vmem>>, %arg16: memref<1x5xf32, #tpu.memory_space<vmem>>, %arg17: memref<1x1x5xf32, #tpu.memory_space<vmem>>) attributes {dimension_semantics = [#tpu.dimension_semantics<parallel>], iteration_bounds = array<i64: 2>, scalar_prefetch = 0 : i64, scratch_operands = 0 : i64, tpu.core_type = #tpu.core_type<tc>, window_params = [{transform_indices = @transform_0, window_bounds = array<i64: 1, 100, 4>}, {pipeline_mode = #tpu.pipeline_mode<synchronous>, transform_indices = @transform_1, window_bounds = array<i64: 51, 98>}, {pipeline_mode = #tpu.pipeline_mode<synchronous>, transform_indices = @transform_2, window_bounds = array<i64: 23, 47>}, {pipeline_mode = #tpu.pipeline_mode<synchronous>, transform_indices = @transform_3, window_bounds = array<i64: 9, 19>}, {pipeline_mode = #tpu.pipeline_mode<synchronous>, transform_indices = @transform_4, window_bounds = array<i64: 12, 64>}, {pipeline_mode = #tpu.pipeline_mode<synchronous>, transform_indices = @transform_5, window_bounds = array<i64: 2, 64>}, {pipeline_mode = #tpu.pipeline_mode<synchronous>, transform_indices = @transform_6, window_bounds = array<i64: 320, 256>}, {pipeline_mode = #tpu.pipeline_mode<synchronous>, transform_indices = @transform_7, window_bounds = array<i64: 2, 256>}, {pipeline_mode = #tpu.pipeline_mode<synchronous>, transform_indices = @transform_8, window_bounds = array<i64: 768, 256>}, {pipeline_mode = #tpu.pipeline_mode<synchronous>, transform_indices = @transform_9, window_bounds = array<i64: 2, 256>}, {pipeline_mode = #tpu.pipeline_mode<synchronous>, transform_indices = @transform_10, window_bounds = array<i64: 768, 128>}, {pipeline_mode = #tpu.pipeline_mode<synchronous>, transform_indices = @transform_11, window_bounds = array<i64: 2, 128>}, {pipeline_mode = #tpu.pipeline_mode<synchronous>, transform_indices = @transform_12, window_bounds = array<i64: 1152, 512>}, {pipeline_mode = #tpu.pipeline_mode<synchronous>, transform_indices = @transform_13, window_bounds = array<i64: 2, 512>}, {pipeline_mode = #tpu.pipeline_mode<synchronous>, transform_indices = @transform_14, window_bounds = array<i64: 512, 5>}, {pipeline_mode = #tpu.pipeline_mode<synchronous>, transform_indices = @transform_15, window_bounds = array<i64: 1, 5>}, {transform_indices = @transform_16, window_bounds = array<i64: 1, 1, 5>}]} {
    %c0 = arith.constant 0 : index
    %c0_0 = arith.constant 0 : index
    %c0_1 = arith.constant 0 : index
    %0 = vector.load %arg1[%c0, %c0_0, %c0_1] : memref<1x100x4xf32, #tpu.memory_space<vmem>>, vector<1x100x4xf32>
    %1 = vector.shape_cast %0 : vector<1x100x4xf32> to vector<100x4xf32>
    %c0_2 = arith.constant 0 : index
    %c0_3 = arith.constant 0 : index
    %2 = vector.load %arg5[%c0_2, %c0_3] : memref<12x64xf32, #tpu.memory_space<vmem>>, vector<12x64xf32>
    %3 = vector.extract_strided_slice %1 {offsets = [0, 0], sizes = [98, 4], strides = [1, 1]} : vector<100x4xf32> to vector<98x4xf32>
    %4 = vector.extract_strided_slice %2 {offsets = [0, 0], sizes = [4, 64], strides = [1, 1]} : vector<12x64xf32> to vector<4x64xf32>
    %cst = arith.constant dense<0.000000e+00> : vector<98x64xf32>
    %5 = tpu.matmul %3, %4, %cst {dimension_numbers = #tpu.dot_dimension_numbers<[1], [0], [0], [1], [0, 0, 1, 1], [], []>} : vector<98x4xf32>, vector<4x64xf32>, vector<98x64xf32> -> vector<98x64xf32>
    %6 = vector.extract_strided_slice %1 {offsets = [1, 0], sizes = [98, 4], strides = [1, 1]} : vector<100x4xf32> to vector<98x4xf32>
    %7 = vector.extract_strided_slice %2 {offsets = [4, 0], sizes = [4, 64], strides = [1, 1]} : vector<12x64xf32> to vector<4x64xf32>
    %cst_4 = arith.constant dense<0.000000e+00> : vector<98x64xf32>
    %8 = tpu.matmul %6, %7, %cst_4 {dimension_numbers = #tpu.dot_dimension_numbers<[1], [0], [0], [1], [0, 0, 1, 1], [], []>} : vector<98x4xf32>, vector<4x64xf32>, vector<98x64xf32> -> vector<98x64xf32>
    %9 = arith.addf %5, %8 : vector<98x64xf32>
    %10 = vector.extract_strided_slice %1 {offsets = [2, 0], sizes = [98, 4], strides = [1, 1]} : vector<100x4xf32> to vector<98x4xf32>
    %11 = vector.extract_strided_slice %2 {offsets = [8, 0], sizes = [4, 64], strides = [1, 1]} : vector<12x64xf32> to vector<4x64xf32>
    %cst_5 = arith.constant dense<0.000000e+00> : vector<98x64xf32>
    %12 = tpu.matmul %10, %11, %cst_5 {dimension_numbers = #tpu.dot_dimension_numbers<[1], [0], [0], [1], [0, 0, 1, 1], [], []>} : vector<98x4xf32>, vector<4x64xf32>, vector<98x64xf32> -> vector<98x64xf32>
    %13 = arith.addf %9, %12 : vector<98x64xf32>
    %c0_6 = arith.constant 0 : index
    %c0_7 = arith.constant 0 : index
    %14 = vector.load %arg6[%c0_6, %c0_7] : memref<2x64xf32, #tpu.memory_space<vmem>>, vector<2x64xf32>
    %15 = vector.extract_strided_slice %14 {offsets = [0, 0], sizes = [1, 64], strides = [1, 1]} : vector<2x64xf32> to vector<1x64xf32>
    %16 = vector.broadcast %15 : vector<1x64xf32> to vector<98x64xf32>
    %17 = arith.mulf %13, %16 : vector<98x64xf32>
    %18 = vector.extract_strided_slice %14 {offsets = [1, 0], sizes = [1, 64], strides = [1, 1]} : vector<2x64xf32> to vector<1x64xf32>
    %19 = vector.broadcast %18 : vector<1x64xf32> to vector<98x64xf32>
    %20 = arith.addf %17, %19 : vector<98x64xf32>
    %cst_8 = arith.constant 0.000000e+00 : f32
    %21 = vector.broadcast %cst_8 : f32 to vector<98x64xf32>
    %22 = arith.maximumf %20, %21 : vector<98x64xf32>
    %c0_9 = arith.constant 0 : index
    %c0_10 = arith.constant 0 : index
    %23 = vector.load %arg2[%c0_9, %c0_10] : memref<51x98xf32, #tpu.memory_space<vmem>>, vector<51x98xf32>
    %cst_11 = arith.constant dense<0.000000e+00> : vector<51x64xf32>
    %24 = tpu.matmul %23, %22, %cst_11 {dimension_numbers = #tpu.dot_dimension_numbers<[1], [0], [0], [1], [0, 0, 1, 1], [], []>} : vector<51x98xf32>, vector<98x64xf32>, vector<51x64xf32> -> vector<51x64xf32>
    %c0_12 = arith.constant 0 : index
    %c0_13 = arith.constant 0 : index
    %25 = vector.load %arg7[%c0_12, %c0_13] : memref<320x256xf32, #tpu.memory_space<vmem>>, vector<320x256xf32>
    %26 = vector.extract_strided_slice %24 {offsets = [0, 0], sizes = [47, 64], strides = [1, 1]} : vector<51x64xf32> to vector<47x64xf32>
    %27 = vector.extract_strided_slice %25 {offsets = [0, 0], sizes = [64, 256], strides = [1, 1]} : vector<320x256xf32> to vector<64x256xf32>
    %cst_14 = arith.constant dense<0.000000e+00> : vector<47x256xf32>
    %28 = tpu.matmul %26, %27, %cst_14 {dimension_numbers = #tpu.dot_dimension_numbers<[1], [0], [0], [1], [0, 0, 1, 1], [], []>} : vector<47x64xf32>, vector<64x256xf32>, vector<47x256xf32> -> vector<47x256xf32>
    %29 = vector.extract_strided_slice %24 {offsets = [1, 0], sizes = [47, 64], strides = [1, 1]} : vector<51x64xf32> to vector<47x64xf32>
    %30 = vector.extract_strided_slice %25 {offsets = [64, 0], sizes = [64, 256], strides = [1, 1]} : vector<320x256xf32> to vector<64x256xf32>
    %cst_15 = arith.constant dense<0.000000e+00> : vector<47x256xf32>
    %31 = tpu.matmul %29, %30, %cst_15 {dimension_numbers = #tpu.dot_dimension_numbers<[1], [0], [0], [1], [0, 0, 1, 1], [], []>} : vector<47x64xf32>, vector<64x256xf32>, vector<47x256xf32> -> vector<47x256xf32>
    %32 = arith.addf %28, %31 : vector<47x256xf32>
    %33 = vector.extract_strided_slice %24 {offsets = [2, 0], sizes = [47, 64], strides = [1, 1]} : vector<51x64xf32> to vector<47x64xf32>
    %34 = vector.extract_strided_slice %25 {offsets = [128, 0], sizes = [64, 256], strides = [1, 1]} : vector<320x256xf32> to vector<64x256xf32>
    %cst_16 = arith.constant dense<0.000000e+00> : vector<47x256xf32>
    %35 = tpu.matmul %33, %34, %cst_16 {dimension_numbers = #tpu.dot_dimension_numbers<[1], [0], [0], [1], [0, 0, 1, 1], [], []>} : vector<47x64xf32>, vector<64x256xf32>, vector<47x256xf32> -> vector<47x256xf32>
    %36 = arith.addf %32, %35 : vector<47x256xf32>
    %37 = vector.extract_strided_slice %24 {offsets = [3, 0], sizes = [47, 64], strides = [1, 1]} : vector<51x64xf32> to vector<47x64xf32>
    %38 = vector.extract_strided_slice %25 {offsets = [192, 0], sizes = [64, 256], strides = [1, 1]} : vector<320x256xf32> to vector<64x256xf32>
    %cst_17 = arith.constant dense<0.000000e+00> : vector<47x256xf32>
    %39 = tpu.matmul %37, %38, %cst_17 {dimension_numbers = #tpu.dot_dimension_numbers<[1], [0], [0], [1], [0, 0, 1, 1], [], []>} : vector<47x64xf32>, vector<64x256xf32>, vector<47x256xf32> -> vector<47x256xf32>
    %40 = arith.addf %36, %39 : vector<47x256xf32>
    %41 = vector.extract_strided_slice %24 {offsets = [4, 0], sizes = [47, 64], strides = [1, 1]} : vector<51x64xf32> to vector<47x64xf32>
    %42 = vector.extract_strided_slice %25 {offsets = [256, 0], sizes = [64, 256], strides = [1, 1]} : vector<320x256xf32> to vector<64x256xf32>
    %cst_18 = arith.constant dense<0.000000e+00> : vector<47x256xf32>
    %43 = tpu.matmul %41, %42, %cst_18 {dimension_numbers = #tpu.dot_dimension_numbers<[1], [0], [0], [1], [0, 0, 1, 1], [], []>} : vector<47x64xf32>, vector<64x256xf32>, vector<47x256xf32> -> vector<47x256xf32>
    %44 = arith.addf %40, %43 : vector<47x256xf32>
    %c0_19 = arith.constant 0 : index
    %c0_20 = arith.constant 0 : index
    %45 = vector.load %arg8[%c0_19, %c0_20] : memref<2x256xf32, #tpu.memory_space<vmem>>, vector<2x256xf32>
    %46 = vector.extract_strided_slice %45 {offsets = [0, 0], sizes = [1, 256], strides = [1, 1]} : vector<2x256xf32> to vector<1x256xf32>
    %47 = vector.broadcast %46 : vector<1x256xf32> to vector<47x256xf32>
    %48 = arith.mulf %44, %47 : vector<47x256xf32>
    %49 = vector.extract_strided_slice %45 {offsets = [1, 0], sizes = [1, 256], strides = [1, 1]} : vector<2x256xf32> to vector<1x256xf32>
    %50 = vector.broadcast %49 : vector<1x256xf32> to vector<47x256xf32>
    %51 = arith.addf %48, %50 : vector<47x256xf32>
    %cst_21 = arith.constant 0.000000e+00 : f32
    %52 = vector.broadcast %cst_21 : f32 to vector<47x256xf32>
    %53 = arith.maximumf %51, %52 : vector<47x256xf32>
    %c0_22 = arith.constant 0 : index
    %c0_23 = arith.constant 0 : index
    %54 = vector.load %arg3[%c0_22, %c0_23] : memref<23x47xf32, #tpu.memory_space<vmem>>, vector<23x47xf32>
    %cst_24 = arith.constant dense<0.000000e+00> : vector<23x256xf32>
    %55 = tpu.matmul %54, %53, %cst_24 {dimension_numbers = #tpu.dot_dimension_numbers<[1], [0], [0], [1], [0, 0, 1, 1], [], []>} : vector<23x47xf32>, vector<47x256xf32>, vector<23x256xf32> -> vector<23x256xf32>
    %c0_25 = arith.constant 0 : index
    %c0_26 = arith.constant 0 : index
    %56 = vector.load %arg9[%c0_25, %c0_26] : memref<768x256xf32, #tpu.memory_space<vmem>>, vector<768x256xf32>
    %57 = vector.extract_strided_slice %55 {offsets = [0, 0], sizes = [21, 256], strides = [1, 1]} : vector<23x256xf32> to vector<21x256xf32>
    %58 = vector.extract_strided_slice %56 {offsets = [0, 0], sizes = [256, 256], strides = [1, 1]} : vector<768x256xf32> to vector<256x256xf32>
    %cst_27 = arith.constant dense<0.000000e+00> : vector<21x256xf32>
    %59 = tpu.matmul %57, %58, %cst_27 {dimension_numbers = #tpu.dot_dimension_numbers<[1], [0], [0], [1], [0, 0, 1, 1], [], []>} : vector<21x256xf32>, vector<256x256xf32>, vector<21x256xf32> -> vector<21x256xf32>
    %60 = vector.extract_strided_slice %55 {offsets = [1, 0], sizes = [21, 256], strides = [1, 1]} : vector<23x256xf32> to vector<21x256xf32>
    %61 = vector.extract_strided_slice %56 {offsets = [256, 0], sizes = [256, 256], strides = [1, 1]} : vector<768x256xf32> to vector<256x256xf32>
    %cst_28 = arith.constant dense<0.000000e+00> : vector<21x256xf32>
    %62 = tpu.matmul %60, %61, %cst_28 {dimension_numbers = #tpu.dot_dimension_numbers<[1], [0], [0], [1], [0, 0, 1, 1], [], []>} : vector<21x256xf32>, vector<256x256xf32>, vector<21x256xf32> -> vector<21x256xf32>
    %63 = arith.addf %59, %62 : vector<21x256xf32>
    %64 = vector.extract_strided_slice %55 {offsets = [2, 0], sizes = [21, 256], strides = [1, 1]} : vector<23x256xf32> to vector<21x256xf32>
    %65 = vector.extract_strided_slice %56 {offsets = [512, 0], sizes = [256, 256], strides = [1, 1]} : vector<768x256xf32> to vector<256x256xf32>
    %cst_29 = arith.constant dense<0.000000e+00> : vector<21x256xf32>
    %66 = tpu.matmul %64, %65, %cst_29 {dimension_numbers = #tpu.dot_dimension_numbers<[1], [0], [0], [1], [0, 0, 1, 1], [], []>} : vector<21x256xf32>, vector<256x256xf32>, vector<21x256xf32> -> vector<21x256xf32>
    %67 = arith.addf %63, %66 : vector<21x256xf32>
    %c0_30 = arith.constant 0 : index
    %c0_31 = arith.constant 0 : index
    %68 = vector.load %arg10[%c0_30, %c0_31] : memref<2x256xf32, #tpu.memory_space<vmem>>, vector<2x256xf32>
    %69 = vector.extract_strided_slice %68 {offsets = [0, 0], sizes = [1, 256], strides = [1, 1]} : vector<2x256xf32> to vector<1x256xf32>
    %70 = vector.broadcast %69 : vector<1x256xf32> to vector<21x256xf32>
    %71 = arith.mulf %67, %70 : vector<21x256xf32>
    %72 = vector.extract_strided_slice %68 {offsets = [1, 0], sizes = [1, 256], strides = [1, 1]} : vector<2x256xf32> to vector<1x256xf32>
    %73 = vector.broadcast %72 : vector<1x256xf32> to vector<21x256xf32>
    %74 = arith.addf %71, %73 : vector<21x256xf32>
    %cst_32 = arith.constant 0.000000e+00 : f32
    %75 = vector.broadcast %cst_32 : f32 to vector<21x256xf32>
    %76 = arith.maximumf %74, %75 : vector<21x256xf32>
    %c0_33 = arith.constant 0 : index
    %c0_34 = arith.constant 0 : index
    %77 = vector.load %arg11[%c0_33, %c0_34] : memref<768x128xf32, #tpu.memory_space<vmem>>, vector<768x128xf32>
    %78 = vector.extract_strided_slice %76 {offsets = [0, 0], sizes = [19, 256], strides = [1, 1]} : vector<21x256xf32> to vector<19x256xf32>
    %79 = vector.extract_strided_slice %77 {offsets = [0, 0], sizes = [256, 128], strides = [1, 1]} : vector<768x128xf32> to vector<256x128xf32>
    %cst_35 = arith.constant dense<0.000000e+00> : vector<19x128xf32>
    %80 = tpu.matmul %78, %79, %cst_35 {dimension_numbers = #tpu.dot_dimension_numbers<[1], [0], [0], [1], [0, 0, 1, 1], [], []>} : vector<19x256xf32>, vector<256x128xf32>, vector<19x128xf32> -> vector<19x128xf32>
    %81 = vector.extract_strided_slice %76 {offsets = [1, 0], sizes = [19, 256], strides = [1, 1]} : vector<21x256xf32> to vector<19x256xf32>
    %82 = vector.extract_strided_slice %77 {offsets = [256, 0], sizes = [256, 128], strides = [1, 1]} : vector<768x128xf32> to vector<256x128xf32>
    %cst_36 = arith.constant dense<0.000000e+00> : vector<19x128xf32>
    %83 = tpu.matmul %81, %82, %cst_36 {dimension_numbers = #tpu.dot_dimension_numbers<[1], [0], [0], [1], [0, 0, 1, 1], [], []>} : vector<19x256xf32>, vector<256x128xf32>, vector<19x128xf32> -> vector<19x128xf32>
    %84 = arith.addf %80, %83 : vector<19x128xf32>
    %85 = vector.extract_strided_slice %76 {offsets = [2, 0], sizes = [19, 256], strides = [1, 1]} : vector<21x256xf32> to vector<19x256xf32>
    %86 = vector.extract_strided_slice %77 {offsets = [512, 0], sizes = [256, 128], strides = [1, 1]} : vector<768x128xf32> to vector<256x128xf32>
    %cst_37 = arith.constant dense<0.000000e+00> : vector<19x128xf32>
    %87 = tpu.matmul %85, %86, %cst_37 {dimension_numbers = #tpu.dot_dimension_numbers<[1], [0], [0], [1], [0, 0, 1, 1], [], []>} : vector<19x256xf32>, vector<256x128xf32>, vector<19x128xf32> -> vector<19x128xf32>
    %88 = arith.addf %84, %87 : vector<19x128xf32>
    %c0_38 = arith.constant 0 : index
    %c0_39 = arith.constant 0 : index
    %89 = vector.load %arg12[%c0_38, %c0_39] : memref<2x128xf32, #tpu.memory_space<vmem>>, vector<2x128xf32>
    %90 = vector.extract_strided_slice %89 {offsets = [0, 0], sizes = [1, 128], strides = [1, 1]} : vector<2x128xf32> to vector<1x128xf32>
    %91 = vector.broadcast %90 : vector<1x128xf32> to vector<19x128xf32>
    %92 = arith.mulf %88, %91 : vector<19x128xf32>
    %93 = vector.extract_strided_slice %89 {offsets = [1, 0], sizes = [1, 128], strides = [1, 1]} : vector<2x128xf32> to vector<1x128xf32>
    %94 = vector.broadcast %93 : vector<1x128xf32> to vector<19x128xf32>
    %95 = arith.addf %92, %94 : vector<19x128xf32>
    %cst_40 = arith.constant 0.000000e+00 : f32
    %96 = vector.broadcast %cst_40 : f32 to vector<19x128xf32>
    %97 = arith.maximumf %95, %96 : vector<19x128xf32>
    %c0_41 = arith.constant 0 : index
    %c0_42 = arith.constant 0 : index
    %98 = vector.load %arg4[%c0_41, %c0_42] : memref<9x19xf32, #tpu.memory_space<vmem>>, vector<9x19xf32>
    %cst_43 = arith.constant dense<0.000000e+00> : vector<9x128xf32>
    %99 = tpu.matmul %98, %97, %cst_43 {dimension_numbers = #tpu.dot_dimension_numbers<[1], [0], [0], [1], [0, 0, 1, 1], [], []>} : vector<9x19xf32>, vector<19x128xf32>, vector<9x128xf32> -> vector<9x128xf32>
    %c0_44 = arith.constant 0 : index
    %c0_45 = arith.constant 0 : index
    %100 = vector.load %arg13[%c0_44, %c0_45] : memref<1152x512xf32, #tpu.memory_space<vmem>>, vector<1152x512xf32>
    %101 = vector.extract_strided_slice %99 {offsets = [0, 0], sizes = [1, 128], strides = [1, 1]} : vector<9x128xf32> to vector<1x128xf32>
    %102 = vector.extract_strided_slice %100 {offsets = [0, 0], sizes = [128, 512], strides = [1, 1]} : vector<1152x512xf32> to vector<128x512xf32>
    %cst_46 = arith.constant dense<0.000000e+00> : vector<1x512xf32>
    %103 = tpu.matmul %101, %102, %cst_46 {dimension_numbers = #tpu.dot_dimension_numbers<[1], [0], [0], [1], [0, 0, 1, 1], [], []>} : vector<1x128xf32>, vector<128x512xf32>, vector<1x512xf32> -> vector<1x512xf32>
    %104 = vector.extract_strided_slice %99 {offsets = [1, 0], sizes = [1, 128], strides = [1, 1]} : vector<9x128xf32> to vector<1x128xf32>
    %105 = vector.extract_strided_slice %100 {offsets = [128, 0], sizes = [128, 512], strides = [1, 1]} : vector<1152x512xf32> to vector<128x512xf32>
    %cst_47 = arith.constant dense<0.000000e+00> : vector<1x512xf32>
    %106 = tpu.matmul %104, %105, %cst_47 {dimension_numbers = #tpu.dot_dimension_numbers<[1], [0], [0], [1], [0, 0, 1, 1], [], []>} : vector<1x128xf32>, vector<128x512xf32>, vector<1x512xf32> -> vector<1x512xf32>
    %107 = arith.addf %103, %106 : vector<1x512xf32>
    %108 = vector.extract_strided_slice %99 {offsets = [2, 0], sizes = [1, 128], strides = [1, 1]} : vector<9x128xf32> to vector<1x128xf32>
    %109 = vector.extract_strided_slice %100 {offsets = [256, 0], sizes = [128, 512], strides = [1, 1]} : vector<1152x512xf32> to vector<128x512xf32>
    %cst_48 = arith.constant dense<0.000000e+00> : vector<1x512xf32>
    %110 = tpu.matmul %108, %109, %cst_48 {dimension_numbers = #tpu.dot_dimension_numbers<[1], [0], [0], [1], [0, 0, 1, 1], [], []>} : vector<1x128xf32>, vector<128x512xf32>, vector<1x512xf32> -> vector<1x512xf32>
    %111 = arith.addf %107, %110 : vector<1x512xf32>
    %112 = vector.extract_strided_slice %99 {offsets = [3, 0], sizes = [1, 128], strides = [1, 1]} : vector<9x128xf32> to vector<1x128xf32>
    %113 = vector.extract_strided_slice %100 {offsets = [384, 0], sizes = [128, 512], strides = [1, 1]} : vector<1152x512xf32> to vector<128x512xf32>
    %cst_49 = arith.constant dense<0.000000e+00> : vector<1x512xf32>
    %114 = tpu.matmul %112, %113, %cst_49 {dimension_numbers = #tpu.dot_dimension_numbers<[1], [0], [0], [1], [0, 0, 1, 1], [], []>} : vector<1x128xf32>, vector<128x512xf32>, vector<1x512xf32> -> vector<1x512xf32>
    %115 = arith.addf %111, %114 : vector<1x512xf32>
    %116 = vector.extract_strided_slice %99 {offsets = [4, 0], sizes = [1, 128], strides = [1, 1]} : vector<9x128xf32> to vector<1x128xf32>
    %117 = vector.extract_strided_slice %100 {offsets = [512, 0], sizes = [128, 512], strides = [1, 1]} : vector<1152x512xf32> to vector<128x512xf32>
    %cst_50 = arith.constant dense<0.000000e+00> : vector<1x512xf32>
    %118 = tpu.matmul %116, %117, %cst_50 {dimension_numbers = #tpu.dot_dimension_numbers<[1], [0], [0], [1], [0, 0, 1, 1], [], []>} : vector<1x128xf32>, vector<128x512xf32>, vector<1x512xf32> -> vector<1x512xf32>
    %119 = arith.addf %115, %118 : vector<1x512xf32>
    %120 = vector.extract_strided_slice %99 {offsets = [5, 0], sizes = [1, 128], strides = [1, 1]} : vector<9x128xf32> to vector<1x128xf32>
    %121 = vector.extract_strided_slice %100 {offsets = [640, 0], sizes = [128, 512], strides = [1, 1]} : vector<1152x512xf32> to vector<128x512xf32>
    %cst_51 = arith.constant dense<0.000000e+00> : vector<1x512xf32>
    %122 = tpu.matmul %120, %121, %cst_51 {dimension_numbers = #tpu.dot_dimension_numbers<[1], [0], [0], [1], [0, 0, 1, 1], [], []>} : vector<1x128xf32>, vector<128x512xf32>, vector<1x512xf32> -> vector<1x512xf32>
    %123 = arith.addf %119, %122 : vector<1x512xf32>
    %124 = vector.extract_strided_slice %99 {offsets = [6, 0], sizes = [1, 128], strides = [1, 1]} : vector<9x128xf32> to vector<1x128xf32>
    %125 = vector.extract_strided_slice %100 {offsets = [768, 0], sizes = [128, 512], strides = [1, 1]} : vector<1152x512xf32> to vector<128x512xf32>
    %cst_52 = arith.constant dense<0.000000e+00> : vector<1x512xf32>
    %126 = tpu.matmul %124, %125, %cst_52 {dimension_numbers = #tpu.dot_dimension_numbers<[1], [0], [0], [1], [0, 0, 1, 1], [], []>} : vector<1x128xf32>, vector<128x512xf32>, vector<1x512xf32> -> vector<1x512xf32>
    %127 = arith.addf %123, %126 : vector<1x512xf32>
    %128 = vector.extract_strided_slice %99 {offsets = [7, 0], sizes = [1, 128], strides = [1, 1]} : vector<9x128xf32> to vector<1x128xf32>
    %129 = vector.extract_strided_slice %100 {offsets = [896, 0], sizes = [128, 512], strides = [1, 1]} : vector<1152x512xf32> to vector<128x512xf32>
    %cst_53 = arith.constant dense<0.000000e+00> : vector<1x512xf32>
    %130 = tpu.matmul %128, %129, %cst_53 {dimension_numbers = #tpu.dot_dimension_numbers<[1], [0], [0], [1], [0, 0, 1, 1], [], []>} : vector<1x128xf32>, vector<128x512xf32>, vector<1x512xf32> -> vector<1x512xf32>
    %131 = arith.addf %127, %130 : vector<1x512xf32>
    %132 = vector.extract_strided_slice %99 {offsets = [8, 0], sizes = [1, 128], strides = [1, 1]} : vector<9x128xf32> to vector<1x128xf32>
    %133 = vector.extract_strided_slice %100 {offsets = [1024, 0], sizes = [128, 512], strides = [1, 1]} : vector<1152x512xf32> to vector<128x512xf32>
    %cst_54 = arith.constant dense<0.000000e+00> : vector<1x512xf32>
    %134 = tpu.matmul %132, %133, %cst_54 {dimension_numbers = #tpu.dot_dimension_numbers<[1], [0], [0], [1], [0, 0, 1, 1], [], []>} : vector<1x128xf32>, vector<128x512xf32>, vector<1x512xf32> -> vector<1x512xf32>
    %135 = arith.addf %131, %134 : vector<1x512xf32>
    %c0_55 = arith.constant 0 : index
    %c0_56 = arith.constant 0 : index
    %136 = vector.load %arg14[%c0_55, %c0_56] : memref<2x512xf32, #tpu.memory_space<vmem>>, vector<2x512xf32>
    %137 = vector.extract_strided_slice %136 {offsets = [0, 0], sizes = [1, 512], strides = [1, 1]} : vector<2x512xf32> to vector<1x512xf32>
    %138 = arith.mulf %135, %137 : vector<1x512xf32>
    %139 = vector.extract_strided_slice %136 {offsets = [1, 0], sizes = [1, 512], strides = [1, 1]} : vector<2x512xf32> to vector<1x512xf32>
    %140 = arith.addf %138, %139 : vector<1x512xf32>
    %cst_57 = arith.constant 0.000000e+00 : f32
    %141 = vector.broadcast %cst_57 : f32 to vector<1x512xf32>
    %142 = arith.maximumf %140, %141 : vector<1x512xf32>
    %c0_58 = arith.constant 0 : index
    %c0_59 = arith.constant 0 : index
    %143 = vector.load %arg15[%c0_58, %c0_59] : memref<512x5xf32, #tpu.memory_space<vmem>>, vector<512x5xf32>
    %cst_60 = arith.constant dense<0.000000e+00> : vector<1x5xf32>
    %144 = tpu.matmul %142, %143, %cst_60 {dimension_numbers = #tpu.dot_dimension_numbers<[1], [0], [0], [1], [0, 0, 1, 1], [], []>} : vector<1x512xf32>, vector<512x5xf32>, vector<1x5xf32> -> vector<1x5xf32>
    %c0_61 = arith.constant 0 : index
    %c0_62 = arith.constant 0 : index
    %145 = vector.load %arg16[%c0_61, %c0_62] : memref<1x5xf32, #tpu.memory_space<vmem>>, vector<1x5xf32>
    %146 = arith.addf %144, %145 : vector<1x5xf32>
    %c0_63 = arith.constant 0 : index
    %c0_64 = arith.constant 0 : index
    %c0_65 = arith.constant 0 : index
    %147 = vector.load %arg17[%c0_63, %c0_64, %c0_65] : memref<1x1x5xf32, #tpu.memory_space<vmem>>, vector<1x1x5xf32>
    %148 = vector.shape_cast %147 : vector<1x1x5xf32> to vector<1x5xf32>
    %149 = vector.shape_cast %146 : vector<1x5xf32> to vector<1x1x5xf32>
    tpu.vector_store %arg17[%c0_63, %c0_64, %c0_65], %149 {strides = array<i32>} : memref<1x1x5xf32, #tpu.memory_space<vmem>>, vector<1x1x5xf32>,
    return
  }
  func.func @transform_0(%arg0: i32) -> (i32, i32, i32) {
    %c0_i32 = arith.constant 0 : i32
    %c0_i32_0 = arith.constant 0 : i32
    %c0_i32_1 = arith.constant 0 : i32
    return %arg0, %c0_i32, %c0_i32_0 : i32, i32, i32
  }
  func.func @transform_1(%arg0: i32) -> (i32, i32) {
    %c0_i32 = arith.constant 0 : i32
    %c0_i32_0 = arith.constant 0 : i32
    %c0_i32_1 = arith.constant 0 : i32
    return %c0_i32, %c0_i32_0 : i32, i32
  }
  func.func @transform_2(%arg0: i32) -> (i32, i32) {
    %c0_i32 = arith.constant 0 : i32
    %c0_i32_0 = arith.constant 0 : i32
    %c0_i32_1 = arith.constant 0 : i32
    return %c0_i32, %c0_i32_0 : i32, i32
  }
  func.func @transform_3(%arg0: i32) -> (i32, i32) {
    %c0_i32 = arith.constant 0 : i32
    %c0_i32_0 = arith.constant 0 : i32
    %c0_i32_1 = arith.constant 0 : i32
    return %c0_i32, %c0_i32_0 : i32, i32
  }
  func.func @transform_4(%arg0: i32) -> (i32, i32) {
    %c0_i32 = arith.constant 0 : i32
    %c0_i32_0 = arith.constant 0 : i32
    %c0_i32_1 = arith.constant 0 : i32
    return %c0_i32, %c0_i32_0 : i32, i32
  }
  func.func @transform_5(%arg0: i32) -> (i32, i32) {
    %c0_i32 = arith.constant 0 : i32
    %c0_i32_0 = arith.constant 0 : i32
    %c0_i32_1 = arith.constant 0 : i32
    return %c0_i32, %c0_i32_0 : i32, i32
  }
  func.func @transform_6(%arg0: i32) -> (i32, i32) {
    %c0_i32 = arith.constant 0 : i32
    %c0_i32_0 = arith.constant 0 : i32
    %c0_i32_1 = arith.constant 0 : i32
    return %c0_i32, %c0_i32_0 : i32, i32
  }
  func.func @transform_7(%arg0: i32) -> (i32, i32) {
    %c0_i32 = arith.constant 0 : i32
    %c0_i32_0 = arith.constant 0 : i32
    %c0_i32_1 = arith.constant 0 : i32
    return %c0_i32, %c0_i32_0 : i32, i32
  }
  func.func @transform_8(%arg0: i32) -> (i32, i32) {
    %c0_i32 = arith.constant 0 : i32
    %c0_i32_0 = arith.constant 0 : i32
    %c0_i32_1 = arith.constant 0 : i32
    return %c0_i32, %c0_i32_0 : i32, i32
  }
  func.func @transform_9(%arg0: i32) -> (i32, i32) {
    %c0_i32 = arith.constant 0 : i32
    %c0_i32_0 = arith.constant 0 : i32
    %c0_i32_1 = arith.constant 0 : i32
    return %c0_i32, %c0_i32_0 : i32, i32
  }
  func.func @transform_10(%arg0: i32) -> (i32, i32) {
    %c0_i32 = arith.constant 0 : i32
    %c0_i32_0 = arith.constant 0 : i32
    %c0_i32_1 = arith.constant 0 : i32
    return %c0_i32, %c0_i32_0 : i32, i32
  }
  func.func @transform_11(%arg0: i32) -> (i32, i32) {
    %c0_i32 = arith.constant 0 : i32
    %c0_i32_0 = arith.constant 0 : i32
    %c0_i32_1 = arith.constant 0 : i32
    return %c0_i32, %c0_i32_0 : i32, i32
  }
  func.func @transform_12(%arg0: i32) -> (i32, i32) {
    %c0_i32 = arith.constant 0 : i32
    %c0_i32_0 = arith.constant 0 : i32
    %c0_i32_1 = arith.constant 0 : i32
    return %c0_i32, %c0_i32_0 : i32, i32
  }
  func.func @transform_13(%arg0: i32) -> (i32, i32) {
    %c0_i32 = arith.constant 0 : i32
    %c0_i32_0 = arith.constant 0 : i32
    %c0_i32_1 = arith.constant 0 : i32
    return %c0_i32, %c0_i32_0 : i32, i32
  }
  func.func @transform_14(%arg0: i32) -> (i32, i32) {
    %c0_i32 = arith.constant 0 : i32
    %c0_i32_0 = arith.constant 0 : i32
    %c0_i32_1 = arith.constant 0 : i32
    return %c0_i32, %c0_i32_0 : i32, i32
  }
  func.func @transform_15(%arg0: i32) -> (i32, i32) {
    %c0_i32 = arith.constant 0 : i32
    %c0_i32_0 = arith.constant 0 : i32
    %c0_i32_1 = arith.constant 0 : i32
    return %c0_i32, %c0_i32_0 : i32, i32
  }
  func.func @transform_16(%arg0: i32) -> (i32, i32, i32) {
    %c0_i32 = arith.constant 0 : i32
    %c0_i32_0 = arith.constant 0 : i32
    %c0_i32_1 = arith.constant 0 : i32
    return %arg0, %c0_i32, %c0_i32_0 : i32, i32, i32
  }
}

</mosaic_0001>

<bundles_post_ra>
// kernel: cnn1d_forward.1
= control target key start
LH: loop header
LB: loop body
LE: loop exit
PB: predicated region body
PF: predicated region fallthrough
CT: control target
= control target key end

     0   :  { %s9377_s0 = inlined_call_operand.vmem [shape: f32[2,100,4], index: 0, kind: input, shape index: {}]   ;;  %s9378_s1 = inlined_call_operand.vmem [shape: f32[51,98], index: 1, kind: input, shape index: {}]   ;;  %s9379_s2 = inlined_call_operand.vmem [shape: f32[23,47], index: 2, kind: input, shape index: {}]   ;;  %s9380_s3 = inlined_call_operand.vmem [shape: f32[9,19], index: 3, kind: input, shape index: {}]   ;;  %s9381_s4 = inlined_call_operand.hbm [shape: f32[12,64], index: 4, kind: input, shape index: {}]   ;;  %s9382_s5 = inlined_call_operand.hbm [shape: f32[2,64], index: 5, kind: input, shape index: {}]   ;;  %s9383_s6 = inlined_call_operand.hbm [shape: f32[320,256], index: 6, kind: input, shape index: {}]   ;;  %s9384_s7 = inlined_call_operand.hbm [shape: f32[2,256], index: 7, kind: input, shape index: {}]   ;;  %s9385_s8 = inlined_call_operand.hbm [shape: f32[768,256], index: 8, kind: input, shape index: {}]   ;;  %s9386_s9 = inlined_call_operand.hbm [shape: f32[2,256], index: 9, kind: input, shape index: {}]   ;;  %s9387_s10 = inlined_call_operand.hbm [shape: f32[768,128], index: 10, kind: input, shape index: {}]   ;;  %s9388_s11 = inlined_call_operand.hbm [shape: f32[2,128], index: 11, kind: input, shape index: {}]   ;;  %s9389_s12 = inlined_call_operand.hbm [shape: f32[1152,512], index: 12, kind: input, shape index: {}]   ;;  %s9390_s13 = inlined_call_operand.hbm [shape: f32[2,512], index: 13, kind: input, shape index: {}]   ;;  %s9391_s14 = inlined_call_operand.vmem [shape: f32[512,5], index: 14, kind: input, shape index: {}]   ;;  %s9392_s15 = inlined_call_operand.hbm [shape: f32[1,5], index: 15, kind: input, shape index: {}]   ;;  %s9393_s16 = inlined_call_operand.hbm [shape: f32[2,1,5], index: 16, kind: output, shape index: {}]  }
   0x1   :  { %9409 = sst [smem:[#allocation36_spill]] %s9377_s0 }
   0x2   :  { %9410 = sst [smem:[#allocation37_spill]] %s9381_s4 }
   0x3   :  { %9411 = sst [smem:[#allocation38_spill]] %s9382_s5 }
   0x4   :  { %9412 = sst [smem:[#allocation39_spill]] %s9384_s7 }
   0x5   :  { %9413 = sst [smem:[#allocation40_spill]] %s9386_s9 }
   0x6   :  { %9414 = sst [smem:[#allocation41_spill]] %s9393_s16 }
   0x7   :  { %21 = vsyncpa [#allocation3], 0 }
   0x8   :  { %22 = vsyncpa [#allocation6], 0 }
   0x9   :  { %23 = vsyncpa [#allocation9], 0 }
   0xa   :  { %24 = vsyncpa [#allocation12], 0 }
   0xb   :  { %25 = vsyncpa [#allocation15], 0 }
   0xc   :  { %26 = vsyncpa [#allocation18], 0 }
   0xd   :  { %27 = vsyncpa [#allocation4], 0 }
   0xe   :  { %29 = vsyncpa [#allocation4 + $0x1], 0  ;;  %s8102_s21 = smov 0   ;;  %s8104_s22 = smov 0  }
   0xf   :  { %s8106_s23 = smov 0   ;;  %s8108_s24 = smov 0  }
  0x10 LB: > { %9415 = sst [smem:[#allocation28_spill]] %s7981_s21  ;;  %s8123_s25 = sadd.s32 4294967295, %s7993_s24   ;;  %s7993_s24 = sphi %s8108_s24, %s9456_s24   ;;  %s7989_s23 = sphi %s8106_s23, %s9459_s23   ;;  %s7985_s22 = sphi %s8104_s22, %s9458_s22   ;;  %s7981_s21 = sphi %s8102_s21, %s9457_s21  }
  0x11   : > { %9416 = sst [smem:[#allocation29_spill]] %s7985_s22  ;;  %s5693_s26 = sadd.s32 4294967294, %s7993_s24  }
  0x12   : > { %9417 = sst [smem:[#allocation30_spill]] %s7989_s23  ;;  %s8127_s27 = sadd.s32 1, %s7993_s24  }
  0x13   : > { %9418 = sst [smem:[#allocation31_spill]] %s7993_s24  ;;  %s383_s28 = sadd.s32 1, %s7989_s23 }
  0x14   : > { %9419 = sst [smem:[#allocation32_spill]] %s8127_s27  ;;  %s380_s29 = ssub.s32 %s7993_s24, %s8127_s27 }
  0x15   : > { %p393_p0 = scmp.ne.s32.totalorder %s7989_s23, %s7985_s22  ;;  %p381_p1 = scmp.eq.s32.totalorder %s380_s29, 0 }
  0x16   : > { %p394_p2 = scmp.eq.s32.totalorder %s8123_s25, 1  ;;  %p399_p3 = scmp.ne.s32.totalorder %s7985_s22, %s7981_s21 }
  0x17   : > { %p400_p4 = scmp.eq.s32.totalorder %s5693_s26, 1  ;;  %p5694_p7 = scmp.ge.s32.totalorder %s7993_s24, 1 }
  0x18   : > { %s8138_s30 = scalar_select %p381_p1, %s7989_s23, %s383_s28  }
  0x19   : > { %p8140_p5 = por %p394_p2, %p393_p0  ;;  %p8144_p6 = por %p400_p4, %p399_p3 }
  0x1a   : > { %9420 = sst [smem:[#allocation33_spill]] %s8138_s30  ;;  %p407_p8 = scmp.lt.s32.totalorder %s7993_s24, 3 }
  0x1b   : > { %s9421_s0 = scalar_select %p8140_p5, 1, 0 }
  0x1c   : > { %s9423_s17 = scalar_select %p8144_p6, 1, 0 }
  0x1d   : > { %9422 = sst [smem:[#allocation34_spill]] %s9421_s0  ;;  %p9401_p9 = scmp.eq.s32.totalorder %s8123_s25, 0 }
  0x1e   : > { %9424 = sst [smem:[#allocation35_spill]] %s9423_s17  ;;  %p8151_p10 = pnand %p5694_p7, %p407_p8 }
  0x1f   : > { %s7995_s19 = smov [#allocation5]   ;;  %s7996_s26 = smov [#allocation8]  }
  0x20   : > { %s9425_s18 = scalar_select %p8151_p10, 1, 0 }
  0x21   : > { %s442_s20 = sshll.u32 %s7995_s19, 4  ;;  %p7485_p11 = pneg %p8151_p10  ;;  %s443_s20 = int_to_ptr.vmem [resolvable:$true] %s442_s20 }
  0x22   : > { %s466_s28 = sshll.u32 %s7996_s26, 4  ;;  %s7997_s30 = smov [#allocation11]   ;;  %s8163_s28 = int_to_ptr.vmem [resolvable:$true] %s466_s28 }
  0x23   : > { %p8159_p12 = pnand %p9401_p9, %p7485_p11  ;;  %s490_s23 = sshll.u32 %s7997_s30, 4  ;;  %s8165_s23 = int_to_ptr.vmem [resolvable:$true] %s490_s23 }
  0x24   : > { %s9427_s5 = sld [smem:[#allocation38_spill]] }
  0x25   : > { %p8175_p0 = pneg %p8159_p12 }
  0x2a   : > { %s7599_s19 = scalar_lea.hbm %s9427_s5, 32 }
  0x2b   : > { %p7600_p13 = scmp.ne.s32.totalorder %s9427_s5, %s7599_s19  ;;  %p7606_p3 = scmp.lt.u32.totalorder %s7599_s19, %s9427_s5 }
  0x2d   : > { %p7602_p1 = pnand %p8175_p0, %p7600_p13 }
  0x2f   : > { %p7603_p2 = pneg %p7602_p1 }
  0x31   : > { %p7608_p4 = pnand %p7606_p3, %p7603_p2 }
  0x33   : > { %7611 = shalt.err (!%p7608_p4)
}
  0x34   : > { %s7612_s27 = scalar_lea.vmem %s443_s20, 32  ;;  %p7620_p9 = scmp.lt.s32.totalorder %s443_s20, %s443_s20 }
  0x35   : > { %p7613_p7 = scmp.ne.s32.totalorder %s443_s20, %s7612_s27  ;;  %p7621_p6 = scmp.lt.s32.totalorder %s7612_s27, %s7612_s27 }
  0x37   : > { %p7615_p8 = pnand %p7613_p7, %p8175_p0  ;;  %p7622_p5 = por %p7621_p6, %p7620_p9 }
  0x39   : > { %p7616_p11 = pneg %p7615_p8 }
  0x3b   : > { %p7623_p10 = pnand %p7622_p5, %p7616_p11 }
  0x3d   : > { %7626 = shalt.err (!%p7623_p10)
}
  0x3e   : > { %7491 = dma.hbm_to_vmem [thread:$0]  (!%p8159_p12), %s9427_s5, 32, %s443_s20, [#allocation6]  }
  0x3f   : > { %s9429_s7 = sld [smem:[#allocation39_spill]] }
  0x45   : > { %s7627_s19 = scalar_lea.hbm %s9429_s7, 64 }
  0x46   : > { %p7628_p13 = scmp.ne.s32.totalorder %s9429_s7, %s7627_s19  ;;  %p7634_p5 = scmp.lt.u32.totalorder %s7627_s19, %s9429_s7 }
  0x48   : > { %p7630_p1 = pnand %p7628_p13, %p8175_p0 }
  0x4a   : > { %p7631_p6 = pneg %p7630_p1 }
  0x4c   : > { %p7636_p9 = pnand %p7634_p5, %p7631_p6 }
  0x4e   : > { %7639 = shalt.err (!%p7636_p9)
}
  0x4f   : > { %s7640_s20 = scalar_lea.vmem %s8163_s28, 64  ;;  %p7648_p4 = scmp.lt.s32.totalorder %s8163_s28, %s8163_s28 }
  0x50   : > { %p7641_p10 = scmp.ne.s32.totalorder %s8163_s28, %s7640_s20  ;;  %p7649_p7 = scmp.lt.s32.totalorder %s7640_s20, %s7640_s20 }
  0x52   : > { %p7643_p2 = pnand %p7641_p10, %p8175_p0  ;;  %p7650_p8 = por %p7649_p7, %p7648_p4 }
  0x54   : > { %p7644_p3 = pneg %p7643_p2 }
  0x56   : > { %p7651_p11 = pnand %p7650_p8, %p7644_p3 }
  0x58   : > { %7654 = shalt.err (!%p7651_p11)
}
  0x59   : > { %7497 = dma.hbm_to_vmem [thread:$0]  (!%p8159_p12), %s9429_s7, 64, %s8163_s28, [#allocation9]  }
  0x5a   : > { %s9430_s9 = sld [smem:[#allocation40_spill]] }
  0x60   : > { %s7655_s16 = scalar_lea.hbm %s9430_s9, 64 }
  0x61   : > { %p7656_p13 = scmp.ne.s32.totalorder %s9430_s9, %s7655_s16  ;;  %p7662_p5 = scmp.lt.u32.totalorder %s7655_s16, %s9430_s9 }
  0x63   : > { %p7658_p1 = pnand %p7656_p13, %p8175_p0 }
  0x65   : > { %p7659_p6 = pneg %p7658_p1 }
  0x67   : > { %p7664_p9 = pnand %p7662_p5, %p7659_p6 }
  0x69   : > { %7667 = shalt.err (!%p7664_p9)
}
  0x6a   : > { %s7668_s28 = scalar_lea.vmem %s8165_s23, 64  ;;  %p7676_p4 = scmp.lt.s32.totalorder %s8165_s23, %s8165_s23 }
  0x6b   : > { %p7669_p10 = scmp.ne.s32.totalorder %s8165_s23, %s7668_s28  ;;  %p7677_p7 = scmp.lt.s32.totalorder %s7668_s28, %s7668_s28 }
  0x6d   : > { %p7671_p2 = pnand %p7669_p10, %p8175_p0  ;;  %p7678_p8 = por %p7677_p7, %p7676_p4 }
  0x6f   : > { %p7672_p3 = pneg %p7671_p2 }
  0x71   : > { %p7679_p11 = pnand %p7678_p8, %p7672_p3 }
  0x73   : > { %7682 = shalt.err (!%p7679_p11)
}
  0x74   : > { %7503 = dma.hbm_to_vmem [thread:$0]  (!%p8159_p12), %s9430_s9, 64, %s8165_s23, [#allocation12]  }
  0x75   : > { %s7998_s0 = smov [#allocation14]   ;;  %s7999_s24 = smov [#allocation17]  }
  0x76   : > { %s514_s21 = sshll.u32 %s7998_s0, 4  ;;  %s538_s16 = sshll.u32 %s7999_s24, 4  ;;  %s515_s21 = int_to_ptr.vmem [resolvable:$true] %s514_s21  ;;  %s539_s16 = int_to_ptr.vmem [resolvable:$true] %s538_s16 }
  0x77   : > { %s7683_s30 = scalar_lea.hbm %s9388_s11, 32 }
  0x78   : > { %p7684_p13 = scmp.ne.s32.totalorder %s9388_s11, %s7683_s30  ;;  %p7690_p5 = scmp.lt.u32.totalorder %s7683_s30, %s9388_s11 }
  0x7a   : > { %p7686_p1 = pnand %p7684_p13, %p8175_p0 }
  0x7c   : > { %p7687_p6 = pneg %p7686_p1 }
  0x7e   : > { %p7692_p9 = pnand %p7690_p5, %p7687_p6 }
  0x80   : > { %7695 = shalt.err (!%p7692_p9)
}
  0x81   : > { %s7696_s23 = scalar_lea.vmem %s515_s21, 32  ;;  %p7704_p4 = scmp.lt.s32.totalorder %s515_s21, %s515_s21 }
  0x82   : > { %p7697_p10 = scmp.ne.s32.totalorder %s515_s21, %s7696_s23  ;;  %p7705_p7 = scmp.lt.s32.totalorder %s7696_s23, %s7696_s23 }
  0x84   : > { %p7699_p2 = pnand %p7697_p10, %p8175_p0  ;;  %p7706_p8 = por %p7705_p7, %p7704_p4 }
  0x86   : > { %p7700_p3 = pneg %p7699_p2 }
  0x88   : > { %p7707_p11 = pnand %p7706_p8, %p7700_p3 }
  0x8a   : > { %7710 = shalt.err (!%p7707_p11)
}
  0x8b   : > { %7509 = dma.hbm_to_vmem [thread:$0]  (!%p8159_p12), %s9388_s11, 32, %s515_s21, [#allocation15]  }
  0x8c   : > { %s7711_s17 = scalar_lea.hbm %s9390_s13, 128 }
  0x8d   : > { %p7712_p13 = scmp.ne.s32.totalorder %s9390_s13, %s7711_s17  ;;  %p7718_p5 = scmp.lt.u32.totalorder %s7711_s17, %s9390_s13 }
  0x8f   : > { %p7714_p1 = pnand %p7712_p13, %p8175_p0 }
  0x91   : > { %p7715_p6 = pneg %p7714_p1 }
  0x93   : > { %p7720_p9 = pnand %p7718_p5, %p7715_p6 }
  0x95   : > { %7723 = shalt.err (!%p7720_p9)
}
  0x96   : > { %s7724_s20 = scalar_lea.vmem %s539_s16, 128  ;;  %p7732_p4 = scmp.lt.s32.totalorder %s539_s16, %s539_s16 }
  0x97   : > { %p7725_p10 = scmp.ne.s32.totalorder %s539_s16, %s7724_s20  ;;  %p7733_p7 = scmp.lt.s32.totalorder %s7724_s20, %s7724_s20 }
  0x99   : > { %p7727_p2 = pnand %p7725_p10, %p8175_p0  ;;  %p7734_p8 = por %p7733_p7, %p7732_p4 }
  0x9b   : > { %p7728_p3 = pneg %p7727_p2 }
  0x9d   : > { %p7735_p11 = pnand %p7734_p8, %p7728_p3 }
  0x9f   : > { %7738 = shalt.err (!%p7735_p11)
}
  0xa0   : > { %7515 = dma.hbm_to_vmem [thread:$0]  (!%p8159_p12), %s9390_s13, 128, %s539_s16, [#allocation18]  }
  0xa1   : > { %s8000_s22 = smov [#allocation2]   ;;  %s9431_s4 = sld [smem:[#allocation37_spill]] }
  0xa2   : > { %s428_s0 = sshll.u32 %s8000_s22, 4  ;;  %s429_s0 = int_to_ptr.vmem [resolvable:$true] %s428_s0 }
  0xa7   : > { %s7739_s17 = scalar_lea.hbm %s9431_s4, 256 }
  0xa8   : > { %p7740_p13 = scmp.ne.s32.totalorder %s9431_s4, %s7739_s17  ;;  %p7746_p5 = scmp.lt.u32.totalorder %s7739_s17, %s9431_s4 }
  0xaa   : > { %p7742_p1 = pnand %p7740_p13, %p8175_p0 }
  0xac   : > { %p7743_p6 = pneg %p7742_p1 }
  0xae   : > { %p7748_p9 = pnand %p7746_p5, %p7743_p6 }
  0xb0   : > { %7751 = shalt.err (!%p7748_p9)
}
  0xb1   : > { %s7752_s16 = scalar_lea.vmem %s429_s0, 256  ;;  %p7760_p4 = scmp.lt.s32.totalorder %s429_s0, %s429_s0 }
  0xb2   : > { %p7753_p10 = scmp.ne.s32.totalorder %s429_s0, %s7752_s16  ;;  %p7761_p7 = scmp.lt.s32.totalorder %s7752_s16, %s7752_s16 }
  0xb4   : > { %p7755_p2 = pnand %p7753_p10, %p8175_p0  ;;  %p7762_p8 = por %p7761_p7, %p7760_p4 }
  0xb6   : > { %p7756_p3 = pneg %p7755_p2 }
  0xb8   : > { %p7763_p11 = pnand %p7762_p8, %p7756_p3 }
  0xba   : > { %7766 = shalt.err (!%p7763_p11)
}
  0xbb   : > { %s9407_s20 = smov 128   ;;  %s9408_s21 = smov 8  }
  0xbc   : > { %7488 = dma.hbm_to_vmem [thread:$0]  (!%p8159_p12), %s9431_s4, 256, %s429_s0, [#allocation3], %s9407_s20, %s9407_s20, %s9408_s21  }
  0xbd   : > { %s8003_s5 = smov [#allocation7]   ;;  %s7767_s30 = scalar_lea.hbm %s9383_s6, 10240 }
  0xbe   : > { %s452_s24 = sshll.u32 %s8003_s5, 4  ;;  %p7768_p13 = scmp.ne.s32.totalorder %s9383_s6, %s7767_s30  ;;  %s453_s24 = int_to_ptr.vmem [resolvable:$true] %s452_s24 }
  0xbf   : > { %p7774_p5 = scmp.lt.u32.totalorder %s7767_s30, %s9383_s6 }
  0xc0   : > { %p7770_p1 = pnand %p7768_p13, %p8175_p0 }
  0xc2   : > { %p7771_p6 = pneg %p7770_p1 }
  0xc4   : > { %p7776_p9 = pnand %p7774_p5, %p7771_p6 }
  0xc6   : > { %7779 = shalt.err (!%p7776_p9)
}
  0xc7   : > { %s7780_s0 = scalar_lea.vmem %s453_s24, 10240  ;;  %p7788_p4 = scmp.lt.s32.totalorder %s453_s24, %s453_s24 }
  0xc8   : > { %p7781_p10 = scmp.ne.s32.totalorder %s453_s24, %s7780_s0  ;;  %p7789_p7 = scmp.lt.s32.totalorder %s7780_s0, %s7780_s0 }
  0xca   : > { %p7783_p2 = pnand %p7781_p10, %p8175_p0  ;;  %p7790_p8 = por %p7789_p7, %p7788_p4 }
  0xcc   : > { %p7784_p3 = pneg %p7783_p2 }
  0xce   : > { %p7791_p11 = pnand %p7790_p8, %p7784_p3 }
  0xd0   : > { %7794 = shalt.err (!%p7791_p11)
}
  0xd1   : > { %s8004_s23 = smov 256   ;;  %s8005_s22 = smov 16  }
  0xd2   : > { %7494 = dma.hbm_to_vmem [thread:$0]  (!%p8159_p12), %s9383_s6, 10240, %s453_s24, [#allocation6], %s8004_s23, %s8004_s23, %s8005_s22  }
  0xd3   : > { %s8006_s17 = smov [#allocation10]   ;;  %s8007_s30 = smov [#allocation13]  }
  0xd4   : > { %s476_s19 = sshll.u32 %s8006_s17, 4  ;;  %s500_s27 = sshll.u32 %s8007_s30, 4  ;;  %s477_s19 = int_to_ptr.vmem [resolvable:$true] %s476_s19  ;;  %s501_s27 = int_to_ptr.vmem [resolvable:$true] %s500_s27 }
  0xd5   : > { %s7795_s0 = scalar_lea.hbm %s9385_s8, 24576 }
  0xd6   : > { %p7796_p13 = scmp.ne.s32.totalorder %s9385_s8, %s7795_s0  ;;  %p7802_p5 = scmp.lt.u32.totalorder %s7795_s0, %s9385_s8 }
  0xd8   : > { %p7798_p1 = pnand %p7796_p13, %p8175_p0 }
  0xda   : > { %p7799_p6 = pneg %p7798_p1 }
  0xdc   : > { %p7804_p9 = pnand %p7802_p5, %p7799_p6 }
  0xde   : > { %7807 = shalt.err (!%p7804_p9)
}
  0xdf   : > { %s7808_s24 = scalar_lea.vmem %s477_s19, 24576  ;;  %p7816_p4 = scmp.lt.s32.totalorder %s477_s19, %s477_s19 }
  0xe0   : > { %p7809_p10 = scmp.ne.s32.totalorder %s477_s19, %s7808_s24  ;;  %p7817_p7 = scmp.lt.s32.totalorder %s7808_s24, %s7808_s24 }
  0xe2   : > { %p7811_p2 = pnand %p7809_p10, %p8175_p0  ;;  %p7818_p8 = por %p7817_p7, %p7816_p4 }
  0xe4   : > { %p7812_p3 = pneg %p7811_p2 }
  0xe6   : > { %p7819_p11 = pnand %p7818_p8, %p7812_p3 }
  0xe8   : > { %7822 = shalt.err (!%p7819_p11)
}
  0xe9   : > { %7500 = dma.hbm_to_vmem [thread:$0]  (!%p8159_p12), %s9385_s8, 24576, %s477_s19, [#allocation9], %s8004_s23, %s8004_s23, %s8005_s22  }
  0xea   : > { %s7823_s7 = scalar_lea.hbm %s9387_s10, 12288 }
  0xeb   : > { %p7824_p13 = scmp.ne.s32.totalorder %s9387_s10, %s7823_s7  ;;  %p7830_p5 = scmp.lt.u32.totalorder %s7823_s7, %s9387_s10 }
  0xed   : > { %p7826_p1 = pnand %p7824_p13, %p8175_p0 }
  0xef   : > { %p7827_p6 = pneg %p7826_p1 }
  0xf1   : > { %p7832_p9 = pnand %p7830_p5, %p7827_p6 }
  0xf3   : > { %7835 = shalt.err (!%p7832_p9)
}
  0xf4   : > { %s7836_s16 = scalar_lea.vmem %s501_s27, 12288  ;;  %p7844_p4 = scmp.lt.s32.totalorder %s501_s27, %s501_s27 }
  0xf5   : > { %p7837_p10 = scmp.ne.s32.totalorder %s501_s27, %s7836_s16  ;;  %p7845_p7 = scmp.lt.s32.totalorder %s7836_s16, %s7836_s16 }
  0xf7   : > { %p7839_p2 = pnand %p7837_p10, %p8175_p0  ;;  %p7846_p8 = por %p7845_p7, %p7844_p4 }
  0xf9   : > { %p7840_p3 = pneg %p7839_p2 }
  0xfb   : > { %p7847_p11 = pnand %p7846_p8, %p7840_p3 }
  0xfd   : > { %7850 = shalt.err (!%p7847_p11)
}
  0xfe   : > { %s9432_s23 = smov 8   ;;  %s9433_s22 = smov 128  }
  0xff   : > { %7506 = dma.hbm_to_vmem [thread:$0]  (!%p8159_p12), %s9387_s10, 12288, %s501_s27, [#allocation12], %s9433_s22, %s9433_s22, %s9432_s23  }
 0x100   : > { %s8008_s24 = smov [#allocation16]   ;;  %s7851_s9 = scalar_lea.hbm %s9389_s12, 73728 }
 0x101   : > { %s524_s20 = sshll.u32 %s8008_s24, 4  ;;  %p7852_p13 = scmp.ne.s32.totalorder %s9389_s12, %s7851_s9  ;;  %s525_s20 = int_to_ptr.vmem [resolvable:$true] %s524_s20 }
 0x102   : > { %p7858_p5 = scmp.lt.u32.totalorder %s7851_s9, %s9389_s12 }
 0x103   : > { %p7854_p1 = pnand %p7852_p13, %p8175_p0 }
 0x105   : > { %p7855_p6 = pneg %p7854_p1 }
 0x107   : > { %p7860_p9 = pnand %p7858_p5, %p7855_p6 }
 0x109   : > { %7863 = shalt.err (!%p7860_p9)
}
 0x10a   : > { %s7864_s27 = scalar_lea.vmem %s525_s20, 73728  ;;  %p7872_p4 = scmp.lt.s32.totalorder %s525_s20, %s525_s20 }
 0x10b   : > { %p7865_p10 = scmp.ne.s32.totalorder %s525_s20, %s7864_s27  ;;  %p7873_p7 = scmp.lt.s32.totalorder %s7864_s27, %s7864_s27 }
 0x10d   : > { %p7867_p2 = pnand %p7865_p10, %p8175_p0  ;;  %p7874_p8 = por %p7873_p7, %p7872_p4 }
 0x10f   : > { %p7868_p3 = pneg %p7867_p2 }
 0x111   : > { %p7875_p11 = pnand %p7874_p8, %p7868_p3 }
 0x113   : > { %7878 = shalt.err (!%p7875_p11)
}
 0x114   : > { %s8009_s28 = smov 512   ;;  %s8010_s16 = smov 32  }
 0x115   : > { %7512 = dma.hbm_to_vmem [thread:$0]  (!%p8159_p12), %s9389_s12, 73728, %s525_s20, [#allocation15], %s8009_s28, %s8009_s28, %s8010_s16  }
 0x116   : > { %s8011_s19 = smov [#allocation19]   ;;  %s7879_s4 = scalar_lea.hbm %s9392_s15, 16 }
 0x117   : > { %s552_s0 = sshll.u32 %s8011_s19, 4  ;;  %p7880_p13 = scmp.ne.s32.totalorder %s9392_s15, %s7879_s4  ;;  %s553_s0 = int_to_ptr.vmem [resolvable:$true] %s552_s0 }
 0x118   : > { %p7886_p5 = scmp.lt.u32.totalorder %s7879_s4, %s9392_s15 }
 0x119   : > { %p7882_p1 = pnand %p7880_p13, %p8175_p0 }
 0x11b   : > { %p7883_p6 = pneg %p7882_p1 }
 0x11d   : > { %p7888_p9 = pnand %p7886_p5, %p7883_p6 }
 0x11f   : > { %7891 = shalt.err (!%p7888_p9)
}
 0x120   : > { %s7892_s20 = scalar_lea.vmem %s553_s0, 16  ;;  %s7899_s30 = scalar_lea.vmem %s553_s0, 32 }
 0x121   : > { %p7893_p10 = scmp.ne.s32.totalorder %s553_s0, %s7892_s20  ;;  %p7900_p4 = scmp.lt.s32.totalorder %s553_s0, %s553_s0 }
 0x122   : > { %p7901_p7 = scmp.lt.s32.totalorder %s7899_s30, %s7892_s20 }
 0x123   : > { %p7895_p2 = pnand %p7893_p10, %p8175_p0 }
 0x124   : > { %p7902_p8 = por %p7901_p7, %p7900_p4 }
 0x125   : > { %p7896_p3 = pneg %p7895_p2 }
 0x127   : > { %p7903_p11 = pnand %p7902_p8, %p7896_p3 }
 0x129   : > { %7906 = shalt.err (!%p7903_p11)
}
 0x12a   : > { %7518 = dma.hbm_to_vmem [thread:$0]  (!%p8159_p12), %s9392_s15, 16, %s553_s0, [#allocation18]  }
 0x12b   : > { %p9434_p13 = scmp.ne.s32.totalorder %s9425_s18, 0 }
 0x12c   : > { %p9435_p1 = scmp.eq.s32.totalorder (!%p9434_p13), %s8123_s25, 0 }
 0x12d   : > { %573 = sbr.rel (%p9434_p13) target bundleno = 3324 (0xcfc), region = 84 }
 0x134   : > { %7952 = dma.done.wait (%p9435_p1), [#allocation3], 256   ;;  %p9436_p0 = pmov %p9435_p1 }
 0x136   : > { %7954 = vsyncadd (%p9436_p0), [#allocation3], 4294967040  ;;  %p9437_p6 = pmov %p9436_p0 }
 0x137   : > { %p9438_p5 = pmov %p9436_p0 }
 0x138   : > { %7956 = dma.done.wait (%p9437_p6), [#allocation6], 10272  }
 0x139   : > { %7958 = vsyncadd (%p9438_p5), [#allocation6], 4294957024  ;;  %p9439_p9 = pmov %p9436_p0 }
 0x13a   : > { %p9440_p12 = pmov %p9436_p0 }
 0x13b   : > { %7960 = dma.done.wait (%p9439_p9), [#allocation9], 24640  }
 0x13c   : > { %7962 = vsyncadd (%p9440_p12), [#allocation9], 4294942656  ;;  %p9441_p10 = pmov %p9436_p0 }
 0x13d   : > { %p9442_p2 = pmov %p9436_p0 }
 0x13e   : > { %7964 = dma.done.wait (%p9441_p10), [#allocation12], 12352  }
 0x13f   : > { %7966 = vsyncadd (%p9442_p2), [#allocation12], 4294954944  ;;  %p9443_p3 = pmov %p9436_p0 }
 0x140   : > { %p9444_p4 = pmov %p9436_p0 }
 0x141   : > { %7968 = dma.done.wait (%p9443_p3), [#allocation15], 73760  }
 0x142   : > { %7970 = vsyncadd (%p9444_p4), [#allocation15], 4294893536  ;;  %p9445_p7 = pmov %p9436_p0 }
 0x143   : > { %p9446_p8 = pmov %p9436_p0 }
 0x144   : > { %7972 = dma.done.wait (%p9445_p7), [#allocation18], 144  }
 0x145   : > { %7974 = vsyncadd (%p9446_p8), [#allocation18], 4294967152  ;;  %p662_p11 = scmp.lt.s32.totalorder %s8123_s25, 1  ;;  %v8012_v0 = vmov 0.0   ;;  %vm8013_vm0 = vmmov 0   ;;  %s9447_s23 = sld [smem:[#allocation36_spill]] }
 0x146   : > { %6071 = vmatprep.subr.mxu1 %v8012_v0  ;;  %6073 = vmatprep.mubr.msk.f32.mxu1 %vm8013_vm0, %v8012_v0  ;;  %v680_v1 = vld [vmem:[#allocation2] sm:$0xff]  ;;  %vm750_vm1 = vcmask 1043456   ;;  %vm695_vm2 = vcmask 1046528   ;;  %vm723_vm3 = vcmask 31744   ;;  %vm1041_vm4 = vcmask 1045504   ;;  %s9448_s19 = sld [smem:[#allocation29_spill]] }
 0x147   : > { %s663_s18 = scalar_select %p662_p11, %s8123_s25, 1  ;;  %2317 = vmatprep.mubr.f32.mxu0 %v8012_v0  ;;  %v722_v4 = vrot.slane %v680_v1, 4  ;;  %v681_v46 = vld [vmem:[#allocation2 + $0x8] sm:$0xf]  ;;  %vm1316_vm5 = vcmask 1041408   ;;  %vm1294_vm6 = vcmask 801792  }
 0x148   : > { %vm1517_vm7 = vcmask 523264   ;;  %vm1883_vm8 = vcmask 1044480   ;;  %vm8015_vm9 = vmmov 1   ;;  %vm2237_vm11 = vcmask 384000   ;;  %s9449_s24 = sld [smem:[#allocation34_spill]]  ;;  %s5808_s21 = sshll.u32 %s8123_s25, 4 }
 0x149   : > { %s7438_s29 = smul.u32 104, %s663_s18  ;;  %6072 = vmatpush3.msk.msra.mxu1 %vm750_vm1, %v722_v4  ;;  %v8014_v4 = vmov 0.0|0.0   ;;  %vm6357_vm10 = vmpackc.low %vm695_vm2, %vm8015_vm9  ;;  %vm3274_vm12 = vcmask 154624   ;;  %vm3281_vm13 = vcmask 1042432   ;;  %vm5516_vm14 = vcmask 32768   ;;  %s9450_s17 = sld [smem:[#allocation41_spill]] }
 0x14a   : > { %6112 = vmatprep.subr.mxu1 %v8012_v0  ;;  %s8016_s25 = smov [#allocation20]  }
 0x14b   : > { %s8422_s22 = scalar_lea.vmem %s9447_s23, %s7438_s29  ;;  %s7911_s28 = sshll.u32 %s8016_s25, 4  ;;  %s7912_s28 = int_to_ptr.vmem [resolvable:$false] %s7911_s28 }
 0x14c   : > { %v8425_v2 = vld [vmem:[%s8422_s22] sm:$0xff]  ;;  %v8428_v3 = vld [vmem:[%s8422_s22 + $0x8] sm:$0xff]  ;;  %v8433_v7 = vld [vmem:[%s8422_s22 + $0x10] sm:$0xff]  ;;  %s660_s0 = sand.u32 1, %s9448_s19   ;;  %s7913_s18 = scalar_lea.vmem %s7912_s28, 32 }
 0x14d   : > { %v696_v5 = vrot.slane %v8425_v2, 1  ;;  %v697_v6 = vrot.slane %v8428_v3, 1  ;;  %v699_v8 = vrot.slane %v8433_v7, 1  ;;  %v8437_v9 = vld [vmem:[%s8422_s22 + $0x18] sm:$0xff]  ;;  %v1042_v11 = vrot.slane %v8425_v2, 2  ;;  %v8451_v15 = vld [vmem:[%s8422_s22 + $0x20] sm:$0xff] }
 0x14e   : > { %v1043_v12 = vrot.slane %v8428_v3, 2  ;;  %v701_v14 = vrot.slane %v8437_v9, 1  ;;  %v1045_v17 = vrot.slane %v8433_v7, 2  ;;  %v703_v19 = vrot.slane %v8451_v15, 1  ;;  %v8469_v21 = vld [vmem:[%s8422_s22 + $0x28] sm:$0xff]  ;;  %v8477_v24 = vld [vmem:[%s8422_s22 + $0x30] sm:$0xff] }
 0x14f   : > { %v698_v10 = vsel %vm695_vm2, %v696_v5, %v697_v6  ;;  %v700_v13 = vsel %vm695_vm2, %v697_v6, %v699_v8  ;;  %v705_v23 = vrot.slane %v8469_v21, 1  ;;  %v707_v26 = vrot.slane %v8477_v24, 1  ;;  %v8485_v27 = vld [vmem:[%s8422_s22 + $0x38] sm:$0xff]  ;;  %v8493_v30 = vld [vmem:[%s8422_s22 + $0x40] sm:$0xff]  ;;  %v8501_v33 = vld [vmem:[%s8422_s22 + $0x48] sm:$0xff]  ;;  %s661_s4 = scalar_lea.vmem [#allocation20], %s660_s0  ;;  %s9335_s20 = scalar_lea.hbm %s9450_s17, %s5808_s21 }
 0x150   : > { %6074 = vmatmul.mubr.msk.f32.vlgmr.msra.gmra.mrb[0].mxu1 %vm723_vm3, %v698_v10  ;;  %v8455_v16 = vsel %vm1041_vm4, %v1042_v11, %v1043_v12  ;;  %v702_v18 = vsel %vm695_vm2, %v699_v8, %v701_v14  ;;  %v8466_v20 = vsel %vm1041_vm4, %v1043_v12, %v1045_v17  ;;  %v704_v22 = vsel %vm695_vm2, %v701_v14, %v703_v19  ;;  %v8509_v36 = vld [vmem:[%s8422_s22 + $0x50] sm:$0xff]  ;;  %v8517_v39 = vld [vmem:[%s8422_s22 + $0x58] sm:$0xff]  ;;  %v8525_v42 = vld [vmem:[%s8422_s22 + $0x60] sm:$0xf]  ;;  %s5531_s9 = sshll.u32 %s661_s4, 4  ;;  %s5519_s30 = scalar_lea.sflag [#allocation4], %s660_s0  ;;  %s9337_s9 = int_to_ptr.vmem [resolvable:$true] %s5531_s9 }
 0x151   : > { %6076 = vmatprep.mubr.msk.f32.mxu1 %vm8013_vm0, %v8012_v0  ;;  %6113 = vmatpush3.msk.msra.mxu1 %vm750_vm1, %v680_v1  ;;  %v706_v25 = vsel %vm695_vm2, %v703_v19, %v705_v23  ;;  %v708_v28 = vsel %vm695_vm2, %v705_v23, %v707_v26  ;;  %v709_v29 = vrot.slane %v8485_v27, 1  ;;  %v711_v32 = vrot.slane %v8493_v30, 1  ;;  %v1239_v8 = vld [vmem:[#allocation5] sm:$0x3]  ;;  %s7907_s27 = scalar_lea.vmem %s9337_s9, 16  ;;  %p9451_p1 = scmp.ne.s32.totalorder %s9449_s24, 0 }
 0x152   : > { %6153 = vmatprep.subr.mxu1 %v8012_v0  ;;  %v713_v35 = vrot.slane %v8501_v33, 1  ;;  %v715_v38 = vrot.slane %v8509_v36, 1  ;;  %v717_v41 = vrot.slane %v8517_v39, 1  ;;  %v719_v44 = vrot.slane %v8525_v42, 1  ;;  %p7908_p13 = scmp.ne.s32.totalorder %s9337_s9, %s7907_s27  ;;  %p7914_p5 = scmp.lt.s32.totalorder %s9337_s9, %s7912_s28 }
 0x153   : > { %v710_v31 = vsel %vm695_vm2, %v707_v26, %v709_v29  ;;  %v712_v34 = vsel %vm695_vm2, %v709_v29, %v711_v32  ;;  %v1047_v47 = vrot.slane %v8437_v9, 2  ;;  %v1049_v49 = vrot.slane %v8451_v15, 2  ;;  %p7915_p9 = scmp.lt.s32.totalorder %s7913_s18, %s7907_s27 }
 0x154   : > { %6077 = vmatmul.mubr.msk.f32.gmra.mrb[2].mxu1 %vm723_vm3, %v700_v13  ;;  %v714_v37 = vsel %vm695_vm2, %v711_v32, %v713_v35  ;;  %v716_v40 = vsel %vm695_vm2, %v713_v35, %v715_v38  ;;  %v718_v43 = vsel %vm695_vm2, %v715_v38, %v717_v41  ;;  %v720_v45 = vsel %vm695_vm2, %v717_v41, %v719_v44  ;;  %p7909_p0 = pnand %p7908_p13, %p9451_p1 }
 0x155   : > { %6079 = vmatprep.mubr.msk.f32.mxu1 %vm8013_vm0, %v8012_v0  ;;  %v1048_v48 = vsel %vm1041_vm4, %v1045_v17, %v1047_v47  ;;  %v1050_v50 = vsel %vm1041_vm4, %v1047_v47, %v1049_v49  ;;  %v1051_v51 = vrot.slane %v8469_v21, 2  ;;  %v1053_v53 = vrot.slane %v8477_v24, 2  ;;  %p7916_p12 = por %p7915_p9, %p7914_p5 }
 0x156   : > { %v1055_v55 = vrot.slane %v8485_v27, 2  ;;  %v1057_v57 = vrot.slane %v8493_v30, 2  ;;  %v1059_v59 = vrot.slane %v8501_v33, 2  ;;  %v1061_v61 = vrot.slane %v8509_v36, 2  ;;  %p7910_p6 = pneg %p7909_p0 }
 0x157   : > { %v1052_v52 = vsel %vm1041_vm4, %v1049_v49, %v1051_v51  ;;  %v1054_v54 = vsel %vm1041_vm4, %v1051_v51, %v1053_v53  ;;  %v1063_v63 = vrot.slane %v8517_v39, 2  ;;  %v1240_v5 = vlaneseq }
 0x158   : > { %6080 = vmatmul.mubr.msk.f32.gmra.mrb[4].mxu1 %vm723_vm3, %v702_v18  ;;  %v1056_v56 = vsel %vm1041_vm4, %v1053_v53, %v1055_v55  ;;  %v1058_v58 = vsel %vm1041_vm4, %v1055_v55, %v1057_v57  ;;  %v1060_v60 = vsel %vm1041_vm4, %v1057_v57, %v1059_v59  ;;  %v1062_v62 = vsel %vm1041_vm4, %v1059_v59, %v1061_v61  ;;  %p7917_p10 = pnand %p7916_p12, %p7910_p6 }
 0x159   : > { %6082 = vmatprep.mubr.msk.f32.mxu1 %vm8013_vm0, %v8012_v0  ;;  %v1064_v1 = vsel %vm1041_vm4, %v1061_v61, %v1063_v63  ;;  %v8659_v6 = vshrl.u32 %v1240_v5, 7 }
 0x15b   : > { %v8668_v10 = vsub.s32 1, %v8659_v6 }
 0x15c   : > { %6083 = vmatmul.mubr.msk.f32.gmra.mrb[6].mxu1 %vm723_vm3, %v704_v22 }
 0x15d   : > { %6085 = vmatprep.mubr.msk.f32.mxu1 %vm8013_vm0, %v8012_v0  ;;  %v8672_v13 = vrot.slane %v1239_v8, %v8668_v10 }
 0x160   : > { %6086 = vmatmul.mubr.msk.f32.gmra.mrb[8].mxu1 %vm723_vm3, %v706_v25 }
 0x161   : > { %6088 = vmatprep.mubr.msk.f32.mxu1 %vm8013_vm0, %v8012_v0 }
 0x164   : > { %6089 = vmatmul.mubr.msk.f32.gmra.mrb[10].mxu1 %vm723_vm3, %v708_v28 }
 0x165   : > { %6091 = vmatprep.mubr.msk.f32.mxu1 %vm8013_vm0, %v8012_v0 }
 0x168   : > { %6092 = vmatmul.mubr.msk.f32.gmra.mrb[12].mxu1 %vm723_vm3, %v710_v31 }
 0x169   : > { %6094 = vmatprep.mubr.msk.f32.mxu1 %vm8013_vm0, %v8012_v0 }
 0x16c   : > { %6095 = vmatmul.mubr.msk.f32.gmra.mrb[14].mxu1 %vm723_vm3, %v712_v34 }
 0x16d   : > { %6097 = vmatprep.mubr.msk.f32.mxu1 %vm8013_vm0, %v8012_v0 }
 0x170   : > { %6098 = vmatmul.mubr.msk.f32.gmra.mrb[16].mxu1 %vm723_vm3, %v714_v37 }
 0x171   : > { %6100 = vmatprep.mubr.msk.f32.mxu1 %vm8013_vm0, %v8012_v0 }
 0x174   : > { %6101 = vmatmul.mubr.msk.f32.gmra.mrb[18].mxu1 %vm723_vm3, %v716_v40 }
 0x175   : > { %6103 = vmatprep.mubr.msk.f32.mxu1 %vm8013_vm0, %v8012_v0 }
 0x178   : > { %6104 = vmatmul.mubr.msk.f32.gmra.mrb[20].mxu1 %vm723_vm3, %v718_v43 }
 0x179   : > { %6106 = vmatprep.mubr.msk.f32.mxu1 %vm8013_vm0, %v8012_v0 }
 0x17c   : > { %6107 = vmatmul.mubr.msk.f32.gmra.mrb[22].mxu1 %vm723_vm3, %v720_v45 }
 0x17d   : > { %6109 = vmatprep.mubr.msk.f32.mxu1 %vm8013_vm0, %v8012_v0 }
 0x180   : > { %6110 = vmatmul.mubr.msk.f32.gmra.mrb[24].mxu1 %vm723_vm3, %v719_v44 }
 0x181   : > { %6114 = vmatprep.mubr.msk.f32.mxu1 %vm8013_vm0, %v8012_v0 }
 0x184   : > { %6115 = vmatmul.mubr.msk.f32.vlgmr.msra.gmra.mrb[0].mxu1 %vm723_vm3, %v8425_v2  ;;  %v1065_v2 = vrot.slane %v8525_v42, 2 }
 0x185   : > { %6117 = vmatprep.mubr.msk.f32.mxu1 %vm8013_vm0, %v8012_v0  ;;  %6154 = vmatpush3.msk.msra.mxu1 %vm750_vm1, %v681_v46 }
 0x186   : > { %6250 = vmatprep.subr.bf16.mxu1 %v8014_v4 }
 0x188   : > { %6118 = vmatmul.mubr.msk.f32.gmra.mrb[2].mxu1 %vm723_vm3, %v8428_v3  ;;  %v1066_v3 = vsel %vm1041_vm4, %v1063_v63, %v1065_v2 }
 0x189   : > { %6120 = vmatprep.mubr.msk.f32.mxu1 %vm8013_vm0, %v8012_v0 }
 0x18c   : > { %6121 = vmatmul.mubr.msk.f32.gmra.mrb[4].mxu1 %vm723_vm3, %v8433_v7  ;;  %v8662_v7 = vsub.s32 0, %v8659_v6 }
 0x18d   : > { %6123 = vmatprep.mubr.msk.f32.mxu1 %vm8013_vm0, %v8012_v0 }
 0x190   : > { %6124 = vmatmul.mubr.msk.f32.gmra.mrb[6].mxu1 %vm723_vm3, %v8437_v9  ;;  %v8665_v9 = vrot.slane %v1239_v8, %v8662_v7 }
 0x191   : > { %6126 = vmatprep.mubr.msk.f32.mxu1 %vm8013_vm0, %v8012_v0 }
 0x194   : > { %6127 = vmatmul.mubr.msk.f32.gmra.mrb[8].mxu1 %vm723_vm3, %v8451_v15 }
 0x195   : > { %6129 = vmatprep.mubr.msk.f32.mxu1 %vm8013_vm0, %v8012_v0 }
 0x198   : > { %6130 = vmatmul.mubr.msk.f32.gmra.mrb[10].mxu1 %vm723_vm3, %v8469_v21 }
 0x199   : > { %6132 = vmatprep.mubr.msk.f32.mxu1 %vm8013_vm0, %v8012_v0 }
 0x19c   : > { %6133 = vmatmul.mubr.msk.f32.gmra.mrb[12].mxu1 %vm723_vm3, %v8477_v24 }
 0x19d   : > { %6135 = vmatprep.mubr.msk.f32.mxu1 %vm8013_vm0, %v8012_v0 }
 0x1a0   : > { %6136 = vmatmul.mubr.msk.f32.gmra.mrb[14].mxu1 %vm723_vm3, %v8485_v27 }
 0x1a1   : > { %6138 = vmatprep.mubr.msk.f32.mxu1 %vm8013_vm0, %v8012_v0 }
 0x1a4   : > { %6139 = vmatmul.mubr.msk.f32.gmra.mrb[16].mxu1 %vm723_vm3, %v8493_v30 }
 0x1a5   : > { %6141 = vmatprep.mubr.msk.f32.mxu1 %vm8013_vm0, %v8012_v0 }
 0x1a8   : > { %6142 = vmatmul.mubr.msk.f32.gmra.mrb[18].mxu1 %vm723_vm3, %v8501_v33 }
 0x1a9   : > { %6144 = vmatprep.mubr.msk.f32.mxu1 %vm8013_vm0, %v8012_v0 }
 0x1ac   : > { %6145 = vmatmul.mubr.msk.f32.gmra.mrb[20].mxu1 %vm723_vm3, %v8509_v36 }
 0x1ad   : > { %6147 = vmatprep.mubr.msk.f32.mxu1 %vm8013_vm0, %v8012_v0 }
 0x1b0   : > { %6148 = vmatmul.mubr.msk.f32.gmra.mrb[22].mxu1 %vm723_vm3, %v8517_v39 }
 0x1b1   : > { %6150 = vmatprep.mubr.msk.f32.mxu1 %vm8013_vm0, %v8012_v0 }
 0x1b4   : > { %6151 = vmatmul.mubr.msk.f32.gmra.mrb[24].mxu1 %vm723_vm3, %v8525_v42 }
 0x1b5   : > { %6155 = vmatprep.mubr.msk.f32.mxu1 %vm8013_vm0, %v8012_v0 }
 0x1b8   : > { %6156 = vmatmul.mubr.msk.f32.vlgmr.msra.gmra.mrb[0].mxu1 %vm723_vm3, %v8455_v16 }
 0x1b9   : > { %6158 = vmatprep.mubr.msk.f32.mxu1 %vm8013_vm0, %v8012_v0 }
 0x1bc   : > { %6159 = vmatmul.mubr.msk.f32.gmra.mrb[2].mxu1 %vm723_vm3, %v8466_v20 }
 0x1bd   : > { %6161 = vmatprep.mubr.msk.f32.mxu1 %vm8013_vm0, %v8012_v0 }
 0x1c0   : > { %6162 = vmatmul.mubr.msk.f32.gmra.mrb[4].mxu1 %vm723_vm3, %v1048_v48 }
 0x1c1   : > { %6164 = vmatprep.mubr.msk.f32.mxu1 %vm8013_vm0, %v8012_v0 }
 0x1c4   : > { %6165 = vmatmul.mubr.msk.f32.gmra.mrb[6].mxu1 %vm723_vm3, %v1050_v50 }
 0x1c5   : > { %6167 = vmatprep.mubr.msk.f32.mxu1 %vm8013_vm0, %v8012_v0 }
 0x1c8   : > { %6168 = vmatmul.mubr.msk.f32.gmra.mrb[8].mxu1 %vm723_vm3, %v1052_v52 }
 0x1c9   : > { %6170 = vmatprep.mubr.msk.f32.mxu1 %vm8013_vm0, %v8012_v0 }
 0x1cc   : > { %6171 = vmatmul.mubr.msk.f32.gmra.mrb[10].mxu1 %vm723_vm3, %v1054_v54 }
 0x1cd   : > { %6173 = vmatprep.mubr.msk.f32.mxu1 %vm8013_vm0, %v8012_v0 }
 0x1d0   : > { %6174 = vmatmul.mubr.msk.f32.gmra.mrb[12].mxu1 %vm723_vm3, %v1056_v56 }
 0x1d1   : > { %6176 = vmatprep.mubr.msk.f32.mxu1 %vm8013_vm0, %v8012_v0 }
 0x1d4   : > { %6177 = vmatmul.mubr.msk.f32.gmra.mrb[14].mxu1 %vm723_vm3, %v1058_v58 }
 0x1d5   : > { %6179 = vmatprep.mubr.msk.f32.mxu1 %vm8013_vm0, %v8012_v0 }
 0x1d8   : > { %6180 = vmatmul.mubr.msk.f32.gmra.mrb[16].mxu1 %vm723_vm3, %v1060_v60 }
 0x1d9   : > { %6182 = vmatprep.mubr.msk.f32.mxu1 %vm8013_vm0, %v8012_v0 }
 0x1dc   : > { %6183 = vmatmul.mubr.msk.f32.gmra.mrb[18].mxu1 %vm723_vm3, %v1062_v62 }
 0x1dd   : > { %6185 = vmatprep.mubr.msk.f32.mxu1 %vm8013_vm0, %v8012_v0 }
 0x1e0   : > { %6186 = vmatmul.mubr.msk.f32.gmra.mrb[20].mxu1 %vm723_vm3, %v1064_v1 }
 0x1e1   : > { %6188 = vmatprep.mubr.msk.f32.mxu1 %vm8013_vm0, %v8012_v0 }
 0x1e4   : > { %6189 = vmatmul.mubr.msk.f32.gmra.mrb[22].mxu1 %vm723_vm3, %v1066_v3 }
 0x1e5   : > { %6191 = vmatprep.mubr.msk.f32.mxu1 %vm8013_vm0, %v8012_v0 }
 0x1e8   : > { %6192 = vmatmul.mubr.msk.f32.gmra.mrb[24].mxu1 %vm723_vm3, %v1065_v2 }
 0x1e9   : > { %6220 = vmatprep.mubr.msk.f32.mxu1 %vm8013_vm0, %v8012_v0 }
 0x28b   : > { %v1162_v11 = vpop.f32.mrb[0].mxu1 }
 0x28c   : > { %v1244_v12 = vmul.f32 %v8665_v9, %v1162_v11  ;;  %v6157_v14 = vpop.f32.mrb[1].mxu1 }
 0x28e   : > { %v1261_v16 = vadd.f32 %v8672_v13, %v1244_v12 }
 0x28f   : > { %v1167_v15 = vpop.f32.mrb[2].mxu1 }
 0x290   : > { %v1245_v17 = vmul.f32 %v8665_v9, %v1167_v15  ;;  %v6160_v18 = vpop.f32.mrb[3].mxu1  ;;  %v1274_v21 = vmax.f32 %v1261_v16, 0.0 }
 0x292   : > { %v1262_v19 = vadd.f32 %v8672_v13, %v1245_v17 }
 0x293   : > { %v1172_v20 = vpop.f32.mrb[4].mxu1 }
 0x294   : > { %v1275_v22 = vmax.f32 %v1262_v19, 0.0  ;;  %v1246_v23 = vmul.f32 %v8665_v9, %v1172_v20  ;;  %v6163_v24 = vpop.f32.mrb[5].mxu1 }
 0x296   : > { %v6251_v25 = vpack.c.bf16 %v1275_v22, %v1274_v21  ;;  %v1263_v27 = vadd.f32 %v8672_v13, %v1246_v23 }
 0x297   : > { %v1177_v26 = vpop.f32.mrb[6].mxu1 }
 0x298   : > { %v1247_v28 = vmul.f32 %v8665_v9, %v1177_v26  ;;  %v6166_v29 = vpop.f32.mrb[7].mxu1  ;;  %6252 = vmatpush3.bf16.msra.mxu1 %v6251_v25  ;;  %v1276_v32 = vmax.f32 %v1263_v27, 0.0  ;;  %v1437_v25 = vld [vmem:[#allocation7 + $0x88] sm:$0xff]  ;;  %v1439_v26 = vld [vmem:[#allocation7 + $0x98] sm:$0xff]  ;;  %v1436_v27 = vld [vmem:[#allocation7 + $0x80] sm:$0xff] }
 0x299   : > { %6253 = vmatprep.subr.bf16.mxu1 %v8014_v4  ;;  %v1441_v29 = vld [vmem:[#allocation7 + $0xa8] sm:$0xff] }
 0x29a   : > { %v1264_v30 = vadd.f32 %v8672_v13, %v1247_v28  ;;  %v1438_v28 = vld [vmem:[#allocation7 + $0x90] sm:$0xff] }
 0x29b   : > { %v1182_v31 = vpop.f32.mrb[8].mxu1 }
 0x29c   : > { %v1277_v33 = vmax.f32 %v1264_v30, 0.0  ;;  %v1248_v34 = vmul.f32 %v8665_v9, %v1182_v31  ;;  %v6169_v35 = vpop.f32.mrb[9].mxu1  ;;  %v1443_v30 = vld [vmem:[#allocation7 + $0xb8] sm:$0xff] }
 0x29d   : > { %v1445_v35 = vld [vmem:[#allocation7 + $0xc8] sm:$0xff] }
 0x29e   : > { %v6254_v36 = vpack.c.bf16 %v1277_v33, %v1276_v32  ;;  %v1265_v38 = vadd.f32 %v8672_v13, %v1248_v34  ;;  %v6270_v32 = vpack.c.bf16 %v1438_v28, %v1436_v27  ;;  %v6272_v33 = vpack.c.bf16 %v1443_v30, %v1441_v29  ;;  %v1442_v34 = vld [vmem:[#allocation7 + $0xb0] sm:$0xff]  ;;  %v1428_v28 = vld [vmem:[#allocation7 + $0x40] sm:$0xff] }
 0x29f   : > { %v1187_v37 = vpop.f32.mrb[10].mxu1 }
 0x2a0   : > { %v1249_v39 = vmul.f32 %v8665_v9, %v1187_v37  ;;  %v6172_v40 = vpop.f32.mrb[11].mxu1  ;;  %6255 = vmatpush3.bf16.msra.mxu1 %v6254_v36  ;;  %v1278_v43 = vmax.f32 %v1265_v38, 0.0  ;;  %v1447_v36 = vld [vmem:[#allocation7 + $0xd8] sm:$0xff] }
 0x2a1   : > { %6256 = vmatprep.subr.bf16.mxu1 %v8014_v4  ;;  %v1288_v37 = vld [vmem:[%s9378_s1 + $0x8] sm:$0xff]  ;;  %v1289_v40 = vld [vmem:[%s9378_s1 + $0x10] sm:$0xff] }
 0x2a2   : > { %v1266_v41 = vadd.f32 %v8672_v13, %v1249_v39  ;;  %v6276_v39 = vpack.c.bf16 %v1447_v36, %v1445_v35  ;;  %v1435_v35 = vld [vmem:[#allocation7 + $0x78] sm:$0xff] }
 0x2a3   : > { %v1192_v42 = vpop.f32.mrb[12].mxu1 }
 0x2a4   : > { %v1279_v44 = vmax.f32 %v1266_v41, 0.0  ;;  %v1250_v45 = vmul.f32 %v8665_v9, %v1192_v42  ;;  %v6175_v46 = vpop.f32.mrb[13].mxu1  ;;  %v1290_v41 = vld [vmem:[%s9378_s1 + $0x18] sm:$0xff]  ;;  %v1291_v42 = vld [vmem:[%s9378_s1 + $0x20] sm:$0xff] }
 0x2a5   : > { %v1446_v46 = vld [vmem:[#allocation7 + $0xd0] sm:$0xff] }
 0x2a6   : > { %v6257_v47 = vpack.c.bf16 %v1279_v44, %v1278_v43  ;;  %v1267_v49 = vadd.f32 %v8672_v13, %v1250_v45  ;;  %v1292_v43 = vld [vmem:[%s9378_s1 + $0x28] sm:$0xff]  ;;  %v1293_v44 = vld [vmem:[%s9378_s1 + $0x30] sm:$0x7] }
 0x2a7   : > { %v1197_v48 = vpop.f32.mrb[14].mxu1  ;;  %v1444_v45 = vld [vmem:[#allocation7 + $0xc0] sm:$0xff] }
 0x2a8   : > { %v1251_v50 = vmul.f32 %v8665_v9, %v1197_v48  ;;  %v6178_v51 = vpop.f32.mrb[15].mxu1  ;;  %6258 = vmatpush3.bf16.msra.mxu1 %v6257_v47  ;;  %v1280_v54 = vmax.f32 %v1267_v49, 0.0  ;;  %v6278_v47 = vpack.c.bf16 %v1446_v46, %v1444_v45  ;;  %v1449_v48 = vld [vmem:[#allocation7 + $0xe8] sm:$0xff]  ;;  %v1451_v49 = vld [vmem:[#allocation7 + $0xf8] sm:$0xff] }
 0x2a9   : > { %6259 = vmatprep.subr.bf16.mxu1 %v8014_v4  ;;  %v1448_v51 = vld [vmem:[#allocation7 + $0xe0] sm:$0xff] }
 0x2aa   : > { %v1268_v52 = vadd.f32 %v8672_v13, %v1251_v50  ;;  %v6280_v50 = vpack.c.bf16 %v1451_v49, %v1449_v48 }
 0x2ab   : > { %v1202_v53 = vpop.f32.mrb[16].mxu1 }
 0x2ac   : > { %v1281_v55 = vmax.f32 %v1268_v52, 0.0  ;;  %v1252_v56 = vmul.f32 %v8665_v9, %v1202_v53  ;;  %v6181_v57 = vpop.f32.mrb[17].mxu1  ;;  %v1450_v52 = vld [vmem:[#allocation7 + $0xf0] sm:$0xff] }
 0x2ad   : > { %v6282_v53 = vpack.c.bf16 %v1450_v52, %v1448_v51  ;;  %v1455_v51 = vld [vmem:[#allocation7 + $0x118] sm:$0xff] }
 0x2ae   : > { %v6260_v58 = vpack.c.bf16 %v1281_v55, %v1280_v54  ;;  %v1269_v60 = vadd.f32 %v8672_v13, %v1252_v56  ;;  %v1421_v54 = vld [vmem:[#allocation7 + $0x8] sm:$0xff]  ;;  %v1423_v55 = vld [vmem:[#allocation7 + $0x18] sm:$0xff] }
 0x2af   : > { %v1207_v59 = vpop.f32.mrb[18].mxu1  ;;  %v6284_v56 = vpack.c.bf16 %v1423_v55, %v1421_v54 }
 0x2b0   : > { %v1253_v61 = vmul.f32 %v8665_v9, %v1207_v59  ;;  %v6184_v62 = vpop.f32.mrb[19].mxu1  ;;  %6261 = vmatpush3.bf16.msra.mxu1 %v6260_v58  ;;  %v1282_v2 = vmax.f32 %v1269_v60, 0.0  ;;  %v1420_v58 = vld [vmem:[#allocation7] sm:$0xff]  ;;  %v1422_v59 = vld [vmem:[#allocation7 + $0x10] sm:$0xff] }
 0x2b1   : > { %6262 = vmatprep.subr.bf16.mxu1 %v8014_v4  ;;  %v1425_v62 = vld [vmem:[#allocation7 + $0x28] sm:$0xff] }
 0x2b2   : > { %v1270_v63 = vadd.f32 %v8672_v13, %v1253_v61  ;;  %v6286_v61 = vpack.c.bf16 %v1422_v59, %v1420_v58 }
 0x2b3   : > { %v1212_v1 = vpop.f32.mrb[20].mxu1 }
 0x2b4   : > { %v1283_v3 = vmax.f32 %v1270_v63, 0.0  ;;  %v1254_v5 = vmul.f32 %v8665_v9, %v1212_v1  ;;  %v6187_v8 = vpop.f32.mrb[21].mxu1  ;;  %v1427_v63 = vld [vmem:[#allocation7 + $0x38] sm:$0xff] }
 0x2b6   : > { %v6263_v11 = vpack.c.bf16 %v1283_v3, %v1282_v2  ;;  %v1271_v14 = vadd.f32 %v8672_v13, %v1254_v5 }
 0x2b7   : > { %v1217_v12 = vpop.f32.mrb[22].mxu1 }
 0x2b8   : > { %v1255_v15 = vmul.f32 %v8665_v9, %v1217_v12  ;;  %v6190_v16 = vpop.f32.mrb[23].mxu1  ;;  %6264 = vmatpush3.bf16.msra.mxu1 %v6263_v11  ;;  %v1284_v19 = vmax.f32 %v1271_v14, 0.0  ;;  %v1424_v11 = vld [vmem:[#allocation7 + $0x20] sm:$0xff] }
 0x2b9   : > { %6265 = vmatprep.subr.bf16.mxu1 %v8014_v4  ;;  %v6268_v4 = vpack.c.bf16 %v1439_v26, %v1437_v25 }
 0x2ba   : > { %v1272_v17 = vadd.f32 %v8672_v13, %v1255_v15 }
 0x2bb   : > { %v1222_v18 = vpop.f32.mrb[24].mxu1 }
 0x2bc   : > { %v1285_v20 = vmax.f32 %v1272_v17, 0.0  ;;  %v1256_v21 = vmul.f32 %v8665_v9, %v1222_v18  ;;  %v6193_v22 = vpop.f32.mrb[25].mxu1  ;;  %v1287_v9 = vld [vmem:[%s9378_s1] sm:$0xff] }
 0x2bd   : > { %v1426_v18 = vld [vmem:[#allocation7 + $0x30] sm:$0xff]  ;;  %v1431_v22 = vld [vmem:[#allocation7 + $0x58] sm:$0xff] }
 0x2be   : > { %v6266_v23 = vpack.c.bf16 %v1285_v20, %v1284_v19  ;;  %v1273_v24 = vadd.f32 %v8672_v13, %v1256_v21  ;;  %v1440_v13 = vld [vmem:[#allocation7 + $0xa0] sm:$0xff]  ;;  %v6288_v19 = vpack.c.bf16 %v1427_v63, %v1425_v62  ;;  %v1429_v21 = vld [vmem:[#allocation7 + $0x48] sm:$0xff]  ;;  %v6290_v27 = vpack.c.bf16 %v1426_v18, %v1424_v11 }
 0x2bf   : > { %v6274_v38 = vpack.c.bf16 %v1442_v34, %v1440_v13  ;;  %v1433_v34 = vld [vmem:[#allocation7 + $0x68] sm:$0xff] }
 0x2c0   : > { %6267 = vmatpush3.bf16.msra.mxu1 %v6266_v23  ;;  %v1286_v31 = vmax.f32 %v1273_v24, 0.0  ;;  %v6296_v48 = vpack.c.bf16 %v1435_v35, %v1433_v34 }
 0x2c1   : > { %6218 = vmatprep.subr.mxu1 %v8012_v0 }
 0x2c4   : > { %6219 = vmatpush3.msk.msra.mxu1 %vm1316_vm5, %v1286_v31 }
 0x2c5   : > { %6221 = vmatmul.mubr.msk.f32.vlgmr.msra.gmra.mrb[26].mxu1 %vm1294_vm6, %v1287_v9  ;;  %6269 = vmatprep.subr.bf16.mxu1 %v6268_v4  ;;  %v1430_v4 = vld [vmem:[#allocation7 + $0x50] sm:$0xff] }
 0x2c6   : > { %6223 = vmatprep.mubr.msk.f32.mxu1 %vm8013_vm0, %v8012_v0  ;;  %6271 = vmatpush1.bf16.msra.mxu1 %v6270_v32 }
 0x2c7   : > { %6273 = vmatprep.subr.bf16.mxu1 %v6272_v33  ;;  %v6292_v33 = vpack.c.bf16 %v1431_v22, %v1429_v21 }
 0x2c9   : > { %6224 = vmatmul.mubr.msk.f32.gmra.mrb[28].mxu1 %vm1294_vm6, %v1288_v37 }
 0x2ca   : > { %6226 = vmatprep.mubr.msk.f32.mxu1 %vm8013_vm0, %v8012_v0  ;;  %6275 = vmatpush1.bf16.msra.mxu1 %v6274_v38 }
 0x2cb   : > { %6277 = vmatprep.subr.bf16.mxu1 %v6276_v39 }
 0x2cd   : > { %6227 = vmatmul.mubr.msk.f32.gmra.mrb[30].mxu1 %vm1294_vm6, %v1289_v40  ;;  %v6294_v40 = vpack.c.bf16 %v1430_v4, %v1428_v28  ;;  %v1452_v4 = vld [vmem:[#allocation7 + $0x100] sm:$0xff] }
 0x2ce   : > { %6229 = vmatprep.mubr.msk.f32.mxu1 %vm8013_vm0, %v8012_v0  ;;  %6279 = vmatpush1.bf16.msra.mxu1 %v6278_v47 }
 0x2cf   : > { %6281 = vmatprep.subr.bf16.mxu1 %v6280_v50  ;;  %v1453_v50 = vld [vmem:[#allocation7 + $0x108] sm:$0xff] }
 0x2d0   : > { %v6300_v63 = vpack.c.bf16 %v1455_v51, %v1453_v50  ;;  %v1467_v50 = vld [vmem:[#allocation7 + $0x178] sm:$0xff] }
 0x2d1   : > { %6230 = vmatmul.mubr.msk.f32.gmra.mrb[32].mxu1 %vm1294_vm6, %v1290_v41  ;;  %v1432_v41 = vld [vmem:[#allocation7 + $0x60] sm:$0xff] }
 0x2d2   : > { %6232 = vmatprep.mubr.msk.f32.mxu1 %vm8013_vm0, %v8012_v0  ;;  %6283 = vmatpush1.bf16.msra.mxu1 %v6282_v53 }
 0x2d3   : > { %6285 = vmatprep.subr.bf16.mxu1 %v6284_v56 }
 0x2d5   : > { %6233 = vmatmul.mubr.msk.f32.gmra.mrb[34].mxu1 %vm1294_vm6, %v1291_v42 }
 0x2d6   : > { %6235 = vmatprep.mubr.msk.f32.mxu1 %vm8013_vm0, %v8012_v0 }
 0x2d9   : > { %6236 = vmatmul.mubr.msk.f32.gmra.mrb[36].mxu1 %vm1294_vm6, %v1292_v43 }
 0x2da   : > { %6238 = vmatprep.mubr.msk.f32.mxu1 %vm8013_vm0, %v8012_v0 }
 0x2dd   : > { %6239 = vmatmul.mubr.msk.f32.gmra.mrb[38].mxu1 %vm1294_vm6, %v1293_v44  ;;  %v1434_v44 = vld [vmem:[#allocation7 + $0x70] sm:$0xff] }
 0x2de   : > { %1594 = vmatprep.mubr.f32.mxu1 %v8012_v0  ;;  %v6298_v56 = vpack.c.bf16 %v1434_v44, %v1432_v41  ;;  %v1456_v41 = vld [vmem:[#allocation7 + $0x120] sm:$0xff]  ;;  %v1463_v44 = vld [vmem:[#allocation7 + $0x158] sm:$0xff] }
 0x398   : > { %v8746_v57 = vpop.f32.mrb[26].mxu1 }
 0x399   : > { %v6222_v60 = vpop.f32.mrb[27].mxu1  ;;  %v1506_v1 = vrot.slane %v8746_v57, 1  ;;  %v1745_v2 = vrot.slane %v8746_v57, 2  ;;  %v1884_v3 = vrot.slane %v8746_v57, 3  ;;  %v2022_v5 = vrot.slane %v8746_v57, 4 }
 0x39c   : > { %v8752_v8 = vpop.f32.mrb[28].mxu1 }
 0x39d   : > { %v1507_v12 = vrot.slane %v8752_v8, 1  ;;  %v1746_v14 = vrot.slane %v8752_v8, 2  ;;  %v1885_v15 = vrot.slane %v8752_v8, 3  ;;  %v2023_v16 = vrot.slane %v8752_v8, 4  ;;  %v6225_v17 = vpop.f32.mrb[29].mxu1 }
 0x39f   : > { %v1508_v20 = vsel %vm695_vm2, %v1506_v1, %v1507_v12  ;;  %v8760_v23 = vsel %vm1041_vm4, %v1745_v2, %v1746_v14  ;;  %v8763_v24 = vsel %vm1883_vm8, %v1884_v3, %v1885_v15  ;;  %v8766_v25 = vsel %vm750_vm1, %v2022_v5, %v2023_v16 }
 0x3a0   : > { %v8768_v26 = vpop.f32.mrb[30].mxu1  ;;  %5770 = vmatmul.mubr.msk.f32.vlgmr.msra.gmra.mrb[40].mxu1 %vm1517_vm7, %v1508_v20 }
 0x3a1   : > { %v6228_v29 = vpop.f32.mrb[31].mxu1  ;;  %1600 = vmatprep.mubr.f32.mxu1 %v8012_v0  ;;  %v1509_v30 = vrot.slane %v8768_v26, 1  ;;  %6287 = vmatpush1.bf16.msra.mxu1 %v6286_v61  ;;  %v1748_v31 = vrot.slane %v8768_v26, 2  ;;  %v1887_v9 = vrot.slane %v8768_v26, 3  ;;  %v2025_v32 = vrot.slane %v8768_v26, 4 }
 0x3a2   : > { %6289 = vmatprep.subr.bf16.mxu1 %v6288_v19 }
 0x3a3   : > { %v1510_v13 = vsel %vm695_vm2, %v1507_v12, %v1509_v30  ;;  %v8778_v36 = vsel %vm1041_vm4, %v1746_v14, %v1748_v31  ;;  %v8781_v37 = vsel %vm1883_vm8, %v1885_v15, %v1887_v9  ;;  %v8784_v38 = vsel %vm750_vm1, %v2023_v16, %v2025_v32 }
 0x3a4   : > { %v8786_v39 = vpop.f32.mrb[32].mxu1  ;;  %5771 = vmatmul.mubr.msk.f32.gmra.mrb[42].mxu1 %vm1517_vm7, %v1510_v13 }
 0x3a5   : > { %v6231_v42 = vpop.f32.mrb[33].mxu1  ;;  %1606 = vmatprep.mubr.f32.mxu1 %v8012_v0  ;;  %v1511_v43 = vrot.slane %v8786_v39, 1  ;;  %6291 = vmatpush1.bf16.msra.mxu1 %v6290_v27  ;;  %v1750_v45 = vrot.slane %v8786_v39, 2  ;;  %v1889_v46 = vrot.slane %v8786_v39, 3  ;;  %v2027_v47 = vrot.slane %v8786_v39, 4 }
 0x3a6   : > { %6293 = vmatprep.subr.bf16.mxu1 %v6292_v33  ;;  %v1458_v42 = vld [vmem:[#allocation7 + $0x130] sm:$0xff] }
 0x3a7   : > { %v1512_v49 = vsel %vm695_vm2, %v1509_v30, %v1511_v43  ;;  %v8796_v52 = vsel %vm1041_vm4, %v1748_v31, %v1750_v45  ;;  %v8799_v53 = vsel %vm1883_vm8, %v1887_v9, %v1889_v46  ;;  %v8802_v54 = vsel %vm750_vm1, %v2025_v32, %v2027_v47  ;;  %v1454_v31 = vld [vmem:[#allocation7 + $0x110] sm:$0xff]  ;;  %v1457_v9 = vld [vmem:[#allocation7 + $0x128] sm:$0xff]  ;;  %v1459_v32 = vld [vmem:[#allocation7 + $0x138] sm:$0xff] }
 0x3a8   : > { %v8804_v55 = vpop.f32.mrb[34].mxu1  ;;  %5772 = vmatmul.mubr.msk.f32.gmra.mrb[44].mxu1 %vm1517_vm7, %v1512_v49  ;;  %v6302_v35 = vpack.c.bf16 %v1454_v31, %v1452_v4  ;;  %v1465_v49 = vld [vmem:[#allocation7 + $0x168] sm:$0xff]  ;;  %v1482_v4 = vld [vmem:[#allocation7 + $0x1f0] sm:$0xff] }
 0x3a9   : > { %v6234_v58 = vpop.f32.mrb[35].mxu1  ;;  %1612 = vmatprep.mubr.f32.mxu1 %v8012_v0  ;;  %v1513_v59 = vrot.slane %v8804_v55, 1  ;;  %6295 = vmatpush1.bf16.msra.mxu1 %v6294_v40  ;;  %v1752_v60 = vrot.slane %v8804_v55, 2  ;;  %v1891_v61 = vrot.slane %v8804_v55, 3  ;;  %v2029_v62 = vrot.slane %v8804_v55, 4  ;;  %v1485_v31 = vld [vmem:[#allocation7 + $0x208] sm:$0xff] }
 0x3aa   : > { %6297 = vmatprep.subr.bf16.mxu1 %v6296_v48  ;;  %v6304_v40 = vpack.c.bf16 %v1459_v32, %v1457_v9  ;;  %v1462_v48 = vld [vmem:[#allocation7 + $0x150] sm:$0xff]  ;;  %v1487_v9 = vld [vmem:[#allocation7 + $0x218] sm:$0xff] }
 0x3ab   : > { %v1514_v1 = vsel %vm695_vm2, %v1511_v43, %v1513_v59  ;;  %v8814_v2 = vsel %vm1041_vm4, %v1750_v45, %v1752_v60  ;;  %v8817_v3 = vsel %vm1883_vm8, %v1889_v46, %v1891_v61  ;;  %v8820_v5 = vsel %vm750_vm1, %v2027_v47, %v2029_v62  ;;  %v1461_v43 = vld [vmem:[#allocation7 + $0x148] sm:$0xff]  ;;  %v1460_v47 = vld [vmem:[#allocation7 + $0x140] sm:$0xff]  ;;  %v1466_v58 = vld [vmem:[#allocation7 + $0x170] sm:$0xff] }
 0x3ac   : > { %v8822_v11 = vpop.f32.mrb[36].mxu1  ;;  %5773 = vmatmul.mubr.msk.f32.gmra.mrb[46].mxu1 %vm1517_vm7, %v1514_v1  ;;  %v6306_v45 = vpack.c.bf16 %v1458_v42, %v1456_v41  ;;  %v6308_v46 = vpack.c.bf16 %v1463_v44, %v1461_v43  ;;  %v6310_v51 = vpack.c.bf16 %v1462_v48, %v1460_v47  ;;  %v1475_v1 = vld [vmem:[#allocation7 + $0x1b8] sm:$0xff]  ;;  %v1488_v43 = vld [vmem:[#allocation7 + $0x220] sm:$0xff]  ;;  %v1490_v44 = vld [vmem:[#allocation7 + $0x230] sm:$0xff] }
 0x3ad   : > { %v6237_v12 = vpop.f32.mrb[37].mxu1  ;;  %1618 = vmatprep.mubr.f32.mxu1 %v8012_v0  ;;  %v1515_v14 = vrot.slane %v8822_v11, 1  ;;  %6299 = vmatpush1.bf16.msra.mxu1 %v6298_v56  ;;  %v1754_v15 = vrot.slane %v8822_v11, 2  ;;  %v1893_v16 = vrot.slane %v8822_v11, 3  ;;  %v2031_v17 = vrot.slane %v8822_v11, 4  ;;  %v1491_v41 = vld [vmem:[#allocation7 + $0x238] sm:$0xff] }
 0x3ae   : > { %6301 = vmatprep.subr.bf16.mxu1 %v6300_v63  ;;  %v6312_v56 = vpack.c.bf16 %v1467_v50, %v1465_v49  ;;  %v1473_v63 = vld [vmem:[#allocation7 + $0x1a8] sm:$0xff]  ;;  %v1492_v48 = vld [vmem:[#allocation7 + $0x240] sm:$0xff]  ;;  %v1494_v49 = vld [vmem:[#allocation7 + $0x250] sm:$0xff] }
 0x3af   : > { %v1516_v18 = vsel %vm695_vm2, %v1513_v59, %v1515_v14  ;;  %v8832_v19 = vsel %vm1041_vm4, %v1752_v60, %v1754_v15  ;;  %v8835_v20 = vsel %vm1883_vm8, %v1891_v61, %v1893_v16  ;;  %v8838_v21 = vsel %vm750_vm1, %v2029_v62, %v2031_v17  ;;  %v1469_v59 = vld [vmem:[#allocation7 + $0x188] sm:$0xff]  ;;  %v1471_v60 = vld [vmem:[#allocation7 + $0x198] sm:$0xff] }
 0x3b0   : > { %v1416_v22 = vpop.f32.mrb[38].mxu1  ;;  %5774 = vmatmul.mubr.msk.f32.gmra.mrb[48].mxu1 %vm1517_vm7, %v1516_v18  ;;  %v6316_v62 = vpack.c.bf16 %v1471_v60, %v1469_v59  ;;  %v1499_v50 = vld [vmem:[#allocation7 + $0x278] sm:$0xff] }
 0x3b1   : > { %v1756_v27 = vrot.slane %v1416_v22, 2  ;;  %v1895_v28 = vrot.slane %v1416_v22, 3  ;;  %v2033_v29 = vrot.slane %v1416_v22, 4  ;;  %1624 = vmatprep.mubr.f32.mxu1 %v8012_v0  ;;  %v6240_v30 = vpop.f32.mrb[39].mxu1  ;;  %v1476_v22 = vld [vmem:[#allocation7 + $0x1c0] sm:$0xff]  ;;  %v2406_v60 = vld [vmem:[#allocation10 + $0x230] sm:$0xff] }
 0x3b3   : > { %v8843_v33 = vsel %vm1041_vm4, %v1754_v15, %v1756_v27  ;;  %v8846_v13 = vsel %vm1883_vm8, %v1893_v16, %v1895_v28  ;;  %v8849_v34 = vsel %vm750_vm1, %v2031_v17, %v2033_v29  ;;  %v1474_v15 = vld [vmem:[#allocation7 + $0x1b0] sm:$0xff]  ;;  %v1477_v16 = vld [vmem:[#allocation7 + $0x1c8] sm:$0xff]  ;;  %v1479_v17 = vld [vmem:[#allocation7 + $0x1d8] sm:$0xff] }
 0x3b4   : > { %5775 = vmatmul.mubr.msk.f32.gmra.mrb[50].mxu1 %vm1517_vm7, %v1515_v14  ;;  %v1472_v14 = vld [vmem:[#allocation7 + $0x1a0] sm:$0xff]  ;;  %v6324_v18 = vpack.c.bf16 %v1479_v17, %v1477_v16  ;;  %v1478_v27 = vld [vmem:[#allocation7 + $0x1d0] sm:$0xff]  ;;  %v1483_v28 = vld [vmem:[#allocation7 + $0x1f8] sm:$0xff] }
 0x3b5   : > { %1707 = vmatprep.mubr.f32.mxu1 %v8012_v0  ;;  %v6326_v29 = vpack.c.bf16 %v1478_v27, %v1476_v22  ;;  %v2417_v16 = vld [vmem:[#allocation10 + $0x288] sm:$0xff]  ;;  %v2419_v17 = vld [vmem:[#allocation10 + $0x298] sm:$0xff]  ;;  %v2416_v22 = vld [vmem:[#allocation10 + $0x280] sm:$0xff] }
 0x3b6   : > { %v2418_v27 = vld [vmem:[#allocation10 + $0x290] sm:$0xff] }
 0x3b8   : > { %5776 = vmatmul.mubr.msk.f32.vlgmr.msra.gmra.mrb[40].mxu1 %vm1517_vm7, %v8746_v57  ;;  %v1464_v57 = vld [vmem:[#allocation7 + $0x160] sm:$0xff] }
 0x3b9   : > { %1713 = vmatprep.mubr.f32.mxu1 %v8012_v0  ;;  %6303 = vmatpush1.bf16.msra.mxu1 %v6302_v35  ;;  %v6314_v61 = vpack.c.bf16 %v1466_v58, %v1464_v57  ;;  %v6332_v35 = vpack.c.bf16 %v1487_v9, %v1485_v31  ;;  %v1498_v57 = vld [vmem:[#allocation7 + $0x270] sm:$0xff]  ;;  %v2427_v9 = vld [vmem:[#allocation10 + $0x2d8] sm:$0xff] }
 0x3ba   : > { %6305 = vmatprep.subr.bf16.mxu1 %v6304_v40  ;;  %v1489_v40 = vld [vmem:[#allocation7 + $0x228] sm:$0xff] }
 0x3bb   : > { %v2425_v31 = vld [vmem:[#allocation10 + $0x2c8] sm:$0xff] }
 0x3bc   : > { %5777 = vmatmul.mubr.msk.f32.gmra.mrb[42].mxu1 %vm1517_vm7, %v8752_v8  ;;  %v1468_v8 = vld [vmem:[#allocation7 + $0x180] sm:$0xff] }
 0x3bd   : > { %1719 = vmatprep.mubr.f32.mxu1 %v8012_v0  ;;  %6307 = vmatpush1.bf16.msra.mxu1 %v6306_v45  ;;  %v1493_v45 = vld [vmem:[#allocation7 + $0x248] sm:$0xff] }
 0x3be   : > { %6309 = vmatprep.subr.bf16.mxu1 %v6308_v46  ;;  %v1495_v46 = vld [vmem:[#allocation7 + $0x258] sm:$0xff] }
 0x3bf   : > { %v6340_v47 = vpack.c.bf16 %v1495_v46, %v1493_v45  ;;  %v2433_v45 = vld [vmem:[#allocation10 + $0x308] sm:$0xff]  ;;  %v2435_v46 = vld [vmem:[#allocation10 + $0x318] sm:$0xff] }
 0x3c0   : > { %5778 = vmatmul.mubr.msk.f32.gmra.mrb[44].mxu1 %vm1517_vm7, %v8768_v26  ;;  %v1470_v26 = vld [vmem:[#allocation7 + $0x190] sm:$0xff] }
 0x3c1   : > { %1725 = vmatprep.mubr.f32.mxu1 %v8012_v0  ;;  %6311 = vmatpush1.bf16.msra.mxu1 %v6310_v51  ;;  %v6318_v12 = vpack.c.bf16 %v1470_v26, %v1468_v8  ;;  %v6342_v51 = vpack.c.bf16 %v1494_v49, %v1492_v48  ;;  %v2408_v26 = vld [vmem:[#allocation10 + $0x240] sm:$0xff]  ;;  %v2434_v49 = vld [vmem:[#allocation10 + $0x310] sm:$0xff] }
 0x3c2   : > { %6313 = vmatprep.subr.bf16.mxu1 %v6312_v56  ;;  %v2432_v48 = vld [vmem:[#allocation10 + $0x300] sm:$0xff] }
 0x3c4   : > { %5779 = vmatmul.mubr.msk.f32.gmra.mrb[46].mxu1 %vm1517_vm7, %v8786_v39  ;;  %v6320_v39 = vpack.c.bf16 %v1475_v1, %v1473_v63  ;;  %v2413_v63 = vld [vmem:[#allocation10 + $0x268] sm:$0xff]  ;;  %v2415_v1 = vld [vmem:[#allocation10 + $0x278] sm:$0xff] }
 0x3c5   : > { %1731 = vmatprep.mubr.f32.mxu1 %v8012_v0  ;;  %6315 = vmatpush1.bf16.msra.mxu1 %v6314_v61  ;;  %v2409_v61 = vld [vmem:[#allocation10 + $0x248] sm:$0xff] }
 0x3c6   : > { %6317 = vmatprep.subr.bf16.mxu1 %v6316_v62  ;;  %v2411_v62 = vld [vmem:[#allocation10 + $0x258] sm:$0xff] }
 0x3c7   : > { %v6370_v8 = vpack.c.bf16 %v2411_v62, %v2409_v61  ;;  %v2449_v61 = vld [vmem:[#allocation10 + $0x388] sm:$0xff]  ;;  %v2451_v62 = vld [vmem:[#allocation10 + $0x398] sm:$0xff] }
 0x3c8   : > { %5780 = vmatmul.mubr.msk.f32.gmra.mrb[48].mxu1 %vm1517_vm7, %v8804_v55  ;;  %v6322_v55 = vpack.c.bf16 %v1474_v15, %v1472_v14  ;;  %v2412_v14 = vld [vmem:[#allocation10 + $0x260] sm:$0xff]  ;;  %v2414_v15 = vld [vmem:[#allocation10 + $0x270] sm:$0xff] }
 0x3c9   : > { %1737 = vmatprep.mubr.f32.mxu1 %v8012_v0 }
 0x3cc   : > { %5781 = vmatmul.mubr.msk.f32.gmra.mrb[50].mxu1 %vm1517_vm7, %v8822_v11  ;;  %v1481_v11 = vld [vmem:[#allocation7 + $0x1e8] sm:$0xff] }
 0x3cd   : > { %1834 = vmatprep.mubr.f32.mxu1 %v8012_v0  ;;  %v6328_v30 = vpack.c.bf16 %v1483_v28, %v1481_v11  ;;  %v2421_v11 = vld [vmem:[#allocation10 + $0x2a8] sm:$0xff]  ;;  %v2423_v28 = vld [vmem:[#allocation10 + $0x2b8] sm:$0xff] }
 0x3d0   : > { %5782 = vmatmul.mubr.msk.f32.vlgmr.msra.gmra.mrb[40].mxu1 %vm1517_vm7, %v8760_v23  ;;  %v1480_v23 = vld [vmem:[#allocation7 + $0x1e0] sm:$0xff] }
 0x3d1   : > { %1840 = vmatprep.mubr.f32.mxu1 %v8012_v0  ;;  %6319 = vmatpush1.bf16.msra.mxu1 %v6318_v12  ;;  %v6330_v32 = vpack.c.bf16 %v1482_v4, %v1480_v23  ;;  %v2420_v23 = vld [vmem:[#allocation10 + $0x2a0] sm:$0xff]  ;;  %v2422_v4 = vld [vmem:[#allocation10 + $0x2b0] sm:$0xff] }
 0x3d2   : > { %6321 = vmatprep.subr.bf16.mxu1 %v6320_v39  ;;  %v6374_v39 = vpack.c.bf16 %v2415_v1, %v2413_v63  ;;  %v2453_v63 = vld [vmem:[#allocation10 + $0x3a8] sm:$0xff]  ;;  %v2455_v1 = vld [vmem:[#allocation10 + $0x3b8] sm:$0xff] }
 0x3d4   : > { %5783 = vmatmul.mubr.msk.f32.gmra.mrb[42].mxu1 %vm1517_vm7, %v8778_v36  ;;  %v1484_v36 = vld [vmem:[#allocation7 + $0x200] sm:$0xff] }
 0x3d5   : > { %1846 = vmatprep.mubr.f32.mxu1 %v8012_v0  ;;  %6323 = vmatpush1.bf16.msra.mxu1 %v6322_v55  ;;  %v6376_v55 = vpack.c.bf16 %v2414_v15, %v2412_v14  ;;  %v2452_v14 = vld [vmem:[#allocation10 + $0x3a0] sm:$0xff]  ;;  %v2454_v15 = vld [vmem:[#allocation10 + $0x3b0] sm:$0xff] }
 0x3d6   : > { %6325 = vmatprep.subr.bf16.mxu1 %v6324_v18  ;;  %v6378_v18 = vpack.c.bf16 %v2419_v17, %v2417_v16  ;;  %v6416_v16 = vpack.c.bf16 %v2454_v15, %v2452_v14  ;;  %v2160_v17 = vld [vmem:[#allocation8] sm:$0xf] }
 0x3d8   : > { %5784 = vmatmul.mubr.msk.f32.gmra.mrb[44].mxu1 %vm1517_vm7, %v8796_v52  ;;  %v1486_v52 = vld [vmem:[#allocation7 + $0x210] sm:$0xff] }
 0x3d9   : > { %1852 = vmatprep.mubr.f32.mxu1 %v8012_v0  ;;  %6327 = vmatpush1.bf16.msra.mxu1 %v6326_v29  ;;  %v6334_v42 = vpack.c.bf16 %v1486_v52, %v1484_v36  ;;  %v6380_v29 = vpack.c.bf16 %v2418_v27, %v2416_v22  ;;  %v2424_v36 = vld [vmem:[#allocation10 + $0x2c0] sm:$0xff]  ;;  %v2426_v52 = vld [vmem:[#allocation10 + $0x2d0] sm:$0xff]  ;;  %v8930_v27 = vsub.s32 3, %v8659_v6 }
 0x3da   : > { %6329 = vmatprep.subr.bf16.mxu1 %v6328_v30  ;;  %v6382_v30 = vpack.c.bf16 %v2423_v28, %v2421_v11  ;;  %v2195_v28 = vrot.slane %v2160_v17, %v8668_v10 }
 0x3dc   : > { %5785 = vmatmul.mubr.msk.f32.gmra.mrb[46].mxu1 %vm1517_vm7, %v8814_v2  ;;  %v6336_v2 = vpack.c.bf16 %v1491_v41, %v1489_v40  ;;  %v2429_v40 = vld [vmem:[#allocation10 + $0x2e8] sm:$0xff]  ;;  %v2431_v41 = vld [vmem:[#allocation10 + $0x2f8] sm:$0xff] }
 0x3dd   : > { %1858 = vmatprep.mubr.f32.mxu1 %v8012_v0  ;;  %6331 = vmatpush1.bf16.msra.mxu1 %v6330_v32  ;;  %v6384_v32 = vpack.c.bf16 %v2422_v4, %v2420_v23 }
 0x3de   : > { %6333 = vmatprep.subr.bf16.mxu1 %v6332_v35  ;;  %v6386_v35 = vpack.c.bf16 %v2427_v9, %v2425_v31  ;;  %v2205_v31 = vrot.slane %v2195_v28, %v8668_v10 }
 0x3e0   : > { %5786 = vmatmul.mubr.msk.f32.gmra.mrb[48].mxu1 %vm1517_vm7, %v8832_v19  ;;  %v6338_v19 = vpack.c.bf16 %v1490_v44, %v1488_v43  ;;  %v2428_v43 = vld [vmem:[#allocation10 + $0x2e0] sm:$0xff]  ;;  %v2430_v44 = vld [vmem:[#allocation10 + $0x2f0] sm:$0xff] }
 0x3e1   : > { %1864 = vmatprep.mubr.f32.mxu1 %v8012_v0 }
 0x3e4   : > { %5787 = vmatmul.mubr.msk.f32.gmra.mrb[50].mxu1 %vm1517_vm7, %v8843_v33  ;;  %v1497_v33 = vld [vmem:[#allocation7 + $0x268] sm:$0xff] }
 0x3e5   : > { %1973 = vmatprep.mubr.f32.mxu1 %v8012_v0  ;;  %v6344_v56 = vpack.c.bf16 %v1499_v50, %v1497_v33  ;;  %v2437_v33 = vld [vmem:[#allocation10 + $0x328] sm:$0xff]  ;;  %v2439_v50 = vld [vmem:[#allocation10 + $0x338] sm:$0xff] }
 0x3e8   : > { %5788 = vmatmul.mubr.msk.f32.vlgmr.msra.gmra.mrb[40].mxu1 %vm1517_vm7, %v8763_v24  ;;  %v1496_v24 = vld [vmem:[#allocation7 + $0x260] sm:$0xff] }
 0x3e9   : > { %1979 = vmatprep.mubr.f32.mxu1 %v8012_v0  ;;  %6335 = vmatpush1.bf16.msra.mxu1 %v6334_v42  ;;  %v6346_v58 = vpack.c.bf16 %v1498_v57, %v1496_v24  ;;  %v6388_v42 = vpack.c.bf16 %v2426_v52, %v2424_v36  ;;  %v2436_v24 = vld [vmem:[#allocation10 + $0x320] sm:$0xff]  ;;  %v2438_v57 = vld [vmem:[#allocation10 + $0x330] sm:$0xff] }
 0x3ea   : > { %6337 = vmatprep.subr.bf16.mxu1 %v6336_v2  ;;  %v6390_v2 = vpack.c.bf16 %v2431_v41, %v2429_v40 }
 0x3ec   : > { %5789 = vmatmul.mubr.msk.f32.gmra.mrb[42].mxu1 %vm1517_vm7, %v8781_v37  ;;  %v2403_v37 = vld [vmem:[#allocation10 + $0x218] sm:$0xff] }
 0x3ed   : > { %1985 = vmatprep.mubr.f32.mxu1 %v8012_v0  ;;  %6339 = vmatpush1.bf16.msra.mxu1 %v6338_v19  ;;  %v6392_v19 = vpack.c.bf16 %v2430_v44, %v2428_v43 }
 0x3ee   : > { %6341 = vmatprep.subr.bf16.mxu1 %v6340_v47  ;;  %v6394_v47 = vpack.c.bf16 %v2435_v46, %v2433_v45 }
 0x3f0   : > { %5790 = vmatmul.mubr.msk.f32.gmra.mrb[44].mxu1 %vm1517_vm7, %v8799_v53 }
 0x3f1   : > { %1991 = vmatprep.mubr.f32.mxu1 %v8012_v0  ;;  %6343 = vmatpush1.bf16.msra.mxu1 %v6342_v51  ;;  %v6396_v51 = vpack.c.bf16 %v2434_v49, %v2432_v48 }
 0x3f2   : > { %6345 = vmatprep.subr.bf16.mxu1 %v6344_v56  ;;  %v6398_v56 = vpack.c.bf16 %v2439_v50, %v2437_v33 }
 0x3f4   : > { %5791 = vmatmul.mubr.msk.f32.gmra.mrb[46].mxu1 %vm1517_vm7, %v8817_v3  ;;  %v2405_v3 = vld [vmem:[#allocation10 + $0x228] sm:$0xff] }
 0x3f5   : > { %1997 = vmatprep.mubr.f32.mxu1 %v8012_v0  ;;  %6347 = vmatpush1.bf16.msra.mxu1 %v6346_v58  ;;  %v2441_v58 = vld [vmem:[#allocation10 + $0x348] sm:$0xff] }
 0x3f8   : > { %5792 = vmatmul.mubr.msk.f32.gmra.mrb[48].mxu1 %vm1517_vm7, %v8835_v20  ;;  %v2407_v20 = vld [vmem:[#allocation10 + $0x238] sm:$0xff] }
 0x3f9   : > { %2003 = vmatprep.mubr.f32.mxu1 %v8012_v0  ;;  %v6366_v59 = vpack.c.bf16 %v2407_v20, %v2405_v3  ;;  %v2445_v3 = vld [vmem:[#allocation10 + $0x368] sm:$0xff]  ;;  %v2447_v20 = vld [vmem:[#allocation10 + $0x378] sm:$0xff] }
 0x3fc   : > { %5793 = vmatmul.mubr.msk.f32.gmra.mrb[50].mxu1 %vm1517_vm7, %v8846_v13 }
 0x3fd   : > { %2111 = vmatprep.mubr.f32.mxu1 %v8012_v0 }
 0x400   : > { %5794 = vmatmul.mubr.msk.f32.vlgmr.msra.gmra.mrb[40].mxu1 %vm1517_vm7, %v8766_v25  ;;  %v2401_v25 = vld [vmem:[#allocation10 + $0x208] sm:$0xff] }
 0x401   : > { %2117 = vmatprep.mubr.f32.mxu1 %v8012_v0  ;;  %v6362_v53 = vpack.c.bf16 %v2403_v37, %v2401_v25  ;;  %v2443_v25 = vld [vmem:[#allocation10 + $0x358] sm:$0xff]  ;;  %v6400_v37 = vpack.c.bf16 %v2438_v57, %v2436_v24 }
 0x403   : > { %6363 = vmatprep.subr.bf16.mxu1 %v6362_v53  ;;  %v2440_v53 = vld [vmem:[#allocation10 + $0x340] sm:$0xff] }
 0x404   : > { %5795 = vmatmul.mubr.msk.f32.gmra.mrb[42].mxu1 %vm1517_vm7, %v8784_v38  ;;  %v2400_v38 = vld [vmem:[#allocation10 + $0x200] sm:$0xff] }
 0x405   : > { %2123 = vmatprep.mubr.f32.mxu1 %v8012_v0 }
 0x408   : > { %5796 = vmatmul.mubr.msk.f32.gmra.mrb[44].mxu1 %vm1517_vm7, %v8802_v54  ;;  %v2402_v54 = vld [vmem:[#allocation10 + $0x210] sm:$0xff] }
 0x409   : > { %2129 = vmatprep.mubr.f32.mxu1 %v8012_v0  ;;  %v6364_v13 = vpack.c.bf16 %v2402_v54, %v2400_v38  ;;  %v6402_v38 = vpack.c.bf16 %v2443_v25, %v2441_v58  ;;  %v2442_v54 = vld [vmem:[#allocation10 + $0x350] sm:$0xff] }
 0x40b   : > { %6365 = vmatpush1.bf16.msra.mxu1 %v6364_v13  ;;  %v6404_v13 = vpack.c.bf16 %v2442_v54, %v2440_v53 }
 0x40c   : > { %5797 = vmatmul.mubr.msk.f32.gmra.mrb[46].mxu1 %vm1517_vm7, %v8820_v5  ;;  %v2404_v5 = vld [vmem:[#allocation10 + $0x220] sm:$0xff]  ;;  %6367 = vmatprep.subr.bf16.mxu1 %v6366_v59  ;;  %v6406_v59 = vpack.c.bf16 %v2447_v20, %v2445_v3 }
 0x40d   : > { %2135 = vmatprep.mubr.f32.mxu1 %v8012_v0 }
 0x410   : > { %5798 = vmatmul.mubr.msk.f32.gmra.mrb[48].mxu1 %vm1517_vm7, %v8838_v21  ;;  %v6368_v21 = vpack.c.bf16 %v2406_v60, %v2404_v5  ;;  %v2444_v5 = vld [vmem:[#allocation10 + $0x360] sm:$0xff]  ;;  %v2446_v60 = vld [vmem:[#allocation10 + $0x370] sm:$0xff] }
 0x411   : > { %2141 = vmatprep.mubr.f32.mxu1 %v8012_v0 }
 0x412   : > { %6369 = vmatpush1.bf16.msra.mxu1 %v6368_v21  ;;  %v6408_v21 = vpack.c.bf16 %v2446_v60, %v2444_v5 }
 0x413   : > { %6371 = vmatprep.subr.bf16.mxu1 %v6370_v8  ;;  %v6410_v8 = vpack.c.bf16 %v2451_v62, %v2449_v61 }
 0x414   : > { %5799 = vmatmul.mubr.msk.f32.gmra.mrb[50].mxu1 %vm1517_vm7, %v8849_v34  ;;  %v2410_v34 = vld [vmem:[#allocation10 + $0x250] sm:$0xff] }
 0x415   : > { %v6372_v12 = vpack.c.bf16 %v2410_v34, %v2408_v26  ;;  %v2448_v26 = vld [vmem:[#allocation10 + $0x380] sm:$0xff]  ;;  %v2450_v34 = vld [vmem:[#allocation10 + $0x390] sm:$0xff] }
 0x417   : > { %6373 = vmatpush1.bf16.msra.mxu1 %v6372_v12  ;;  %v6412_v12 = vpack.c.bf16 %v2450_v34, %v2448_v26 }
 0x418   : > { %6375 = vmatprep.subr.bf16.mxu1 %v6374_v39  ;;  %v6414_v39 = vpack.c.bf16 %v2455_v1, %v2453_v63 }
 0x41b   : > { %6377 = vmatpush1.bf16.msra.mxu1 %v6376_v55  ;;  %v8925_v55 = vsub.s32 2, %v8659_v6 }
 0x41c   : > { %6379 = vmatprep.subr.bf16.mxu1 %v6378_v18  ;;  %v2165_v18 = vrot.slane %v2160_v17, %v8662_v7 }
 0x41d   : > { %v2169_v22 = vrot.slane %v2160_v17, %v8925_v55 }
 0x41e   : > { %v2175_v11 = vrot.slane %v2165_v18, %v8662_v7 }
 0x41f   : > { %6381 = vmatpush1.bf16.msra.mxu1 %v6380_v29  ;;  %v2179_v29 = vrot.slane %v2169_v22, %v8662_v7 }
 0x420   : > { %6383 = vmatprep.subr.bf16.mxu1 %v6382_v30  ;;  %v2199_v30 = vrot.slane %v2160_v17, %v8930_v27 }
 0x423   : > { %6385 = vmatpush1.bf16.msra.mxu1 %v6384_v32 }
 0x424   : > { %6387 = vmatprep.subr.bf16.mxu1 %v6386_v35  ;;  %v2209_v35 = vrot.slane %v2199_v30, %v8668_v10 }
 0x427   : > { %6389 = vmatpush1.bf16.msra.mxu1 %v6388_v42 }
 0x428   : > { %6391 = vmatprep.subr.bf16.mxu1 %v6390_v2 }
 0x42b   : > { %6393 = vmatpush1.bf16.msra.mxu1 %v6392_v19 }
 0x42c   : > { %6395 = vmatprep.subr.bf16.mxu1 %v6394_v47 }
 0x42f   : > { %6397 = vmatpush1.bf16.msra.mxu1 %v6396_v51 }
 0x430   : > { %6399 = vmatprep.subr.bf16.mxu1 %v6398_v56 }
 0x433   : > { %6401 = vmatpush1.bf16.msra.mxu1 %v6400_v37 }
 0x434   : > { %6403 = vmatprep.subr.bf16.mxu1 %v6402_v38 }
 0x437   : > { %6405 = vmatpush1.bf16.msra.mxu1 %v6404_v13 }
 0x438   : > { %6407 = vmatprep.subr.bf16.mxu1 %v6406_v59 }
 0x43b   : > { %6409 = vmatpush1.bf16.msra.mxu1 %v6408_v21 }
 0x43c   : > { %6411 = vmatprep.subr.bf16.mxu1 %v6410_v8 }
 0x43f   : > { %6413 = vmatpush1.bf16.msra.mxu1 %v6412_v12 }
 0x440   : > { %6415 = vmatprep.subr.bf16.mxu1 %v6414_v39 }
 0x443   : > { %6417 = vmatpush1.bf16.msra.mxu1 %v6416_v16 }
 0x4d3   : > { %v2113_v23 = vpop.f32.mrb[40].mxu1 }
 0x4d4   : > { %v2180_v4 = vmul.f32 %v2175_v11, %v2113_v23  ;;  %v2115_v9 = vpop.f32.mrb[41].mxu1  ;;  %v2236_v23 = vld [vmem:[%s9379_s2 + $0x10] sm:$0x7f] }
 0x4d5   : > { %v2181_v32 = vmul.f32 %v2179_v29, %v2115_v9 }
 0x4d6   : > { %v2210_v52 = vadd.f32 %v2205_v31, %v2180_v4  ;;  %v2457_v4 = vld [vmem:[#allocation10 + $0x3c8] sm:$0xff] }
 0x4d7   : > { %v2119_v36 = vpop.f32.mrb[42].mxu1  ;;  %v2211_v2 = vadd.f32 %v2209_v35, %v2181_v32  ;;  %v2456_v32 = vld [vmem:[#allocation10 + $0x3c0] sm:$0xff] }
 0x4d8   : > { %v2182_v40 = vmul.f32 %v2175_v11, %v2119_v36  ;;  %v2121_v41 = vpop.f32.mrb[43].mxu1  ;;  %v2222_v46 = vmax.f32 %v2210_v52, 0.0  ;;  %v2461_v52 = vld [vmem:[#allocation10 + $0x3e8] sm:$0xff] }
 0x4d9   : > { %v2183_v42 = vmul.f32 %v2179_v29, %v2121_v41  ;;  %v2223_v33 = vmax.f32 %v2211_v2, 0.0  ;;  %v2462_v2 = vld [vmem:[#allocation10 + $0x3f0] sm:$0xff] }
 0x4da   : > { %v2212_v43 = vadd.f32 %v2205_v31, %v2182_v40  ;;  %v2463_v40 = vld [vmem:[#allocation10 + $0x3f8] sm:$0xff] }
 0x4db   : > { %v2125_v44 = vpop.f32.mrb[44].mxu1  ;;  %v2213_v45 = vadd.f32 %v2209_v35, %v2183_v42  ;;  %v6422_v41 = vpack.c.bf16 %v2463_v40, %v2461_v52  ;;  %v2460_v42 = vld [vmem:[#allocation10 + $0x3e0] sm:$0xff] }
 0x4dc   : > { %v2224_v19 = vmax.f32 %v2212_v43, 0.0  ;;  %v2184_v47 = vmul.f32 %v2175_v11, %v2125_v44  ;;  %v2127_v48 = vpop.f32.mrb[45].mxu1  ;;  %v6424_v43 = vpack.c.bf16 %v2462_v2, %v2460_v42  ;;  %v2337_v44 = vld [vmem:[#allocation10 + $0x8] sm:$0xff]  ;;  %v2352_v52 = vld [vmem:[#allocation10 + $0x80] sm:$0xff]  ;;  %v2354_v2 = vld [vmem:[#allocation10 + $0x90] sm:$0xff] }
 0x4dd   : > { %v2185_v49 = vmul.f32 %v2179_v29, %v2127_v48  ;;  %v2225_v50 = vmax.f32 %v2213_v45, 0.0  ;;  %v2339_v45 = vld [vmem:[#allocation10 + $0x18] sm:$0xff]  ;;  %v2957_v40 = vld [vmem:[#allocation13 + $0x280] sm:$0xff] }
 0x4de   : > { %v6350_v51 = vpack.c.bf16 %v2224_v19, %v2222_v46  ;;  %v2214_v57 = vadd.f32 %v2205_v31, %v2184_v47  ;;  %v6426_v46 = vpack.c.bf16 %v2339_v45, %v2337_v44  ;;  %v2941_v44 = vld [vmem:[#allocation13 + $0x200] sm:$0xff]  ;;  %v2942_v45 = vld [vmem:[#allocation13 + $0x208] sm:$0xff] }
 0x4df   : > { %v2131_v56 = vpop.f32.mrb[46].mxu1  ;;  %v6348_v24 = vpack.c.bf16 %v2225_v50, %v2223_v33  ;;  %v2215_v37 = vadd.f32 %v2209_v35, %v2185_v49  ;;  %v2336_v49 = vld [vmem:[#allocation10] sm:$0xff]  ;;  %v2338_v33 = vld [vmem:[#allocation10 + $0x10] sm:$0xff]  ;;  %v2341_v50 = vld [vmem:[#allocation10 + $0x28] sm:$0xff] }
 0x4e0   : > { %v2186_v58 = vmul.f32 %v2175_v11, %v2131_v56  ;;  %v2133_v25 = vpop.f32.mrb[47].mxu1  ;;  %v2226_v20 = vmax.f32 %v2214_v57, 0.0 }
 0x4e1   : > { %v2187_v38 = vmul.f32 %v2179_v29, %v2133_v25  ;;  %6349 = vmatprep.subr.bf16.mxu0 %v6348_v24  ;;  %v2227_v60 = vmax.f32 %v2215_v37, 0.0  ;;  %v2343_v25 = vld [vmem:[#allocation10 + $0x38] sm:$0xff] }
 0x4e2   : > { %v2216_v53 = vadd.f32 %v2205_v31, %v2186_v58  ;;  %6351 = vmatpush1.bf16.msra.mxu0 %v6350_v51 }
 0x4e3   : > { %v2217_v54 = vadd.f32 %v2209_v35, %v2187_v38  ;;  %v2137_v3 = vpop.f32.mrb[48].mxu1 }
 0x4e4   : > { %v2228_v13 = vmax.f32 %v2216_v53, 0.0  ;;  %v2188_v59 = vmul.f32 %v2175_v11, %v2137_v3  ;;  %v2139_v5 = vpop.f32.mrb[49].mxu1 }
 0x4e5   : > { %v2229_v61 = vmax.f32 %v2217_v54, 0.0  ;;  %v2189_v62 = vmul.f32 %v2179_v29, %v2139_v5 }
 0x4e6   : > { %v6354_v21 = vpack.c.bf16 %v2228_v13, %v2226_v20  ;;  %v2218_v34 = vadd.f32 %v2205_v31, %v2188_v59  ;;  %v6428_v20 = vpack.c.bf16 %v2338_v33, %v2336_v49  ;;  %v2359_v49 = vld [vmem:[#allocation10 + $0xb8] sm:$0xff]  ;;  %v6620_v33 = vpack.c.bf16 %v2942_v45, %v2941_v44 }
 0x4e7   : > { %v2143_v8 = vpop.f32.mrb[50].mxu1  ;;  %v6352_v26 = vpack.c.bf16 %v2229_v61, %v2227_v60  ;;  %v2219_v12 = vadd.f32 %v2209_v35, %v2189_v62  ;;  %v6430_v60 = vpack.c.bf16 %v2343_v25, %v2341_v50  ;;  %v2340_v61 = vld [vmem:[#allocation10 + $0x20] sm:$0xff]  ;;  %v2342_v62 = vld [vmem:[#allocation10 + $0x30] sm:$0xff] }
 0x4e8   : > { %v2190_v63 = vmul.f32 %v2175_v11, %v2143_v8  ;;  %v2145_v1 = vpop.f32.mrb[51].mxu1  ;;  %v2230_v16 = vmax.f32 %v2218_v34, 0.0  ;;  %v2234_v11 = vld [vmem:[%s9379_s2] sm:$0xff]  ;;  %v2959_v50 = vld [vmem:[#allocation13 + $0x290] sm:$0xff] }
 0x4e9   : > { %v2191_v39 = vmul.f32 %v2179_v29, %v2145_v1  ;;  %6353 = vmatprep.subr.bf16.mxu0 %v6352_v26  ;;  %v2231_v18 = vmax.f32 %v2219_v12, 0.0  ;;  %v2235_v29 = vld [vmem:[%s9379_s2 + $0x8] sm:$0xff] }
 0x4ea   : > { %v2220_v14 = vadd.f32 %v2205_v31, %v2190_v63  ;;  %6355 = vmatpush1.bf16.msra.mxu0 %v6354_v21  ;;  %v2459_v31 = vld [vmem:[#allocation10 + $0x3d8] sm:$0xff]  ;;  %v2345_v63 = vld [vmem:[#allocation10 + $0x48] sm:$0xff] }
 0x4eb   : > { %v2221_v15 = vadd.f32 %v2209_v35, %v2191_v39  ;;  %v6418_v9 = vpack.c.bf16 %v2459_v31, %v2457_v4  ;;  %v2458_v35 = vld [vmem:[#allocation10 + $0x3d0] sm:$0xff]  ;;  %v2347_v1 = vld [vmem:[#allocation10 + $0x58] sm:$0xff]  ;;  %v2348_v31 = vld [vmem:[#allocation10 + $0x60] sm:$0xff] }
 0x4ec   : > { %v2232_v17 = vmax.f32 %v2220_v14, 0.0  ;;  %v6420_v36 = vpack.c.bf16 %v2458_v35, %v2456_v32  ;;  %v2353_v32 = vld [vmem:[#allocation10 + $0x88] sm:$0xff]  ;;  %v2355_v35 = vld [vmem:[#allocation10 + $0x98] sm:$0xff] }
 0x4ed   : > { %v2233_v22 = vmax.f32 %v2221_v15, 0.0  ;;  %6419 = vmatprep.subr.bf16.mxu1 %v6418_v9  ;;  %v6432_v15 = vpack.c.bf16 %v2342_v62, %v2340_v61  ;;  %v2350_v9 = vld [vmem:[#allocation10 + $0x70] sm:$0xff]  ;;  %v6442_v42 = vpack.c.bf16 %v2355_v35, %v2353_v32  ;;  %v2369_v35 = vld [vmem:[#allocation10 + $0x108] sm:$0xff] }
 0x4ee   : > { %v6359_v28 = vpack.c.bf16 %v2232_v17, %v2230_v16  ;;  %6421 = vmatpush1.bf16.msra.mxu1 %v6420_v36  ;;  %v6440_v36 = vpack.c.bf16 %v2350_v9, %v2348_v31  ;;  %v2946_v61 = vld [vmem:[#allocation13 + $0x228] sm:$0xff]  ;;  %v2364_v9 = vld [vmem:[#allocation10 + $0xe0] sm:$0xff] }
 0x4ef   : > { %v6356_v30 = vpack.c.bf16 %v2233_v22, %v2231_v18  ;;  %6423 = vmatprep.subr.bf16.mxu1 %v6422_v41  ;;  %v6434_v18 = vpack.c.bf16 %v2347_v1, %v2345_v63  ;;  %v2344_v22 = vld [vmem:[#allocation10 + $0x40] sm:$0xff]  ;;  %v2958_v41 = vld [vmem:[#allocation13 + $0x288] sm:$0xff] }
 0x4f0   : > { %v2360_v63 = vld [vmem:[#allocation10 + $0xc0] sm:$0xff]  ;;  %v2366_v32 = vld [vmem:[#allocation10 + $0xf0] sm:$0xff] }
 0x4f1   : > { %6358 = vmatprep.subr.msk.bf16.mxu0 %vm6357_vm10, %v6356_v30 }
 0x4f2   : > { %6361 = vmatpush1.bf16.msk.msra.mxu0 %vm6357_vm10, %v6359_v28  ;;  %6425 = vmatpush1.bf16.msra.mxu1 %v6424_v43  ;;  %v2346_v28 = vld [vmem:[#allocation10 + $0x50] sm:$0xff]  ;;  %v6618_v43 = vpack.c.bf16 %v2958_v41, %v2957_v40  ;;  %v2368_v41 = vld [vmem:[#allocation10 + $0x100] sm:$0xff] }
 0x4f3   : > { %6427 = vmatprep.subr.bf16.mxu1 %v6426_v46  ;;  %v2357_v46 = vld [vmem:[#allocation10 + $0xa8] sm:$0xff] }
 0x4f4   : > { %6619 = vmatprep.subr.bf16.mxu0 %v6618_v43  ;;  %v2375_v43 = vld [vmem:[#allocation10 + $0x138] sm:$0xff] }
 0x4f5   : > { %5802 = vmatmul.mubr.msk.f32.vlgmr.msra.gmra.mrb[0].mxu0 %vm2237_vm11, %v2234_v11  ;;  %v2349_v11 = vld [vmem:[#allocation10 + $0x68] sm:$0xff] }
 0x4f6   : > { %2323 = vmatprep.mubr.f32.mxu0 %v8012_v0  ;;  %6621 = vmatpush3.bf16.msra.mxu0 %v6620_v33  ;;  %v2377_v33 = vld [vmem:[#allocation10 + $0x148] sm:$0xff] }
 0x4f9   : > { %5803 = vmatmul.mubr.msk.f32.gmra.mrb[2].mxu0 %vm2237_vm11, %v2235_v29  ;;  %v2351_v29 = vld [vmem:[#allocation10 + $0x78] sm:$0xff] }
 0x4fa   : > { %2329 = vmatprep.mubr.f32.mxu0 %v8012_v0  ;;  %v6438_v4 = vpack.c.bf16 %v2351_v29, %v2349_v11  ;;  %v2365_v11 = vld [vmem:[#allocation10 + $0xe8] sm:$0xff]  ;;  %v2367_v29 = vld [vmem:[#allocation10 + $0xf8] sm:$0xff] }
 0x4fb   : > { %v6454_v31 = vpack.c.bf16 %v2367_v29, %v2365_v11  ;;  %v2392_v11 = vld [vmem:[#allocation10 + $0x1c0] sm:$0xff]  ;;  %v2394_v29 = vld [vmem:[#allocation10 + $0x1d0] sm:$0xff] }
 0x4fd   : > { %5804 = vmatmul.mubr.msk.f32.gmra.mrb[4].mxu0 %vm2237_vm11, %v2236_v23  ;;  %v6436_v23 = vpack.c.bf16 %v2346_v28, %v2344_v22  ;;  %v2947_v22 = vld [vmem:[#allocation13 + $0x230] sm:$0xff]  ;;  %v2948_v28 = vld [vmem:[#allocation13 + $0x238] sm:$0xff] }
 0x5c8   : > { %v8950_v19 = vpop.f32.mrb[0].mxu0 }
 0x5c9   : > { %v2321_v47 = vpop.f32.mrb[1].mxu0  ;;  %v2534_v51 = vrot.slane %v8950_v19, 1  ;;  %v2716_v56 = vrot.slane %v8950_v19, 2 }
 0x5ca   : > { %v2537_v37 = vrot.slane %v2321_v47, 1  ;;  %v2719_v38 = vrot.slane %v2321_v47, 2 }
 0x5cc   : > { %v8952_v48 = vpop.f32.mrb[2].mxu0 }
 0x5cd   : > { %v2535_v24 = vrot.slane %v8952_v48, 1  ;;  %v2717_v57 = vrot.slane %v8952_v48, 2  ;;  %v8958_v58 = vpop.f32.mrb[3].mxu0 }
 0x5ce   : > { %v2538_v53 = vrot.slane %v8958_v58, 1  ;;  %v2720_v54 = vrot.slane %v8958_v58, 2 }
 0x5cf   : > { %v2536_v3 = vsel %vm695_vm2, %v2534_v51, %v2535_v24  ;;  %v8964_v13 = vsel %vm1041_vm4, %v2716_v56, %v2717_v57  ;;  %v2960_v51 = vld [vmem:[#allocation13 + $0x298] sm:$0xff]  ;;  %v2943_v56 = vld [vmem:[#allocation13 + $0x210] sm:$0xff] }
 0x5d0   : > { %v8966_v59 = vpop.f32.mrb[4].mxu0  ;;  %v2539_v5 = vsel %vm695_vm2, %v2537_v37, %v2538_v53  ;;  %v8970_v21 = vsel %vm1041_vm4, %v2719_v38, %v2720_v54  ;;  %v6622_v25 = vpack.c.bf16 %v2960_v51, %v2959_v50  ;;  %v2944_v37 = vld [vmem:[#allocation13 + $0x218] sm:$0xff]  ;;  %v6446_v38 = vpack.c.bf16 %v2359_v49, %v2357_v46  ;;  %v2374_v49 = vld [vmem:[#allocation10 + $0x130] sm:$0xff] }
 0x5d1   : > { %v2540_v8 = vrot.slane %v8966_v59, 1  ;;  %v2722_v26 = vrot.slane %v8966_v59, 2  ;;  %v8974_v34 = vpop.f32.mrb[5].mxu0  ;;  %2614 = vmatprep.mubr.f32.mxu1 %v2539_v5  ;;  %v2962_v5 = vld [vmem:[#allocation13 + $0x2a8] sm:$0xff]  ;;  %v2372_v46 = vld [vmem:[#allocation10 + $0x120] sm:$0xff]  ;;  %v2379_v50 = vld [vmem:[#allocation10 + $0x158] sm:$0xff] }
 0x5d2   : > { %v2542_v12 = vrot.slane %v8974_v34, 1  ;;  %v2724_v39 = vrot.slane %v8974_v34, 2  ;;  %2615 = vmatmul.mubr.f32.vlgmr.msra.gmra.mrb[52].mxu1 %v2536_v3  ;;  %v6624_v3 = vpack.c.bf16 %v2944_v37, %v2943_v56  ;;  %6623 = vmatprep.subr.bf16.mxu0 %v6622_v25  ;;  %v6464_v51 = vpack.c.bf16 %v2374_v49, %v2372_v46  ;;  %v2383_v25 = vld [vmem:[#allocation10 + $0x178] sm:$0xff]  ;;  %v2468_v49 = vld [vmem:[#allocation10 + $0x420] sm:$0xff] }
 0x5d3   : > { %6429 = vmatpush1.bf16.msra.mxu1 %v6428_v20  ;;  %v2541_v14 = vsel %vm695_vm2, %v2535_v24, %v2540_v8  ;;  %v8982_v16 = vsel %vm1041_vm4, %v2717_v57, %v2722_v26  ;;  %v6444_v24 = vpack.c.bf16 %v2354_v2, %v2352_v52  ;;  %v2358_v57 = vld [vmem:[#allocation10 + $0xb0] sm:$0xff]  ;;  %v2961_v20 = vld [vmem:[#allocation13 + $0x2a0] sm:$0xff]  ;;  %v6456_v52 = vpack.c.bf16 %v2366_v32, %v2364_v9 }
 0x5d4   : > { %v2543_v17 = vsel %vm695_vm2, %v2538_v53, %v2542_v12  ;;  %6431 = vmatprep.subr.bf16.mxu1 %v6430_v60  ;;  %v8988_v30 = vsel %vm1041_vm4, %v2720_v54, %v2724_v39  ;;  %v2361_v53 = vld [vmem:[#allocation10 + $0xc8] sm:$0xff]  ;;  %v2363_v54 = vld [vmem:[#allocation10 + $0xd8] sm:$0xff]  ;;  %v6626_v62 = vpack.c.bf16 %v2962_v5, %v2961_v20  ;;  %6625 = vmatpush3.bf16.msra.mxu0 %v6624_v3  ;;  %v2396_v32 = vld [vmem:[#allocation10 + $0x1e0] sm:$0xff] }
 0x5d5   : > { %2620 = vmatprep.mubr.f32.mxu1 %v2543_v17  ;;  %v2945_v60 = vld [vmem:[#allocation13 + $0x220] sm:$0xff]  ;;  %v2362_v17 = vld [vmem:[#allocation10 + $0xd0] sm:$0xff]  ;;  %v6466_v56 = vpack.c.bf16 %v2379_v50, %v2377_v33  ;;  %v2387_v20 = vld [vmem:[#allocation10 + $0x198] sm:$0xff] }
 0x5d6   : > { %2621 = vmatmul.mubr.f32.gmra.mrb[54].mxu1 %v2541_v14  ;;  %v6628_v1 = vpack.c.bf16 %v2946_v61, %v2945_v60  ;;  %v2964_v14 = vld [vmem:[#allocation13 + $0x2b8] sm:$0xff]  ;;  %6627 = vmatprep.subr.bf16.mxu0 %v6626_v62  ;;  %v2373_v2 = vld [vmem:[#allocation10 + $0x128] sm:$0xff]  ;;  %v2386_v62 = vld [vmem:[#allocation10 + $0x190] sm:$0xff] }
 0x5d7   : > { %6433 = vmatpush1.bf16.msra.mxu1 %v6432_v15  ;;  %2626 = vmatprep.mubr.f32.mxu1 %v2542_v12  ;;  %v2963_v12 = vld [vmem:[#allocation13 + $0x2b0] sm:$0xff]  ;;  %v6450_v15 = vpack.c.bf16 %v2363_v54, %v2361_v53  ;;  %v6462_v45 = vpack.c.bf16 %v2375_v43, %v2373_v2  ;;  %v2380_v53 = vld [vmem:[#allocation10 + $0x160] sm:$0xff]  ;;  %v2385_v3 = vld [vmem:[#allocation10 + $0x188] sm:$0xff] }
 0x5d8   : > { %6435 = vmatprep.subr.bf16.mxu1 %v6434_v18  ;;  %v6630_v18 = vpack.c.bf16 %v2964_v14, %v2963_v12  ;;  %6629 = vmatpush3.bf16.msra.mxu0 %v6628_v1  ;;  %v2382_v54 = vld [vmem:[#allocation10 + $0x170] sm:$0xff]  ;;  %v6474_v60 = vpack.c.bf16 %v2387_v20, %v2385_v3  ;;  %v2384_v61 = vld [vmem:[#allocation10 + $0x180] sm:$0xff]  ;;  %v2469_v43 = vld [vmem:[#allocation10 + $0x428] sm:$0xff] }
 0x5d9   : > { %v6472_v5 = vpack.c.bf16 %v2382_v54, %v2380_v53  ;;  %v6476_v1 = vpack.c.bf16 %v2386_v62, %v2384_v61  ;;  %v2388_v14 = vld [vmem:[#allocation10 + $0x1a0] sm:$0xff]  ;;  %v2466_v2 = vld [vmem:[#allocation10 + $0x410] sm:$0xff]  ;;  %v2473_v50 = vld [vmem:[#allocation10 + $0x448] sm:$0xff] }
 0x5da   : > { %2627 = vmatmul.mubr.f32.gmra.mrb[56].mxu1 %v2540_v8  ;;  %6631 = vmatprep.subr.bf16.mxu0 %v6630_v18  ;;  %v2395_v18 = vld [vmem:[#allocation10 + $0x1d8] sm:$0xff]  ;;  %v2470_v33 = vld [vmem:[#allocation10 + $0x430] sm:$0xff]  ;;  %v2476_v54 = vld [vmem:[#allocation10 + $0x460] sm:$0xff] }
 0x5db   : > { %6437 = vmatpush1.bf16.msra.mxu1 %v6436_v23  ;;  %2697 = vmatprep.mubr.f32.mxu1 %v2321_v47  ;;  %v2356_v47 = vld [vmem:[#allocation10 + $0xa0] sm:$0xff]  ;;  %v6452_v23 = vpack.c.bf16 %v2362_v17, %v2360_v63  ;;  %v2391_v63 = vld [vmem:[#allocation10 + $0x1b8] sm:$0xff]  ;;  %v2393_v17 = vld [vmem:[#allocation10 + $0x1c8] sm:$0xff] }
 0x5dc   : > { %6439 = vmatprep.subr.bf16.mxu1 %v6438_v4  ;;  %v6448_v8 = vpack.c.bf16 %v2358_v57, %v2356_v47  ;;  %v6632_v4 = vpack.c.bf16 %v2948_v28, %v2947_v22  ;;  %v2378_v47 = vld [vmem:[#allocation10 + $0x150] sm:$0xff]  ;;  %v2381_v57 = vld [vmem:[#allocation10 + $0x168] sm:$0xff]  ;;  %v6482_v28 = vpack.c.bf16 %v2395_v18, %v2393_v17  ;;  %v2487_v62 = vld [vmem:[#allocation10 + $0x4b8] sm:$0xff] }
 0x5dd   : > { %v2481_v3 = vld [vmem:[#allocation10 + $0x488] sm:$0xff] }
 0x5de   : > { %6633 = vmatpush3.bf16.msra.mxu0 %v6632_v4  ;;  %v2399_v4 = vld [vmem:[#allocation10 + $0x1f8] sm:$0xff]  ;;  %v2485_v61 = vld [vmem:[#allocation10 + $0x4a8] sm:$0xff] }
 0x5df   : > { %6441 = vmatpush1.bf16.msra.mxu1 %v6440_v36  ;;  %v2371_v36 = vld [vmem:[#allocation10 + $0x118] sm:$0xff] }
 0x5e0   : > { %6443 = vmatprep.subr.bf16.mxu1 %v6442_v42  ;;  %v6458_v40 = vpack.c.bf16 %v2371_v36, %v2369_v35  ;;  %v2370_v42 = vld [vmem:[#allocation10 + $0x110] sm:$0xff]  ;;  %v2465_v36 = vld [vmem:[#allocation10 + $0x408] sm:$0xff] }
 0x5e1   : > { %v6460_v44 = vpack.c.bf16 %v2370_v42, %v2368_v41  ;;  %v2398_v35 = vld [vmem:[#allocation10 + $0x1f0] sm:$0xff]  ;;  %v2464_v42 = vld [vmem:[#allocation10 + $0x400] sm:$0xff] }
 0x5e3   : > { %6445 = vmatpush1.bf16.msra.mxu1 %v6444_v24  ;;  %v2376_v24 = vld [vmem:[#allocation10 + $0x140] sm:$0xff] }
 0x5e4   : > { %6447 = vmatprep.subr.bf16.mxu1 %v6446_v38  ;;  %v6468_v37 = vpack.c.bf16 %v2378_v47, %v2376_v24  ;;  %v6470_v38 = vpack.c.bf16 %v2383_v25, %v2381_v57  ;;  %v2472_v47 = vld [vmem:[#allocation10 + $0x440] sm:$0xff]  ;;  %v2474_v57 = vld [vmem:[#allocation10 + $0x450] sm:$0xff]  ;;  %v2477_v25 = vld [vmem:[#allocation10 + $0x468] sm:$0xff] }
 0x5e7   : > { %6449 = vmatpush1.bf16.msra.mxu1 %v6448_v8  ;;  %v2389_v8 = vld [vmem:[#allocation10 + $0x1a8] sm:$0xff] }
 0x5e8   : > { %6451 = vmatprep.subr.bf16.mxu1 %v6450_v15  ;;  %v6478_v12 = vpack.c.bf16 %v2391_v63, %v2389_v8  ;;  %v2390_v15 = vld [vmem:[#allocation10 + $0x1b0] sm:$0xff]  ;;  %v6510_v63 = vpack.c.bf16 %v2487_v62, %v2485_v61  ;;  %v2516_v62 = vld [vmem:[#allocation10 + $0x5a0] sm:$0xff] }
 0x5e9   : > { %v6480_v22 = vpack.c.bf16 %v2390_v15, %v2388_v14  ;;  %v2489_v14 = vld [vmem:[#allocation10 + $0x4c8] sm:$0xff]  ;;  %v2491_v15 = vld [vmem:[#allocation10 + $0x4d8] sm:$0xff] }
 0x5ea   : > { %v6514_v18 = vpack.c.bf16 %v2491_v15, %v2489_v14  ;;  %v2520_v15 = vld [vmem:[#allocation10 + $0x5c0] sm:$0xff] }
 0x5eb   : > { %6453 = vmatpush1.bf16.msra.mxu1 %v6452_v23  ;;  %v2397_v23 = vld [vmem:[#allocation10 + $0x1e8] sm:$0xff] }
 0x5ec   : > { %6455 = vmatprep.subr.bf16.mxu1 %v6454_v31  ;;  %v6484_v31 = vpack.c.bf16 %v2394_v29, %v2392_v11  ;;  %v6486_v9 = vpack.c.bf16 %v2399_v4, %v2397_v23  ;;  %v2495_v11 = vld [vmem:[#allocation10 + $0x4f8] sm:$0xff]  ;;  %v2492_v4 = vld [vmem:[#allocation10 + $0x4e0] sm:$0xff] }
 0x5ef   : > { %6457 = vmatpush1.bf16.msra.mxu1 %v6456_v52  ;;  %v2467_v52 = vld [vmem:[#allocation10 + $0x418] sm:$0xff] }
 0x5f0   : > { %6459 = vmatprep.subr.bf16.mxu1 %v6458_v40  ;;  %v6488_v40 = vpack.c.bf16 %v2398_v35, %v2396_v32  ;;  %v6490_v41 = vpack.c.bf16 %v2467_v52, %v2465_v36  ;;  %v2499_v32 = vld [vmem:[#allocation10 + $0x518] sm:$0xff]  ;;  %v2496_v52 = vld [vmem:[#allocation10 + $0x500] sm:$0xff] }
 0x5f3   : > { %6461 = vmatpush1.bf16.msra.mxu1 %v6460_v44  ;;  %v2471_v44 = vld [vmem:[#allocation10 + $0x438] sm:$0xff] }
 0x5f4   : > { %6463 = vmatprep.subr.bf16.mxu1 %v6462_v45  ;;  %v6492_v45 = vpack.c.bf16 %v2466_v2, %v2464_v42  ;;  %v6494_v46 = vpack.c.bf16 %v2471_v44, %v2469_v43  ;;  %v2503_v42 = vld [vmem:[#allocation10 + $0x538] sm:$0xff]  ;;  %v2500_v44 = vld [vmem:[#allocation10 + $0x520] sm:$0xff] }
 0x5f7   : > { %6465 = vmatpush1.bf16.msra.mxu1 %v6464_v51  ;;  %v2475_v51 = vld [vmem:[#allocation10 + $0x458] sm:$0xff] }
 0x5f8   : > { %6467 = vmatprep.subr.bf16.mxu1 %v6466_v56  ;;  %v6496_v56 = vpack.c.bf16 %v2470_v33, %v2468_v49  ;;  %v6498_v24 = vpack.c.bf16 %v2475_v51, %v2473_v50  ;;  %v2507_v49 = vld [vmem:[#allocation10 + $0x558] sm:$0xff]  ;;  %v2504_v51 = vld [vmem:[#allocation10 + $0x540] sm:$0xff] }
 0x5fb   : > { %6469 = vmatpush1.bf16.msra.mxu1 %v6468_v37  ;;  %v2479_v37 = vld [vmem:[#allocation10 + $0x478] sm:$0xff] }
 0x5fc   : > { %6471 = vmatprep.subr.bf16.mxu1 %v6470_v38  ;;  %v6500_v38 = vpack.c.bf16 %v2474_v57, %v2472_v47  ;;  %v6502_v53 = vpack.c.bf16 %v2479_v37, %v2477_v25  ;;  %v2511_v47 = vld [vmem:[#allocation10 + $0x578] sm:$0xff]  ;;  %v2508_v37 = vld [vmem:[#allocation10 + $0x560] sm:$0xff] }
 0x5ff   : > { %6473 = vmatpush1.bf16.msra.mxu1 %v6472_v5 }
 0x600   : > { %6475 = vmatprep.subr.bf16.mxu1 %v6474_v60  ;;  %v2480_v60 = vld [vmem:[#allocation10 + $0x480] sm:$0xff] }
 0x603   : > { %6477 = vmatpush1.bf16.msra.mxu1 %v6476_v1  ;;  %v2484_v1 = vld [vmem:[#allocation10 + $0x4a0] sm:$0xff] }
 0x604   : > { %6479 = vmatprep.subr.bf16.mxu1 %v6478_v12  ;;  %v2486_v12 = vld [vmem:[#allocation10 + $0x4b0] sm:$0xff] }
 0x605   : > { %v6512_v17 = vpack.c.bf16 %v2486_v12, %v2484_v1  ;;  %v2523_v1 = vld [vmem:[#allocation10 + $0x5d8] sm:$0xff] }
 0x607   : > { %6481 = vmatpush1.bf16.msra.mxu1 %v6480_v22  ;;  %v2490_v22 = vld [vmem:[#allocation10 + $0x4d0] sm:$0xff] }
 0x608   : > { %6483 = vmatprep.subr.bf16.mxu1 %v6482_v28  ;;  %v2493_v28 = vld [vmem:[#allocation10 + $0x4e8] sm:$0xff] }
 0x609   : > { %v6518_v23 = vpack.c.bf16 %v2495_v11, %v2493_v28  ;;  %v2524_v11 = vld [vmem:[#allocation10 + $0x5e0] sm:$0xff] }
 0x60b   : > { %6485 = vmatpush1.bf16.msra.mxu1 %v6484_v31  ;;  %v2494_v31 = vld [vmem:[#allocation10 + $0x4f0] sm:$0xff] }
 0x60c   : > { %6487 = vmatprep.subr.bf16.mxu1 %v6486_v9  ;;  %v2497_v9 = vld [vmem:[#allocation10 + $0x508] sm:$0xff]  ;;  %v6520_v35 = vpack.c.bf16 %v2494_v31, %v2492_v4 }
 0x60d   : > { %v6522_v36 = vpack.c.bf16 %v2499_v32, %v2497_v9  ;;  %v2926_v4 = vld [vmem:[#allocation13 + $0x188] sm:$0xff]  ;;  %v2909_v32 = vld [vmem:[#allocation13 + $0x100] sm:$0xff] }
 0x60f   : > { %6489 = vmatpush1.bf16.msra.mxu1 %v6488_v40  ;;  %v2498_v40 = vld [vmem:[#allocation10 + $0x510] sm:$0xff] }
 0x610   : > { %6491 = vmatprep.subr.bf16.mxu1 %v6490_v41  ;;  %v2501_v41 = vld [vmem:[#allocation10 + $0x528] sm:$0xff]  ;;  %v6524_v2 = vpack.c.bf16 %v2498_v40, %v2496_v52  ;;  %v2928_v52 = vld [vmem:[#allocation13 + $0x198] sm:$0xff] }
 0x611   : > { %v6526_v43 = vpack.c.bf16 %v2503_v42, %v2501_v41  ;;  %v2911_v42 = vld [vmem:[#allocation13 + $0x110] sm:$0xff] }
 0x612   : > { %2698 = vmatmul.mubr.f32.vlgmr.msra.gmra.mrb[52].mxu1 %v8950_v19  ;;  %v2478_v19 = vld [vmem:[#allocation10 + $0x470] sm:$0xff] }
 0x613   : > { %2703 = vmatprep.mubr.f32.mxu1 %v8958_v58  ;;  %6493 = vmatpush1.bf16.msra.mxu1 %v6492_v45  ;;  %v2483_v58 = vld [vmem:[#allocation10 + $0x498] sm:$0xff]  ;;  %v6504_v20 = vpack.c.bf16 %v2478_v19, %v2476_v54  ;;  %v2502_v45 = vld [vmem:[#allocation10 + $0x530] sm:$0xff] }
 0x614   : > { %6495 = vmatprep.subr.bf16.mxu1 %v6494_v46  ;;  %v6506_v5 = vpack.c.bf16 %v2483_v58, %v2481_v3  ;;  %v2505_v46 = vld [vmem:[#allocation10 + $0x548] sm:$0xff]  ;;  %v6528_v33 = vpack.c.bf16 %v2502_v45, %v2500_v44  ;;  %v2515_v54 = vld [vmem:[#allocation10 + $0x598] sm:$0xff]  ;;  %v2512_v58 = vld [vmem:[#allocation10 + $0x580] sm:$0xff] }
 0x615   : > { %v6530_v50 = vpack.c.bf16 %v2507_v49, %v2505_v46  ;;  %v2930_v44 = vld [vmem:[#allocation13 + $0x1a8] sm:$0xff]  ;;  %v2913_v49 = vld [vmem:[#allocation13 + $0x120] sm:$0xff] }
 0x616   : > { %2704 = vmatmul.mubr.f32.gmra.mrb[54].mxu1 %v8952_v48  ;;  %v2482_v48 = vld [vmem:[#allocation10 + $0x490] sm:$0xff] }
 0x617   : > { %2709 = vmatprep.mubr.f32.mxu1 %v8974_v34  ;;  %6497 = vmatpush1.bf16.msra.mxu1 %v6496_v56  ;;  %v6508_v8 = vpack.c.bf16 %v2482_v48, %v2480_v60  ;;  %v2506_v56 = vld [vmem:[#allocation10 + $0x550] sm:$0xff]  ;;  %v2519_v60 = vld [vmem:[#allocation10 + $0x5b8] sm:$0xff] }
 0x618   : > { %6499 = vmatprep.subr.bf16.mxu1 %v6498_v24  ;;  %v2509_v24 = vld [vmem:[#allocation10 + $0x568] sm:$0xff]  ;;  %v6532_v57 = vpack.c.bf16 %v2506_v56, %v2504_v51  ;;  %v2932_v51 = vld [vmem:[#allocation13 + $0x1b8] sm:$0xff] }
 0x619   : > { %v6534_v25 = vpack.c.bf16 %v2511_v47, %v2509_v24  ;;  %v2916_v47 = vld [vmem:[#allocation13 + $0x138] sm:$0xff]  ;;  %v2918_v34 = vld [vmem:[#allocation13 + $0x148] sm:$0xff] }
 0x61a   : > { %2710 = vmatmul.mubr.f32.gmra.mrb[56].mxu1 %v8966_v59 }
 0x61b   : > { %6501 = vmatpush1.bf16.msra.mxu1 %v6500_v38  ;;  %2796 = vmatprep.mubr.f32.mxu1 %v8970_v21  ;;  %v2488_v21 = vld [vmem:[#allocation10 + $0x4c0] sm:$0xff]  ;;  %v2510_v38 = vld [vmem:[#allocation10 + $0x570] sm:$0xff] }
 0x61c   : > { %6503 = vmatprep.subr.bf16.mxu1 %v6502_v53  ;;  %v6516_v29 = vpack.c.bf16 %v2490_v22, %v2488_v21  ;;  %v2513_v53 = vld [vmem:[#allocation10 + $0x588] sm:$0xff]  ;;  %v6536_v19 = vpack.c.bf16 %v2510_v38, %v2508_v37  ;;  %v2527_v21 = vld [vmem:[#allocation10 + $0x5f8] sm:$0xff] }
 0x61d   : > { %v6538_v3 = vpack.c.bf16 %v2515_v54, %v2513_v53  ;;  %v2966_v53 = vld [vmem:[#allocation13 + $0x2c8] sm:$0xff]  ;;  %v2949_v54 = vld [vmem:[#allocation13 + $0x240] sm:$0xff] }
 0x61f   : > { %6505 = vmatpush1.bf16.msra.mxu1 %v6504_v20  ;;  %v2514_v20 = vld [vmem:[#allocation10 + $0x590] sm:$0xff] }
 0x620   : > { %6507 = vmatprep.subr.bf16.mxu1 %v6506_v5  ;;  %v2517_v5 = vld [vmem:[#allocation10 + $0x5a8] sm:$0xff]  ;;  %v6540_v48 = vpack.c.bf16 %v2514_v20, %v2512_v58  ;;  %v2935_v20 = vld [vmem:[#allocation13 + $0x1d0] sm:$0xff] }
 0x621   : > { %v6542_v61 = vpack.c.bf16 %v2519_v60, %v2517_v5  ;;  %v2936_v5 = vld [vmem:[#allocation13 + $0x1d8] sm:$0xff] }
 0x622   : > { %v6574_v59 = vpack.c.bf16 %v2936_v5, %v2935_v20  ;;  %v2920_v60 = vld [vmem:[#allocation13 + $0x158] sm:$0xff] }
 0x623   : > { %6509 = vmatpush1.bf16.msra.mxu1 %v6508_v8  ;;  %v2518_v8 = vld [vmem:[#allocation10 + $0x5b0] sm:$0xff] }
 0x624   : > { %6511 = vmatprep.subr.bf16.mxu1 %v6510_v63  ;;  %v2521_v63 = vld [vmem:[#allocation10 + $0x5c8] sm:$0xff]  ;;  %v6544_v12 = vpack.c.bf16 %v2518_v8, %v2516_v62  ;;  %v2968_v62 = vld [vmem:[#allocation13 + $0x2d8] sm:$0xff]  ;;  %v2951_v8 = vld [vmem:[#allocation13 + $0x250] sm:$0xff] }
 0x625   : > { %v6546_v14 = vpack.c.bf16 %v2523_v1, %v2521_v63  ;;  %v2952_v63 = vld [vmem:[#allocation13 + $0x258] sm:$0xff] }
 0x627   : > { %6513 = vmatpush1.bf16.msra.mxu1 %v6512_v17  ;;  %v2522_v17 = vld [vmem:[#allocation10 + $0x5d0] sm:$0xff] }
 0x628   : > { %6515 = vmatprep.subr.bf16.mxu1 %v6514_v18  ;;  %v2525_v18 = vld [vmem:[#allocation10 + $0x5e8] sm:$0xff]  ;;  %v6548_v22 = vpack.c.bf16 %v2522_v17, %v2520_v15 }
 0x629   : > { %v6550_v28 = vpack.c.bf16 %v2527_v21, %v2525_v18  ;;  %v2938_v15 = vld [vmem:[#allocation13 + $0x1e8] sm:$0xff]  ;;  %v2921_v18 = vld [vmem:[#allocation13 + $0x160] sm:$0xff] }
 0x62a   : > { %v2922_v21 = vld [vmem:[#allocation13 + $0x168] sm:$0xff] }
 0x62b   : > { %6517 = vmatpush1.bf16.msra.mxu1 %v6516_v29  ;;  %v2526_v29 = vld [vmem:[#allocation10 + $0x5f0] sm:$0xff] }
 0x62c   : > { %6519 = vmatprep.subr.bf16.mxu1 %v6518_v23  ;;  %v2925_v23 = vld [vmem:[#allocation13 + $0x180] sm:$0xff]  ;;  %v6552_v31 = vpack.c.bf16 %v2526_v29, %v2524_v11  ;;  %v2970_v11 = vld [vmem:[#allocation13 + $0x2e8] sm:$0xff] }
 0x62d   : > { %v6554_v9 = vpack.c.bf16 %v2926_v4, %v2925_v23  ;;  %v2953_v29 = vld [vmem:[#allocation13 + $0x260] sm:$0xff]  ;;  %v2954_v23 = vld [vmem:[#allocation13 + $0x268] sm:$0xff] }
 0x62f   : > { %6521 = vmatpush1.bf16.msra.mxu1 %v6520_v35  ;;  %v2910_v35 = vld [vmem:[#allocation13 + $0x108] sm:$0xff] }
 0x630   : > { %6523 = vmatprep.subr.bf16.mxu1 %v6522_v36  ;;  %v2927_v36 = vld [vmem:[#allocation13 + $0x190] sm:$0xff]  ;;  %v6556_v40 = vpack.c.bf16 %v2910_v35, %v2909_v32  ;;  %v2940_v32 = vld [vmem:[#allocation13 + $0x1f8] sm:$0xff] }
 0x631   : > { %v6558_v41 = vpack.c.bf16 %v2928_v52, %v2927_v36  ;;  %v2923_v36 = vld [vmem:[#allocation13 + $0x170] sm:$0xff]  ;;  %v2924_v52 = vld [vmem:[#allocation13 + $0x178] sm:$0xff] }
 0x633   : > { %6525 = vmatpush1.bf16.msra.mxu1 %v6524_v2  ;;  %v2912_v2 = vld [vmem:[#allocation13 + $0x118] sm:$0xff] }
 0x634   : > { %6527 = vmatprep.subr.bf16.mxu1 %v6526_v43  ;;  %v2929_v43 = vld [vmem:[#allocation13 + $0x1a0] sm:$0xff]  ;;  %v6560_v45 = vpack.c.bf16 %v2912_v2, %v2911_v42  ;;  %v2972_v42 = vld [vmem:[#allocation13 + $0x2f8] sm:$0xff]  ;;  %v2955_v2 = vld [vmem:[#allocation13 + $0x270] sm:$0xff] }
 0x635   : > { %v6562_v46 = vpack.c.bf16 %v2930_v44, %v2929_v43  ;;  %v2956_v43 = vld [vmem:[#allocation13 + $0x278] sm:$0xff] }
 0x637   : > { %6529 = vmatpush1.bf16.msra.mxu1 %v6528_v33  ;;  %v2914_v33 = vld [vmem:[#allocation13 + $0x128] sm:$0xff] }
 0x638   : > { %6531 = vmatprep.subr.bf16.mxu1 %v6530_v50  ;;  %v2931_v50 = vld [vmem:[#allocation13 + $0x1b0] sm:$0xff]  ;;  %v6564_v56 = vpack.c.bf16 %v2914_v33, %v2913_v49  ;;  %v2894_v49 = vld [vmem:[#allocation13 + $0x88] sm:$0xff] }
 0x639   : > { %v6566_v24 = vpack.c.bf16 %v2932_v51, %v2931_v50  ;;  %v2821_v50 = vld [vmem:[#allocation11] sm:$0xf] }
 0x63a   : > { %v2826_v51 = vrot.slane %v2821_v50, %v8662_v7 }
 0x63b   : > { %6533 = vmatpush1.bf16.msra.mxu1 %v6532_v57  ;;  %v2934_v57 = vld [vmem:[#allocation13 + $0x1c8] sm:$0xff] }
 0x63c   : > { %6535 = vmatprep.subr.bf16.mxu1 %v6534_v25 }
 0x63f   : > { %6537 = vmatpush1.bf16.msra.mxu1 %v6536_v19  ;;  %v2950_v19 = vld [vmem:[#allocation13 + $0x248] sm:$0xff] }
 0x640   : > { %6539 = vmatprep.subr.bf16.mxu1 %v6538_v3  ;;  %v6636_v58 = vpack.c.bf16 %v2950_v19, %v2949_v54 }
 0x643   : > { %6541 = vmatpush1.bf16.msra.mxu1 %v6540_v48  ;;  %v2967_v48 = vld [vmem:[#allocation13 + $0x2d0] sm:$0xff] }
 0x644   : > { %6543 = vmatprep.subr.bf16.mxu1 %v6542_v61  ;;  %v6638_v1 = vpack.c.bf16 %v2968_v62, %v2967_v48 }
 0x647   : > { %6545 = vmatpush1.bf16.msra.mxu1 %v6544_v12  ;;  %v6640_v12 = vpack.c.bf16 %v2952_v63, %v2951_v8 }
 0x648   : > { %6547 = vmatprep.subr.bf16.mxu1 %v6546_v14  ;;  %v2937_v14 = vld [vmem:[#allocation13 + $0x1e0] sm:$0xff] }
 0x649   : > { %v6578_v17 = vpack.c.bf16 %v2938_v15, %v2937_v14  ;;  %v2877_v14 = vld [vmem:[#allocation13] sm:$0xff]  ;;  %v2878_v15 = vld [vmem:[#allocation13 + $0x8] sm:$0xff] }
 0x64b   : > { %6549 = vmatpush1.bf16.msra.mxu1 %v6548_v22  ;;  %v2969_v22 = vld [vmem:[#allocation13 + $0x2e0] sm:$0xff] }
 0x64c   : > { %6551 = vmatprep.subr.bf16.mxu1 %v6550_v28  ;;  %v6580_v28 = vpack.c.bf16 %v2922_v21, %v2921_v18  ;;  %v6642_v4 = vpack.c.bf16 %v2970_v11, %v2969_v22  ;;  %v2896_v11 = vld [vmem:[#allocation13 + $0x98] sm:$0xff] }
 0x64f   : > { %6553 = vmatpush1.bf16.msra.mxu1 %v6552_v31  ;;  %v6644_v31 = vpack.c.bf16 %v2954_v23, %v2953_v29 }
 0x650   : > { %6555 = vmatprep.subr.bf16.mxu1 %v6554_v9  ;;  %v2939_v9 = vld [vmem:[#allocation13 + $0x1f0] sm:$0xff] }
 0x651   : > { %v6582_v35 = vpack.c.bf16 %v2940_v32, %v2939_v9 }
 0x652   : > { %2797 = vmatmul.mubr.f32.vlgmr.msra.gmra.mrb[52].mxu1 %v8964_v13  ;;  %v2915_v13 = vld [vmem:[#allocation13 + $0x130] sm:$0xff] }
 0x653   : > { %2802 = vmatprep.mubr.f32.mxu1 %v8988_v30  ;;  %6557 = vmatpush3.bf16.msra.mxu1 %v6556_v40  ;;  %v2933_v30 = vld [vmem:[#allocation13 + $0x1c0] sm:$0xff]  ;;  %v6568_v25 = vpack.c.bf16 %v2916_v47, %v2915_v13  ;;  %v2971_v40 = vld [vmem:[#allocation13 + $0x2f0] sm:$0xff]  ;;  %v2854_v13 = vrot.slane %v2821_v50, %v8930_v27  ;;  %v2836_v47 = vrot.slane %v2826_v51, %v8662_v7 }
 0x654   : > { %6559 = vmatprep.subr.bf16.mxu1 %v6558_v41  ;;  %v6570_v37 = vpack.c.bf16 %v2934_v57, %v2933_v30  ;;  %v6584_v41 = vpack.c.bf16 %v2924_v52, %v2923_v36  ;;  %v6646_v44 = vpack.c.bf16 %v2972_v42, %v2971_v40 }
 0x656   : > { %2803 = vmatmul.mubr.f32.gmra.mrb[54].mxu1 %v8982_v16  ;;  %v2917_v16 = vld [vmem:[#allocation13 + $0x140] sm:$0xff] }
 0x657   : > { %2808 = vmatprep.mubr.f32.mxu1 %v2724_v39  ;;  %6561 = vmatpush3.bf16.msra.mxu1 %v6560_v45  ;;  %v2965_v39 = vld [vmem:[#allocation13 + $0x2c0] sm:$0xff]  ;;  %v6572_v38 = vpack.c.bf16 %v2918_v34, %v2917_v16  ;;  %v6648_v45 = vpack.c.bf16 %v2956_v43, %v2955_v2  ;;  %v2879_v2 = vld [vmem:[#allocation13 + $0x10] sm:$0xff]  ;;  %v2880_v43 = vld [vmem:[#allocation13 + $0x18] sm:$0xff] }
 0x658   : > { %6563 = vmatprep.subr.bf16.mxu1 %v6562_v46  ;;  %v6634_v3 = vpack.c.bf16 %v2966_v53, %v2965_v39  ;;  %v2893_v46 = vld [vmem:[#allocation13 + $0x80] sm:$0xff] }
 0x659   : > { %v6586_v33 = vpack.c.bf16 %v2894_v49, %v2893_v46  ;;  %v2897_v46 = vld [vmem:[#allocation13 + $0xa0] sm:$0xff]  ;;  %v2898_v49 = vld [vmem:[#allocation13 + $0xa8] sm:$0xff] }
 0x65a   : > { %2809 = vmatmul.mubr.f32.gmra.mrb[56].mxu1 %v2722_v26  ;;  %6635 = vmatprep.subr.bf16.mxu0 %v6634_v3  ;;  %v2919_v26 = vld [vmem:[#allocation13 + $0x150] sm:$0xff] }
 0x65b   : > { %6565 = vmatpush3.bf16.msra.mxu1 %v6564_v56  ;;  %6637 = vmatpush3.bf16.msra.mxu0 %v6636_v58  ;;  %v6576_v61 = vpack.c.bf16 %v2920_v60, %v2919_v26  ;;  %v2830_v56 = vrot.slane %v2821_v50, %v8925_v55 }
 0x65c   : > { %6567 = vmatprep.subr.bf16.mxu1 %v6566_v24  ;;  %6639 = vmatprep.subr.bf16.mxu0 %v6638_v1  ;;  %v2850_v24 = vrot.slane %v2821_v50, %v8668_v10 }
 0x65d   : > { %v2840_v30 = vrot.slane %v2830_v56, %v8662_v7  ;;  %v6592_v56 = vpack.c.bf16 %v2880_v43, %v2879_v2  ;;  %v3432_v43 = vld [vmem:[#allocation16 + $0x240] sm:$0xff] }
 0x65e   : > { %v2860_v57 = vrot.slane %v2850_v24, %v8668_v10 }
 0x65f   : > { %6569 = vmatpush3.bf16.msra.mxu1 %v6568_v25  ;;  %6641 = vmatpush3.bf16.msra.mxu0 %v6640_v12 }
 0x660   : > { %6571 = vmatprep.subr.bf16.mxu1 %v6570_v37  ;;  %6643 = vmatprep.subr.bf16.mxu0 %v6642_v4  ;;  %v2864_v37 = vrot.slane %v2854_v13, %v8668_v10 }
 0x663   : > { %6573 = vmatpush3.bf16.msra.mxu1 %v6572_v38  ;;  %6645 = vmatpush3.bf16.msra.mxu0 %v6644_v31 }
 0x664   : > { %6575 = vmatprep.subr.bf16.mxu1 %v6574_v59  ;;  %6647 = vmatprep.subr.bf16.mxu0 %v6646_v44 }
 0x667   : > { %6577 = vmatpush3.bf16.msra.mxu1 %v6576_v61  ;;  %6649 = vmatpush3.bf16.msra.mxu0 %v6648_v45 }
 0x668   : > { %6579 = vmatprep.subr.bf16.mxu1 %v6578_v17 }
 0x66b   : > { %6581 = vmatpush3.bf16.msra.mxu1 %v6580_v28  ;;  %v2895_v28 = vld [vmem:[#allocation13 + $0x90] sm:$0xff] }
 0x66c   : > { %6583 = vmatprep.subr.bf16.mxu1 %v6582_v35  ;;  %v6588_v35 = vpack.c.bf16 %v2878_v15, %v2877_v14  ;;  %v6590_v42 = vpack.c.bf16 %v2896_v11, %v2895_v28  ;;  %v2905_v14 = vld [vmem:[#allocation13 + $0xe0] sm:$0xff]  ;;  %v2906_v15 = vld [vmem:[#allocation13 + $0xe8] sm:$0xff]  ;;  %v2908_v28 = vld [vmem:[#allocation13 + $0xf8] sm:$0xff] }
 0x66f   : > { %6585 = vmatpush3.bf16.msra.mxu1 %v6584_v41 }
 0x670   : > { %6587 = vmatprep.subr.bf16.mxu1 %v6586_v33 }
 0x725   : > { %v2798_v25 = vpop.f32.mrb[52].mxu1 }
 0x726   : > { %v2841_v16 = vmul.f32 %v2836_v47, %v2798_v25  ;;  %v2800_v34 = vpop.f32.mrb[53].mxu1  ;;  %v2882_v25 = vld [vmem:[#allocation13 + $0x28] sm:$0xff] }
 0x727   : > { %v2842_v39 = vmul.f32 %v2840_v30, %v2800_v34 }
 0x728   : > { %v2865_v38 = vadd.f32 %v2860_v57, %v2841_v16  ;;  %v2900_v16 = vld [vmem:[#allocation13 + $0xb8] sm:$0xff] }
 0x729   : > { %v2866_v53 = vadd.f32 %v2864_v37, %v2842_v39  ;;  %v2804_v54 = vpop.f32.mrb[54].mxu1 }
 0x72a   : > { %v2843_v19 = vmul.f32 %v2836_v47, %v2804_v54  ;;  %v2806_v3 = vpop.f32.mrb[55].mxu1  ;;  %v9011_v58 = vmax.f32 %v2865_v38, 0.0  ;;  %v2883_v38 = vld [vmem:[#allocation13 + $0x30] sm:$0xff]  ;;  %v2901_v54 = vld [vmem:[#allocation13 + $0xc0] sm:$0xff] }
 0x72b   : > { %v2844_v20 = vmul.f32 %v2840_v30, %v2806_v3  ;;  %v9013_v5 = vmax.f32 %v2866_v53, 0.0  ;;  %v2884_v53 = vld [vmem:[#allocation13 + $0x38] sm:$0xff] }
 0x72c   : > { %v2867_v59 = vadd.f32 %v2860_v57, %v2843_v19  ;;  %v2979_v8 = vrot.slane %v9011_v58, 1  ;;  %v3155_v63 = vrot.slane %v9011_v58, 2  ;;  %v2902_v19 = vld [vmem:[#allocation13 + $0xc8] sm:$0xff]  ;;  %v6600_v3 = vpack.c.bf16 %v2884_v53, %v2883_v38 }
 0x72d   : > { %v2868_v26 = vadd.f32 %v2864_v37, %v2844_v20  ;;  %v2810_v60 = vpop.f32.mrb[56].mxu1  ;;  %v2982_v22 = vrot.slane %v9013_v5, 1  ;;  %v3158_v4 = vrot.slane %v9013_v5, 2  ;;  %v6602_v20 = vpack.c.bf16 %v2902_v19, %v2901_v54  ;;  %v3469_v38 = vld [vmem:[#allocation16 + $0x368] sm:$0xff]  ;;  %v3464_v19 = vld [vmem:[#allocation16 + $0x340] sm:$0xff] }
 0x72e   : > { %v9015_v48 = vmax.f32 %v2867_v59, 0.0  ;;  %v2845_v61 = vmul.f32 %v2836_v47, %v2810_v60  ;;  %v2812_v62 = vpop.f32.mrb[57].mxu1  ;;  %v2885_v59 = vld [vmem:[#allocation13 + $0x40] sm:$0xff]  ;;  %v2903_v60 = vld [vmem:[#allocation13 + $0xd0] sm:$0xff] }
 0x72f   : > { %v9019_v1 = vmax.f32 %v2868_v26, 0.0  ;;  %v2846_v12 = vmul.f32 %v2840_v30, %v2812_v62  ;;  %v6594_v30 = vpack.c.bf16 %v2898_v49, %v2897_v46  ;;  %v2886_v26 = vld [vmem:[#allocation13 + $0x48] sm:$0xff] }
 0x730   : > { %v2980_v17 = vrot.slane %v9015_v48, 1  ;;  %v3156_v18 = vrot.slane %v9015_v48, 2  ;;  %v2869_v21 = vadd.f32 %v2860_v57, %v2845_v61  ;;  %v2881_v57 = vld [vmem:[#allocation13 + $0x20] sm:$0xff]  ;;  %v2904_v61 = vld [vmem:[#allocation13 + $0xd8] sm:$0xff]  ;;  %v6604_v62 = vpack.c.bf16 %v2886_v26, %v2885_v59  ;;  %v3477_v59 = vld [vmem:[#allocation16 + $0x3a8] sm:$0xff] }
 0x731   : > { %v2870_v29 = vadd.f32 %v2864_v37, %v2846_v12  ;;  %v2983_v23 = vrot.slane %v9019_v1, 1  ;;  %v3159_v31 = vrot.slane %v9019_v1, 2  ;;  %v2899_v37 = vld [vmem:[#allocation13 + $0xb0] sm:$0xff]  ;;  %v6596_v34 = vpack.c.bf16 %v2882_v25, %v2881_v57  ;;  %v2888_v12 = vld [vmem:[#allocation13 + $0x58] sm:$0xff]  ;;  %v3440_v49 = vld [vmem:[#allocation16 + $0x280] sm:$0xff] }
 0x732   : > { %v9027_v9 = vmax.f32 %v2869_v21, 0.0  ;;  %v2981_v32 = vsel %vm695_vm2, %v2979_v8, %v2980_v17  ;;  %v3157_v36 = vsel %vm1041_vm4, %v3155_v63, %v3156_v18  ;;  %v6598_v39 = vpack.c.bf16 %v2900_v16, %v2899_v37  ;;  %v2887_v63 = vld [vmem:[#allocation13 + $0x50] sm:$0xff]  ;;  %v2890_v21 = vld [vmem:[#allocation13 + $0x68] sm:$0xff] }
 0x733   : > { %v9031_v52 = vmax.f32 %v2870_v29, 0.0  ;;  %v2984_v40 = vsel %vm695_vm2, %v2982_v22, %v2983_v23  ;;  %v3160_v41 = vsel %vm1041_vm4, %v3158_v4, %v3159_v31  ;;  %v6606_v8 = vpack.c.bf16 %v2904_v61, %v2903_v60  ;;  %v2907_v22 = vld [vmem:[#allocation13 + $0xf0] sm:$0xff]  ;;  %v2892_v4 = vld [vmem:[#allocation13 + $0x78] sm:$0xff]  ;;  %v3456_v16 = vld [vmem:[#allocation16 + $0x300] sm:$0xff] }
 0x734   : > { %3059 = vmatprep.mubr.f32.mxu1 %v2984_v40  ;;  %3235 = vmatprep.mubr.f32.mxu0 %v3160_v41  ;;  %v2985_v44 = vrot.slane %v9027_v9, 1  ;;  %v3161_v45 = vrot.slane %v9027_v9, 2  ;;  %v6614_v29 = vpack.c.bf16 %v2908_v28, %v2907_v22  ;;  %v3424_v40 = vld [vmem:[#allocation16 + $0x200] sm:$0xff]  ;;  %v3461_v57 = vld [vmem:[#allocation16 + $0x328] sm:$0xff] }
 0x735   : > { %3060 = vmatmul.mubr.f32.vlgmr.msra.gmra.mrb[58].mxu1 %v2981_v32  ;;  %3236 = vmatmul.mubr.f32.vlgmr.msra.gmra.mrb[6].mxu0 %v3157_v36  ;;  %v2987_v33 = vrot.slane %v9031_v52, 1  ;;  %v3163_v50 = vrot.slane %v9031_v52, 2  ;;  %v3272_v32 = vld [vmem:[%s9380_s3] sm:$0xff] }
 0x736   : > { %6589 = vmatpush3.bf16.msra.mxu1 %v6588_v35  ;;  %v2986_v51 = vsel %vm695_vm2, %v2980_v17, %v2985_v44  ;;  %v3162_v24 = vsel %vm1041_vm4, %v3156_v18, %v3161_v45  ;;  %v6608_v17 = vpack.c.bf16 %v2888_v12, %v2887_v63  ;;  %v2889_v18 = vld [vmem:[#allocation13 + $0x60] sm:$0xff]  ;;  %v3425_v35 = vld [vmem:[#allocation16 + $0x208] sm:$0xff] }
 0x737   : > { %v2988_v13 = vsel %vm695_vm2, %v2983_v23, %v2987_v33  ;;  %6591 = vmatprep.subr.bf16.mxu1 %v6590_v42  ;;  %v3164_v47 = vsel %vm1041_vm4, %v3159_v31, %v3163_v50  ;;  %v6612_v11 = vpack.c.bf16 %v2890_v21, %v2889_v18  ;;  %v2891_v23 = vld [vmem:[#allocation13 + $0x70] sm:$0xff]  ;;  %v3472_v61 = vld [vmem:[#allocation16 + $0x380] sm:$0xff] }
 0x738   : > { %3064 = vmatprep.mubr.f32.mxu1 %v2988_v13  ;;  %3240 = vmatprep.mubr.f32.mxu0 %v3164_v47  ;;  %v6616_v31 = vpack.c.bf16 %v2892_v4, %v2891_v23  ;;  %v3429_v36 = vld [vmem:[#allocation16 + $0x228] sm:$0xff]  ;;  %v3448_v13 = vld [vmem:[#allocation16 + $0x2c0] sm:$0xff] }
 0x739   : > { %3065 = vmatmul.mubr.f32.gmra.mrb[60].mxu1 %v2986_v51  ;;  %3241 = vmatmul.mubr.f32.gmra.mrb[8].mxu0 %v3162_v24  ;;  %v6654_v41 = vpack.c.bf16 %v3429_v36, %v3425_v35  ;;  %v3433_v42 = vld [vmem:[#allocation16 + $0x248] sm:$0xff]  ;;  %v3452_v47 = vld [vmem:[#allocation16 + $0x2e0] sm:$0xff] }
 0x73a   : > { %6593 = vmatpush3.bf16.msra.mxu1 %v6592_v56  ;;  %3069 = vmatprep.mubr.f32.mxu1 %v2987_v33  ;;  %v3444_v33 = vld [vmem:[#allocation16 + $0x2a0] sm:$0xff]  ;;  %v3453_v51 = vld [vmem:[#allocation16 + $0x2e8] sm:$0xff]  ;;  %v6668_v25 = vpack.c.bf16 %v3452_v47, %v3448_v13 }
 0x73b   : > { %3245 = vmatprep.mubr.f32.mxu0 %v3163_v50  ;;  %6595 = vmatprep.subr.bf16.mxu1 %v6594_v30  ;;  %v3449_v50 = vld [vmem:[#allocation16 + $0x2c8] sm:$0xff]  ;;  %v6664_v56 = vpack.c.bf16 %v3444_v33, %v3440_v49 }
 0x73c   : > { %6655 = vmatprep.subr.bf16.mxu0 %v6654_v41  ;;  %v6666_v24 = vpack.c.bf16 %v3453_v51, %v3449_v50  ;;  %v3457_v30 = vld [vmem:[#allocation16 + $0x308] sm:$0xff] }
 0x73d   : > { %3070 = vmatmul.mubr.f32.gmra.mrb[62].mxu1 %v2985_v44  ;;  %3246 = vmatmul.mubr.f32.gmra.mrb[10].mxu0 %v3161_v45  ;;  %v3441_v44 = vld [vmem:[#allocation16 + $0x288] sm:$0xff]  ;;  %v6670_v37 = vpack.c.bf16 %v3461_v57, %v3457_v30 }
 0x73e   : > { %6597 = vmatpush3.bf16.msra.mxu1 %v6596_v34  ;;  %3139 = vmatprep.mubr.f32.mxu1 %v9013_v5  ;;  %v6610_v5 = vpack.c.bf16 %v2906_v15, %v2905_v14  ;;  %v3460_v34 = vld [vmem:[#allocation16 + $0x320] sm:$0xff]  ;;  %v3485_v63 = vld [vmem:[#allocation16 + $0x3e8] sm:$0xff] }
 0x73f   : > { %6599 = vmatprep.subr.bf16.mxu1 %v6598_v39  ;;  %4003 = vmatprep.mubr.f32.mxu0 %v8012_v0  ;;  %v3465_v39 = vld [vmem:[#allocation16 + $0x348] sm:$0xff]  ;;  %v6672_v53 = vpack.c.bf16 %v3460_v34, %v3456_v16 }
 0x740   : > { %v6674_v54 = vpack.c.bf16 %v3469_v38, %v3465_v39 }
 0x742   : > { %6601 = vmatpush3.bf16.msra.mxu1 %v6600_v3  ;;  %v3468_v3 = vld [vmem:[#allocation16 + $0x360] sm:$0xff] }
 0x743   : > { %6603 = vmatprep.subr.bf16.mxu1 %v6602_v20  ;;  %v3473_v20 = vld [vmem:[#allocation16 + $0x388] sm:$0xff]  ;;  %v6676_v26 = vpack.c.bf16 %v3468_v3, %v3464_v19  ;;  %v3480_v3 = vld [vmem:[#allocation16 + $0x3c0] sm:$0xff] }
 0x744   : > { %v6678_v60 = vpack.c.bf16 %v3477_v59, %v3473_v20  ;;  %v3273_v19 = vld [vmem:[%s9380_s3 + $0x8] sm:$0x1]  ;;  %v3484_v20 = vld [vmem:[#allocation16 + $0x3e0] sm:$0xff] }
 0x745   : > { %v6684_v59 = vpack.c.bf16 %v3484_v20, %v3480_v3  ;;  %v3364_v3 = vld [vmem:[#allocation16 + $0x20] sm:$0xff]  ;;  %v3369_v20 = vld [vmem:[#allocation16 + $0x48] sm:$0xff] }
 0x746   : > { %6605 = vmatpush3.bf16.msra.mxu1 %v6604_v62  ;;  %v3476_v62 = vld [vmem:[#allocation16 + $0x3a0] sm:$0xff] }
 0x747   : > { %6607 = vmatprep.subr.bf16.mxu1 %v6606_v8  ;;  %v3481_v8 = vld [vmem:[#allocation16 + $0x3c8] sm:$0xff]  ;;  %v6680_v12 = vpack.c.bf16 %v3476_v62, %v3472_v61  ;;  %v3426_v62 = vld [vmem:[#allocation16 + $0x210] sm:$0xff] }
 0x748   : > { %v6682_v14 = vpack.c.bf16 %v3485_v63, %v3481_v8  ;;  %v3430_v8 = vld [vmem:[#allocation16 + $0x230] sm:$0xff]  ;;  %v3435_v63 = vld [vmem:[#allocation16 + $0x258] sm:$0xff] }
 0x74a   : > { %6609 = vmatpush3.bf16.msra.mxu1 %v6608_v17 }
 0x74b   : > { %6611 = vmatprep.subr.bf16.mxu1 %v6610_v5 }
 0x74e   : > { %6613 = vmatpush3.bf16.msra.mxu1 %v6612_v11 }
 0x74f   : > { %6615 = vmatprep.subr.bf16.mxu1 %v6614_v29 }
 0x752   : > { %6617 = vmatpush3.bf16.msra.mxu1 %v6616_v31 }
 0x755   : > { %3140 = vmatmul.mubr.f32.vlgmr.msra.gmra.mrb[64].mxu1 %v9011_v58  ;;  %v3428_v58 = vld [vmem:[#allocation16 + $0x220] sm:$0xff] }
 0x756   : > { %3144 = vmatprep.mubr.f32.mxu1 %v9019_v1  ;;  %v3437_v1 = vld [vmem:[#allocation16 + $0x268] sm:$0xff]  ;;  %v6656_v2 = vpack.c.bf16 %v3428_v58, %v3424_v40 }
 0x758   : > { %6657 = vmatpush1.bf16.msra.mxu0 %v6656_v2  ;;  %v3254_v2 = vld [vmem:[#allocation14] sm:$0x3] }
 0x759   : > { %3145 = vmatmul.mubr.f32.gmra.mrb[66].mxu1 %v9015_v48  ;;  %v6658_v48 = vpack.c.bf16 %v3437_v1, %v3433_v42  ;;  %v3265_v51 = vrot.slane %v3254_v2, %v8668_v10 }
 0x75a   : > { %3149 = vmatprep.mubr.f32.mxu1 %v9031_v52  ;;  %v3436_v52 = vld [vmem:[#allocation16 + $0x260] sm:$0xff] }
 0x75b   : > { %v6660_v45 = vpack.c.bf16 %v3436_v52, %v3432_v43  ;;  %6659 = vmatprep.subr.bf16.mxu0 %v6658_v48  ;;  %v3258_v52 = vrot.slane %v3254_v2, %v8662_v7 }
 0x75d   : > { %3150 = vmatmul.mubr.f32.gmra.mrb[68].mxu1 %v9027_v9  ;;  %v3445_v9 = vld [vmem:[#allocation16 + $0x2a8] sm:$0xff]  ;;  %6661 = vmatpush1.bf16.msra.mxu0 %v6660_v45 }
 0x75e   : > { %6247 = vmatprep.mubr.msk.f32.mxu1 %vm3274_vm12, %v3272_v32  ;;  %v6662_v46 = vpack.c.bf16 %v3445_v9, %v3441_v44 }
 0x760   : > { %6663 = vmatprep.subr.bf16.mxu0 %v6662_v46 }
 0x761   : > { %6665 = vmatpush1.bf16.msra.mxu0 %v6664_v56 }
 0x762   : > { %6667 = vmatprep.subr.bf16.mxu0 %v6666_v24 }
 0x765   : > { %6669 = vmatpush1.bf16.msra.mxu0 %v6668_v25 }
 0x766   : > { %6671 = vmatprep.subr.bf16.mxu0 %v6670_v37 }
 0x769   : > { %6673 = vmatpush1.bf16.msra.mxu0 %v6672_v53 }
 0x76a   : > { %6675 = vmatprep.subr.bf16.mxu0 %v6674_v54 }
 0x76d   : > { %6677 = vmatpush1.bf16.msra.mxu0 %v6676_v26  ;;  %v3427_v26 = vld [vmem:[#allocation16 + $0x218] sm:$0xff] }
 0x76e   : > { %6679 = vmatprep.subr.bf16.mxu0 %v6678_v60  ;;  %v3431_v60 = vld [vmem:[#allocation16 + $0x238] sm:$0xff] }
 0x76f   : > { %v6686_v61 = vpack.c.bf16 %v3431_v60, %v3427_v26 }
 0x771   : > { %6681 = vmatpush1.bf16.msra.mxu0 %v6680_v12  ;;  %v3439_v12 = vld [vmem:[#allocation16 + $0x278] sm:$0xff] }
 0x772   : > { %6683 = vmatprep.subr.bf16.mxu0 %v6682_v14 }
 0x775   : > { %6685 = vmatpush1.bf16.msra.mxu0 %v6684_v59  ;;  %v3373_v59 = vld [vmem:[#allocation16 + $0x68] sm:$0xff] }
 0x776   : > { %6687 = vmatprep.subr.bf16.mxu0 %v6686_v61  ;;  %v6722_v60 = vpack.c.bf16 %v3373_v59, %v3369_v20  ;;  %v3368_v61 = vld [vmem:[#allocation16 + $0x40] sm:$0xff] }
 0x808   : > { %v5905_v15 = vpop.f32.mrb[58].mxu1  ;;  %v5987_v17 = vpop.f32.mrb[6].mxu0 }
 0x809   : > { %v5906_v5 = vpop.f32.mrb[59].mxu1  ;;  %v5988_v18 = vpop.f32.mrb[7].mxu0 }
 0x80a   : > { %v5907_v21 = vadd.f32 %v5906_v5, %v5905_v15  ;;  %v5989_v22 = vadd.f32 %v5988_v18, %v5987_v17  ;;  %v6688_v17 = vpack.c.bf16 %v3430_v8, %v3426_v62  ;;  %v6690_v18 = vpack.c.bf16 %v3439_v12, %v3435_v63  ;;  %v3372_v62 = vld [vmem:[#allocation16 + $0x60] sm:$0xff]  ;;  %v3377_v8 = vld [vmem:[#allocation16 + $0x88] sm:$0xff] }
 0x80b   : > { %v3381_v63 = vld [vmem:[#allocation16 + $0xa8] sm:$0xff]  ;;  %v6724_v12 = vpack.c.bf16 %v3372_v62, %v3368_v61  ;;  %v3387_v61 = vld [vmem:[#allocation16 + $0xd8] sm:$0xff] }
 0x80c   : > { %v5908_v28 = vpop.f32.mrb[60].mxu1  ;;  %v5990_v11 = vpop.f32.mrb[8].mxu0  ;;  %v3391_v62 = vld [vmem:[#allocation16 + $0xf8] sm:$0xff] }
 0x80d   : > { %v5909_v29 = vpop.f32.mrb[61].mxu1  ;;  %v5991_v23 = vpop.f32.mrb[9].mxu0 }
 0x80e   : > { %v5910_v4 = vadd.f32 %v5909_v29, %v5908_v28  ;;  %v5992_v31 = vadd.f32 %v5991_v23, %v5990_v11  ;;  %v3443_v28 = vld [vmem:[#allocation16 + $0x298] sm:$0xff] }
 0x80f   : > { %v3447_v11 = vld [vmem:[#allocation16 + $0x2b8] sm:$0xff] }
 0x810   : > { %v5911_v32 = vpop.f32.mrb[62].mxu1  ;;  %v5993_v35 = vpop.f32.mrb[10].mxu0  ;;  %v6694_v23 = vpack.c.bf16 %v3447_v11, %v3443_v28  ;;  %v3389_v28 = vld [vmem:[#allocation16 + $0xe8] sm:$0xff] }
 0x811   : > { %v5912_v36 = vpop.f32.mrb[63].mxu1  ;;  %v5994_v40 = vpop.f32.mrb[11].mxu0 }
 0x812   : > { %v5913_v41 = vadd.f32 %v5912_v36, %v5911_v32  ;;  %v5995_v58 = vadd.f32 %v5994_v40, %v5993_v35  ;;  %v3451_v32 = vld [vmem:[#allocation16 + $0x2d8] sm:$0xff] }
 0x813   : > { %v3455_v35 = vld [vmem:[#allocation16 + $0x2f8] sm:$0xff] }
 0x814   : > { %v6698_v40 = vpack.c.bf16 %v3455_v35, %v3451_v32  ;;  %v3397_v32 = vld [vmem:[#allocation16 + $0x128] sm:$0xff] }
 0x828   : > { %v5946_v42 = vpop.f32.mrb[64].mxu1 }
 0x829   : > { %v5947_v1 = vpop.f32.mrb[65].mxu1 }
 0x82a   : > { %v5948_v48 = vadd.f32 %v5947_v1, %v5946_v42  ;;  %v3459_v42 = vld [vmem:[#allocation16 + $0x318] sm:$0xff] }
 0x82b   : > { %v3463_v1 = vld [vmem:[#allocation16 + $0x338] sm:$0xff] }
 0x82c   : > { %v3142_v43 = vadd.f32 %v5948_v48, %v5907_v21  ;;  %v5949_v44 = vpop.f32.mrb[66].mxu1  ;;  %v3434_v21 = vld [vmem:[#allocation16 + $0x250] sm:$0xff]  ;;  %v6702_v48 = vpack.c.bf16 %v3463_v1, %v3459_v42 }
 0x82d   : > { %v5950_v9 = vpop.f32.mrb[67].mxu1 }
 0x82e   : > { %v3251_v45 = vadd.f32 %v5989_v22, %v3142_v43  ;;  %v5951_v46 = vadd.f32 %v5950_v9, %v5949_v44  ;;  %v3438_v22 = vld [vmem:[#allocation16 + $0x270] sm:$0xff]  ;;  %v3467_v44 = vld [vmem:[#allocation16 + $0x358] sm:$0xff] }
 0x82f   : > { %v6692_v29 = vpack.c.bf16 %v3438_v22, %v3434_v21  ;;  %v3458_v43 = vld [vmem:[#allocation16 + $0x310] sm:$0xff]  ;;  %v3471_v9 = vld [vmem:[#allocation16 + $0x378] sm:$0xff]  ;;  %v3380_v21 = vld [vmem:[#allocation16 + $0xa0] sm:$0xff] }
 0x830   : > { %v3259_v49 = vmul.f32 %v3258_v52, %v3251_v45  ;;  %v3147_v33 = vadd.f32 %v5951_v46, %v5910_v4  ;;  %v5952_v50 = vpop.f32.mrb[68].mxu1  ;;  %v3442_v4 = vld [vmem:[#allocation16 + $0x290] sm:$0xff]  ;;  %v6706_v46 = vpack.c.bf16 %v3471_v9, %v3467_v44  ;;  %v3385_v22 = vld [vmem:[#allocation16 + $0xc8] sm:$0xff] }
 0x831   : > { %v5953_v56 = vpop.f32.mrb[69].mxu1 }
 0x832   : > { %v3252_v24 = vadd.f32 %v5992_v31, %v3147_v33  ;;  %v5954_v13 = vadd.f32 %v5953_v56, %v5952_v50  ;;  %v3266_v57 = vadd.f32 %v3265_v51, %v3259_v49  ;;  %v3446_v31 = vld [vmem:[#allocation16 + $0x2b0] sm:$0xff]  ;;  %v3475_v50 = vld [vmem:[#allocation16 + $0x398] sm:$0xff] }
 0x833   : > { %v6696_v36 = vpack.c.bf16 %v3446_v31, %v3442_v4  ;;  %v3466_v49 = vld [vmem:[#allocation16 + $0x350] sm:$0xff]  ;;  %v3388_v4 = vld [vmem:[#allocation16 + $0xe0] sm:$0xff]  ;;  %v3393_v31 = vld [vmem:[#allocation16 + $0x108] sm:$0xff] }
 0x834   : > { %v3260_v47 = vmul.f32 %v3258_v52, %v3252_v24  ;;  %v3152_v30 = vadd.f32 %v5954_v13, %v5913_v41  ;;  %v3269_v34 = vmax.f32 %v3266_v57, 0.0  ;;  %v3450_v41 = vld [vmem:[#allocation16 + $0x2d0] sm:$0xff]  ;;  %v3487_v57 = vld [vmem:[#allocation16 + $0x3f8] sm:$0xff]  ;;  %v6734_v35 = vpack.c.bf16 %v3397_v32, %v3393_v31 }
 0x835   : > { %v3470_v33 = vld [vmem:[#allocation16 + $0x370] sm:$0xff] }
 0x836   : > { %v3253_v25 = vadd.f32 %v5995_v58, %v3152_v30  ;;  %v3267_v37 = vadd.f32 %v3265_v51, %v3260_v47  ;;  %v3454_v58 = vld [vmem:[#allocation16 + $0x2f0] sm:$0xff]  ;;  %v6708_v56 = vpack.c.bf16 %v3470_v33, %v3466_v49  ;;  %v3483_v30 = vld [vmem:[#allocation16 + $0x3d8] sm:$0xff]  ;;  %v3417_v49 = vld [vmem:[#allocation16 + $0x1c8] sm:$0xff] }
 0x837   : > { %v6700_v2 = vpack.c.bf16 %v3454_v58, %v3450_v41  ;;  %v3474_v13 = vld [vmem:[#allocation16 + $0x390] sm:$0xff]  ;;  %v3401_v41 = vld [vmem:[#allocation16 + $0x148] sm:$0xff] }
 0x838   : > { %v3261_v16 = vmul.f32 %v3258_v52, %v3253_v25  ;;  %v3270_v39 = vmax.f32 %v3267_v37, 0.0  ;;  %v3462_v52 = vld [vmem:[#allocation16 + $0x330] sm:$0xff]  ;;  %v6714_v37 = vpack.c.bf16 %v3487_v57, %v3483_v30  ;;  %v3405_v58 = vld [vmem:[#allocation16 + $0x168] sm:$0xff] }
 0x839   : > { %v6704_v45 = vpack.c.bf16 %v3462_v52, %v3458_v43  ;;  %v3478_v47 = vld [vmem:[#allocation16 + $0x3b0] sm:$0xff]  ;;  %v6738_v1 = vpack.c.bf16 %v3405_v58, %v3401_v41  ;;  %v3409_v43 = vld [vmem:[#allocation16 + $0x188] sm:$0xff] }
 0x83a   : > { %v6650_v38 = vpack.c.bf16 %v3270_v39, %v3269_v34  ;;  %v3268_v53 = vadd.f32 %v3265_v51, %v3261_v16  ;;  %v3479_v51 = vld [vmem:[#allocation16 + $0x3b8] sm:$0xff]  ;;  %v6712_v25 = vpack.c.bf16 %v3478_v47, %v3474_v13  ;;  %v3482_v16 = vld [vmem:[#allocation16 + $0x3d0] sm:$0xff]  ;;  %v3361_v39 = vld [vmem:[#allocation16 + $0x8] sm:$0xff] }
 0x83b   : > { %v6710_v24 = vpack.c.bf16 %v3479_v51, %v3475_v50  ;;  %v3486_v34 = vld [vmem:[#allocation16 + $0x3f0] sm:$0xff]  ;;  %v3413_v52 = vld [vmem:[#allocation16 + $0x1a8] sm:$0xff]  ;;  %v3363_v13 = vld [vmem:[#allocation16 + $0x18] sm:$0xff] }
 0x83c   : > { %6651 = vmatprep.subr.bf16.mxu1 %v6650_v38  ;;  %v3271_v54 = vmax.f32 %v3268_v53, 0.0  ;;  %v6716_v53 = vpack.c.bf16 %v3486_v34, %v3482_v16  ;;  %v6742_v9 = vpack.c.bf16 %v3413_v52, %v3409_v43  ;;  %v3421_v33 = vld [vmem:[#allocation16 + $0x1e8] sm:$0xff]  ;;  %v3367_v47 = vld [vmem:[#allocation16 + $0x38] sm:$0xff] }
 0x83d   : > { %6653 = vmatpush3.bf16.msra.mxu1 %v6650_v38  ;;  %v3365_v38 = vld [vmem:[#allocation16 + $0x28] sm:$0xff]  ;;  %v6746_v51 = vpack.c.bf16 %v3421_v33, %v3417_v49  ;;  %v6750_v57 = vpack.c.bf16 %v3367_v47, %v3363_v13  ;;  %v3371_v16 = vld [vmem:[#allocation16 + $0x58] sm:$0xff] }
 0x83e   : > { %6245 = vmatprep.subr.msk.mxu1 %vm3281_vm13, %v3271_v54  ;;  %v3375_v34 = vld [vmem:[#allocation16 + $0x78] sm:$0xff] }
 0x841   : > { %6246 = vmatpush3.msk.msra.mxu1 %vm3281_vm13, %v3271_v54  ;;  %v6718_v54 = vpack.c.bf16 %v3365_v38, %v3361_v39  ;;  %v6754_v38 = vpack.c.bf16 %v3375_v34, %v3371_v16 }
 0x842   : > { %6248 = vmatmul.mubr.msk.f32.vlgmr.msra.gmra.mrb[70].mxu1 %vm3274_vm12, %v3273_v19  ;;  %v3360_v19 = vld [vmem:[#allocation16] sm:$0xff] }
 0x843   : > { %v6720_v26 = vpack.c.bf16 %v3364_v3, %v3360_v19  ;;  %v3379_v19 = vld [vmem:[#allocation16 + $0x98] sm:$0xff] }
 0x844   : > { %v3383_v3 = vld [vmem:[#allocation16 + $0xb8] sm:$0xff] }
 0x845   : > { %v6758_v59 = vpack.c.bf16 %v3383_v3, %v3379_v19 }
 0x915   : > { %v9060_v14 = vpop.f32.mrb[70].mxu1 }
 0x916   : > { %v9062_v15 = vpop.f32.mrb[71].mxu1 }
 0x917   : > { %v3937_v5 = vrot.slane %v9062_v15, 1 }
 0x919   : > { %4004 = vmatmul.mubr.f32.vlgmr.msra.gmra.mrb[12].mxu0 %v3937_v5 }
 0x91a   : > { %6689 = vmatpush1.bf16.msra.mxu0 %v6688_v17  ;;  %4074 = vmatprep.mubr.f32.mxu0 %v8012_v0  ;;  %v6726_v17 = vpack.c.bf16 %v3381_v63, %v3377_v8  ;;  %v6762_v63 = vpack.c.bf16 %v3391_v62, %v3387_v61 }
 0x91b   : > { %6691 = vmatprep.subr.bf16.mxu0 %v6690_v18  ;;  %v3376_v18 = vld [vmem:[#allocation16 + $0x80] sm:$0xff] }
 0x91c   : > { %v6728_v11 = vpack.c.bf16 %v3380_v21, %v3376_v18  ;;  %v3395_v18 = vld [vmem:[#allocation16 + $0x118] sm:$0xff] }
 0x91d   : > { %v3399_v21 = vld [vmem:[#allocation16 + $0x138] sm:$0xff] }
 0x91e   : > { %6693 = vmatpush1.bf16.msra.mxu0 %v6692_v29  ;;  %v6730_v29 = vpack.c.bf16 %v3389_v28, %v3385_v22  ;;  %v6766_v28 = vpack.c.bf16 %v3399_v21, %v3395_v18 }
 0x91f   : > { %6695 = vmatprep.subr.bf16.mxu0 %v6694_v23  ;;  %v3384_v23 = vld [vmem:[#allocation16 + $0xc0] sm:$0xff] }
 0x922   : > { %6697 = vmatpush1.bf16.msra.mxu0 %v6696_v36  ;;  %v3392_v36 = vld [vmem:[#allocation16 + $0x100] sm:$0xff] }
 0x923   : > { %6699 = vmatprep.subr.bf16.mxu0 %v6698_v40  ;;  %v3396_v40 = vld [vmem:[#allocation16 + $0x120] sm:$0xff] }
 0x924   : > { %v6736_v42 = vpack.c.bf16 %v3396_v40, %v3392_v36  ;;  %v3411_v36 = vld [vmem:[#allocation16 + $0x198] sm:$0xff] }
 0x925   : > { %v3415_v40 = vld [vmem:[#allocation16 + $0x1b8] sm:$0xff] }
 0x926   : > { %6701 = vmatpush1.bf16.msra.mxu0 %v6700_v2  ;;  %v3400_v2 = vld [vmem:[#allocation16 + $0x140] sm:$0xff]  ;;  %v6774_v58 = vpack.c.bf16 %v3415_v40, %v3411_v36 }
 0x927   : > { %6703 = vmatprep.subr.bf16.mxu0 %v6702_v48  ;;  %v3404_v48 = vld [vmem:[#allocation16 + $0x160] sm:$0xff] }
 0x928   : > { %v6740_v44 = vpack.c.bf16 %v3404_v48, %v3400_v2  ;;  %v3419_v2 = vld [vmem:[#allocation16 + $0x1d8] sm:$0xff] }
 0x929   : > { %v3423_v48 = vld [vmem:[#allocation16 + $0x1f8] sm:$0xff] }
 0x92a   : > { %6705 = vmatpush1.bf16.msra.mxu0 %v6704_v45  ;;  %v3408_v45 = vld [vmem:[#allocation16 + $0x180] sm:$0xff]  ;;  %v6778_v52 = vpack.c.bf16 %v3423_v48, %v3419_v2 }
 0x92b   : > { %6707 = vmatprep.subr.bf16.mxu0 %v6706_v46  ;;  %v3412_v46 = vld [vmem:[#allocation16 + $0x1a0] sm:$0xff] }
 0x92c   : > { %v6744_v50 = vpack.c.bf16 %v3412_v46, %v3408_v45  ;;  %v3489_v45 = vld [vmem:[#allocation16 + $0x408] sm:$0xff] }
 0x92d   : > { %v3493_v46 = vld [vmem:[#allocation16 + $0x428] sm:$0xff] }
 0x92e   : > { %6709 = vmatpush1.bf16.msra.mxu0 %v6708_v56  ;;  %v3416_v56 = vld [vmem:[#allocation16 + $0x1c0] sm:$0xff]  ;;  %v6782_v33 = vpack.c.bf16 %v3493_v46, %v3489_v45  ;;  %v4223_v46 = vrot.slane %v9062_v15, 2 }
 0x92f   : > { %6711 = vmatprep.subr.bf16.mxu0 %v6710_v24  ;;  %v3420_v24 = vld [vmem:[#allocation16 + $0x1e0] sm:$0xff] }
 0x930   : > { %v6748_v30 = vpack.c.bf16 %v3420_v24, %v3416_v56  ;;  %v3497_v56 = vld [vmem:[#allocation16 + $0x448] sm:$0xff] }
 0x931   : > { %v3501_v24 = vld [vmem:[#allocation16 + $0x468] sm:$0xff] }
 0x932   : > { %6713 = vmatpush1.bf16.msra.mxu0 %v6712_v25  ;;  %v3362_v25 = vld [vmem:[#allocation16 + $0x10] sm:$0xff]  ;;  %v6786_v47 = vpack.c.bf16 %v3501_v24, %v3497_v56  ;;  %v3511_v56 = vld [vmem:[#allocation16 + $0x4b8] sm:$0xff] }
 0x933   : > { %6715 = vmatprep.subr.bf16.mxu0 %v6714_v37  ;;  %v3366_v37 = vld [vmem:[#allocation16 + $0x30] sm:$0xff] }
 0x934   : > { %v6752_v39 = vpack.c.bf16 %v3366_v37, %v3362_v25  ;;  %v3505_v25 = vld [vmem:[#allocation16 + $0x488] sm:$0xff] }
 0x935   : > { %v3509_v37 = vld [vmem:[#allocation16 + $0x4a8] sm:$0xff] }
 0x936   : > { %6717 = vmatpush1.bf16.msra.mxu0 %v6716_v53  ;;  %v3370_v53 = vld [vmem:[#allocation16 + $0x50] sm:$0xff]  ;;  %v6790_v34 = vpack.c.bf16 %v3509_v37, %v3505_v25  ;;  %v3519_v25 = vld [vmem:[#allocation16 + $0x4f8] sm:$0xff] }
 0x937   : > { %6719 = vmatprep.subr.bf16.mxu0 %v6718_v54  ;;  %v3374_v54 = vld [vmem:[#allocation16 + $0x70] sm:$0xff] }
 0x938   : > { %v6756_v20 = vpack.c.bf16 %v3374_v54, %v3370_v53  ;;  %v3513_v53 = vld [vmem:[#allocation16 + $0x4c8] sm:$0xff] }
 0x939   : > { %4075 = vmatmul.mubr.f32.vlgmr.msra.gmra.mrb[14].mxu0 %v3937_v5  ;;  %v6732_v5 = vpack.c.bf16 %v3388_v4, %v3384_v23  ;;  %v3403_v23 = vld [vmem:[#allocation16 + $0x158] sm:$0xff]  ;;  %v3517_v54 = vld [vmem:[#allocation16 + $0x4e8] sm:$0xff] }
 0x93a   : > { %6721 = vmatpush1.bf16.msra.mxu0 %v6720_v26  ;;  %4145 = vmatprep.mubr.f32.mxu0 %v8012_v0  ;;  %v3378_v26 = vld [vmem:[#allocation16 + $0x90] sm:$0xff]  ;;  %v3407_v4 = vld [vmem:[#allocation16 + $0x178] sm:$0xff]  ;;  %v6794_v3 = vpack.c.bf16 %v3517_v54, %v3513_v53 }
 0x93b   : > { %6723 = vmatprep.subr.bf16.mxu0 %v6722_v60  ;;  %v3382_v60 = vld [vmem:[#allocation16 + $0xb0] sm:$0xff]  ;;  %v6770_v32 = vpack.c.bf16 %v3407_v4, %v3403_v23  ;;  %v3527_v53 = vld [vmem:[#allocation16 + $0x538] sm:$0xff] }
 0x93c   : > { %v6760_v8 = vpack.c.bf16 %v3382_v60, %v3378_v26  ;;  %v3521_v26 = vld [vmem:[#allocation16 + $0x508] sm:$0xff] }
 0x93d   : > { %v3525_v60 = vld [vmem:[#allocation16 + $0x528] sm:$0xff] }
 0x93e   : > { %6725 = vmatpush1.bf16.msra.mxu0 %v6724_v12  ;;  %v3386_v12 = vld [vmem:[#allocation16 + $0xd0] sm:$0xff]  ;;  %v6798_v62 = vpack.c.bf16 %v3525_v60, %v3521_v26  ;;  %v3535_v26 = vld [vmem:[#allocation16 + $0x578] sm:$0xff] }
 0x93f   : > { %6727 = vmatprep.subr.bf16.mxu0 %v6726_v17  ;;  %v3390_v17 = vld [vmem:[#allocation16 + $0xf0] sm:$0xff] }
 0x940   : > { %v6764_v22 = vpack.c.bf16 %v3390_v17, %v3386_v12  ;;  %v3529_v12 = vld [vmem:[#allocation16 + $0x548] sm:$0xff] }
 0x941   : > { %v3533_v17 = vld [vmem:[#allocation16 + $0x568] sm:$0xff] }
 0x942   : > { %6729 = vmatpush1.bf16.msra.mxu0 %v6728_v11  ;;  %v3394_v11 = vld [vmem:[#allocation16 + $0x110] sm:$0xff]  ;;  %v6802_v21 = vpack.c.bf16 %v3533_v17, %v3529_v12  ;;  %v3543_v12 = vld [vmem:[#allocation16 + $0x5b8] sm:$0xff] }
 0x943   : > { %6731 = vmatprep.subr.bf16.mxu0 %v6730_v29  ;;  %v3398_v29 = vld [vmem:[#allocation16 + $0x130] sm:$0xff] }
 0x944   : > { %v6768_v31 = vpack.c.bf16 %v3398_v29, %v3394_v11  ;;  %v3537_v11 = vld [vmem:[#allocation16 + $0x588] sm:$0xff] }
 0x945   : > { %v3541_v29 = vld [vmem:[#allocation16 + $0x5a8] sm:$0xff] }
 0x946   : > { %6733 = vmatpush1.bf16.msra.mxu0 %v6732_v5  ;;  %v3402_v5 = vld [vmem:[#allocation16 + $0x150] sm:$0xff]  ;;  %v6806_v4 = vpack.c.bf16 %v3541_v29, %v3537_v11  ;;  %v3551_v11 = vld [vmem:[#allocation16 + $0x5f8] sm:$0xff] }
 0x947   : > { %6735 = vmatprep.subr.bf16.mxu0 %v6734_v35  ;;  %v3406_v35 = vld [vmem:[#allocation16 + $0x170] sm:$0xff] }
 0x948   : > { %v6772_v41 = vpack.c.bf16 %v3406_v35, %v3402_v5  ;;  %v3545_v5 = vld [vmem:[#allocation16 + $0x5c8] sm:$0xff] }
 0x949   : > { %v3549_v35 = vld [vmem:[#allocation16 + $0x5e8] sm:$0xff] }
 0x94a   : > { %6737 = vmatpush1.bf16.msra.mxu0 %v6736_v42  ;;  %v3410_v42 = vld [vmem:[#allocation16 + $0x190] sm:$0xff]  ;;  %v6810_v40 = vpack.c.bf16 %v3549_v35, %v3545_v5  ;;  %v3557_v5 = vld [vmem:[#allocation16 + $0x628] sm:$0xff] }
 0x94b   : > { %6739 = vmatprep.subr.bf16.mxu0 %v6738_v1  ;;  %v3414_v1 = vld [vmem:[#allocation16 + $0x1b0] sm:$0xff] }
 0x94c   : > { %v6776_v43 = vpack.c.bf16 %v3414_v1, %v3410_v42  ;;  %v3491_v42 = vld [vmem:[#allocation16 + $0x418] sm:$0xff] }
 0x94d   : > { %v3495_v1 = vld [vmem:[#allocation16 + $0x438] sm:$0xff] }
 0x94e   : > { %6741 = vmatpush1.bf16.msra.mxu0 %v6740_v44  ;;  %v3418_v44 = vld [vmem:[#allocation16 + $0x1d0] sm:$0xff]  ;;  %v6814_v48 = vpack.c.bf16 %v3495_v1, %v3491_v42  ;;  %v3565_v42 = vld [vmem:[#allocation16 + $0x668] sm:$0xff] }
 0x94f   : > { %6743 = vmatprep.subr.bf16.mxu0 %v6742_v9  ;;  %v3422_v9 = vld [vmem:[#allocation16 + $0x1f0] sm:$0xff] }
 0x950   : > { %v6780_v49 = vpack.c.bf16 %v3422_v9, %v3418_v44  ;;  %v3499_v44 = vld [vmem:[#allocation16 + $0x458] sm:$0xff] }
 0x951   : > { %v3503_v9 = vld [vmem:[#allocation16 + $0x478] sm:$0xff] }
 0x952   : > { %6745 = vmatpush1.bf16.msra.mxu0 %v6744_v50  ;;  %v3488_v50 = vld [vmem:[#allocation16 + $0x400] sm:$0xff] }
 0x953   : > { %6747 = vmatprep.subr.bf16.mxu0 %v6746_v51  ;;  %v3492_v51 = vld [vmem:[#allocation16 + $0x420] sm:$0xff] }
 0x954   : > { %v6784_v13 = vpack.c.bf16 %v3492_v51, %v3488_v50  ;;  %v3502_v50 = vld [vmem:[#allocation16 + $0x470] sm:$0xff]  ;;  %v3507_v51 = vld [vmem:[#allocation16 + $0x498] sm:$0xff] }
 0x956   : > { %6749 = vmatpush1.bf16.msra.mxu0 %v6748_v30  ;;  %v3496_v30 = vld [vmem:[#allocation16 + $0x440] sm:$0xff] }
 0x957   : > { %6751 = vmatprep.subr.bf16.mxu0 %v6750_v57  ;;  %v3500_v57 = vld [vmem:[#allocation16 + $0x460] sm:$0xff] }
 0x958   : > { %v6788_v16 = vpack.c.bf16 %v3500_v57, %v3496_v30  ;;  %v3510_v30 = vld [vmem:[#allocation16 + $0x4b0] sm:$0xff]  ;;  %v3515_v57 = vld [vmem:[#allocation16 + $0x4d8] sm:$0xff] }
 0x959   : > { %4146 = vmatmul.mubr.f32.vlgmr.msra.gmra.mrb[12].mxu0 %v9062_v15 }
 0x95a   : > { %6753 = vmatpush1.bf16.msra.mxu0 %v6752_v39  ;;  %4216 = vmatprep.mubr.f32.mxu0 %v8012_v0  ;;  %v3504_v39 = vld [vmem:[#allocation16 + $0x480] sm:$0xff] }
 0x95b   : > { %6755 = vmatprep.subr.bf16.mxu0 %v6754_v38  ;;  %v3508_v38 = vld [vmem:[#allocation16 + $0x4a0] sm:$0xff] }
 0x95c   : > { %v6792_v19 = vpack.c.bf16 %v3508_v38, %v3504_v39  ;;  %v3518_v39 = vld [vmem:[#allocation16 + $0x4f0] sm:$0xff]  ;;  %v3523_v38 = vld [vmem:[#allocation16 + $0x518] sm:$0xff] }
 0x95e   : > { %6757 = vmatpush1.bf16.msra.mxu0 %v6756_v20  ;;  %v3512_v20 = vld [vmem:[#allocation16 + $0x4c0] sm:$0xff] }
 0x95f   : > { %6759 = vmatprep.subr.bf16.mxu0 %v6758_v59  ;;  %v3516_v59 = vld [vmem:[#allocation16 + $0x4e0] sm:$0xff] }
 0x960   : > { %v6796_v61 = vpack.c.bf16 %v3516_v59, %v3512_v20  ;;  %v3526_v20 = vld [vmem:[#allocation16 + $0x530] sm:$0xff]  ;;  %v3531_v59 = vld [vmem:[#allocation16 + $0x558] sm:$0xff] }
 0x962   : > { %6761 = vmatpush1.bf16.msra.mxu0 %v6760_v8  ;;  %v3520_v8 = vld [vmem:[#allocation16 + $0x500] sm:$0xff] }
 0x963   : > { %6763 = vmatprep.subr.bf16.mxu0 %v6762_v63  ;;  %v3524_v63 = vld [vmem:[#allocation16 + $0x520] sm:$0xff] }
 0x964   : > { %v6800_v18 = vpack.c.bf16 %v3524_v63, %v3520_v8  ;;  %v3534_v8 = vld [vmem:[#allocation16 + $0x570] sm:$0xff]  ;;  %v3539_v63 = vld [vmem:[#allocation16 + $0x598] sm:$0xff] }
 0x966   : > { %6765 = vmatpush1.bf16.msra.mxu0 %v6764_v22  ;;  %v3528_v22 = vld [vmem:[#allocation16 + $0x540] sm:$0xff] }
 0x967   : > { %6767 = vmatprep.subr.bf16.mxu0 %v6766_v28  ;;  %v3532_v28 = vld [vmem:[#allocation16 + $0x560] sm:$0xff] }
 0x968   : > { %v6804_v23 = vpack.c.bf16 %v3532_v28, %v3528_v22  ;;  %v3542_v22 = vld [vmem:[#allocation16 + $0x5b0] sm:$0xff]  ;;  %v3547_v28 = vld [vmem:[#allocation16 + $0x5d8] sm:$0xff] }
 0x96a   : > { %6769 = vmatpush1.bf16.msra.mxu0 %v6768_v31  ;;  %v3536_v31 = vld [vmem:[#allocation16 + $0x580] sm:$0xff] }
 0x96b   : > { %6771 = vmatprep.subr.bf16.mxu0 %v6770_v32  ;;  %v3540_v32 = vld [vmem:[#allocation16 + $0x5a0] sm:$0xff] }
 0x96c   : > { %v6808_v36 = vpack.c.bf16 %v3540_v32, %v3536_v31  ;;  %v3550_v31 = vld [vmem:[#allocation16 + $0x5f0] sm:$0xff]  ;;  %v3553_v32 = vld [vmem:[#allocation16 + $0x608] sm:$0xff] }
 0x96e   : > { %6773 = vmatpush1.bf16.msra.mxu0 %v6772_v41  ;;  %v3544_v41 = vld [vmem:[#allocation16 + $0x5c0] sm:$0xff] }
 0x96f   : > { %6775 = vmatprep.subr.bf16.mxu0 %v6774_v58  ;;  %v3548_v58 = vld [vmem:[#allocation16 + $0x5e0] sm:$0xff] }
 0x970   : > { %v6812_v2 = vpack.c.bf16 %v3548_v58, %v3544_v41  ;;  %v3556_v41 = vld [vmem:[#allocation16 + $0x620] sm:$0xff]  ;;  %v3561_v58 = vld [vmem:[#allocation16 + $0x648] sm:$0xff] }
 0x972   : > { %6777 = vmatpush1.bf16.msra.mxu0 %v6776_v43  ;;  %v3490_v43 = vld [vmem:[#allocation16 + $0x410] sm:$0xff] }
 0x973   : > { %6779 = vmatprep.subr.bf16.mxu0 %v6778_v52  ;;  %v3494_v52 = vld [vmem:[#allocation16 + $0x430] sm:$0xff] }
 0x974   : > { %v6816_v45 = vpack.c.bf16 %v3494_v52, %v3490_v43  ;;  %v3564_v43 = vld [vmem:[#allocation16 + $0x660] sm:$0xff]  ;;  %v3569_v52 = vld [vmem:[#allocation16 + $0x688] sm:$0xff] }
 0x976   : > { %6781 = vmatpush1.bf16.msra.mxu0 %v6780_v49  ;;  %v6818_v49 = vpack.c.bf16 %v3503_v9, %v3499_v44  ;;  %v3573_v44 = vld [vmem:[#allocation16 + $0x6a8] sm:$0xff] }
 0x977   : > { %6783 = vmatprep.subr.bf16.mxu0 %v6782_v33  ;;  %v3498_v33 = vld [vmem:[#allocation16 + $0x450] sm:$0xff] }
 0x978   : > { %v6820_v24 = vpack.c.bf16 %v3502_v50, %v3498_v33  ;;  %v3572_v33 = vld [vmem:[#allocation16 + $0x6a0] sm:$0xff]  ;;  %v3577_v50 = vld [vmem:[#allocation16 + $0x6c8] sm:$0xff] }
 0x979   : > { %4217 = vmatmul.mubr.f32.vlgmr.msra.gmra.mrb[14].mxu0 %v9062_v15 }
 0x97a   : > { %6785 = vmatpush1.bf16.msra.mxu0 %v6784_v13  ;;  %4289 = vmatprep.mubr.f32.mxu0 %v8012_v0  ;;  %v6822_v13 = vpack.c.bf16 %v3511_v56, %v3507_v51  ;;  %v3581_v51 = vld [vmem:[#allocation16 + $0x6e8] sm:$0xff] }
 0x97b   : > { %6787 = vmatprep.subr.bf16.mxu0 %v6786_v47  ;;  %v3506_v47 = vld [vmem:[#allocation16 + $0x490] sm:$0xff] }
 0x97c   : > { %v6824_v37 = vpack.c.bf16 %v3510_v30, %v3506_v47  ;;  %v3580_v47 = vld [vmem:[#allocation16 + $0x6e0] sm:$0xff]  ;;  %v3585_v30 = vld [vmem:[#allocation16 + $0x708] sm:$0xff] }
 0x97e   : > { %6789 = vmatpush1.bf16.msra.mxu0 %v6788_v16  ;;  %v6826_v16 = vpack.c.bf16 %v3519_v25, %v3515_v57  ;;  %v3589_v57 = vld [vmem:[#allocation16 + $0x728] sm:$0xff] }
 0x97f   : > { %6791 = vmatprep.subr.bf16.mxu0 %v6790_v34  ;;  %v3514_v34 = vld [vmem:[#allocation16 + $0x4d0] sm:$0xff]  ;;  %v6862_v25 = vpack.c.bf16 %v3589_v57, %v3585_v30  ;;  %v3599_v30 = vld [vmem:[#allocation16 + $0x778] sm:$0xff] }
 0x980   : > { %v6828_v54 = vpack.c.bf16 %v3518_v39, %v3514_v34  ;;  %v3593_v34 = vld [vmem:[#allocation16 + $0x748] sm:$0xff] }
 0x981   : > { %v3597_v39 = vld [vmem:[#allocation16 + $0x768] sm:$0xff] }
 0x982   : > { %6793 = vmatpush1.bf16.msra.mxu0 %v6792_v19  ;;  %v6830_v19 = vpack.c.bf16 %v3527_v53, %v3523_v38  ;;  %v6866_v53 = vpack.c.bf16 %v3597_v39, %v3593_v34  ;;  %v3607_v34 = vld [vmem:[#allocation16 + $0x7b8] sm:$0xff] }
 0x983   : > { %6795 = vmatprep.subr.bf16.mxu0 %v6794_v3  ;;  %v3522_v3 = vld [vmem:[#allocation16 + $0x510] sm:$0xff] }
 0x984   : > { %v6832_v60 = vpack.c.bf16 %v3526_v20, %v3522_v3  ;;  %v3601_v3 = vld [vmem:[#allocation16 + $0x788] sm:$0xff] }
 0x985   : > { %v3605_v20 = vld [vmem:[#allocation16 + $0x7a8] sm:$0xff] }
 0x986   : > { %6797 = vmatpush1.bf16.msra.mxu0 %v6796_v61  ;;  %v6834_v61 = vpack.c.bf16 %v3535_v26, %v3531_v59  ;;  %v6870_v26 = vpack.c.bf16 %v3605_v20, %v3601_v3  ;;  %v3615_v3 = vld [vmem:[#allocation16 + $0x7f8] sm:$0xff] }
 0x987   : > { %6799 = vmatprep.subr.bf16.mxu0 %v6798_v62  ;;  %v3530_v62 = vld [vmem:[#allocation16 + $0x550] sm:$0xff] }
 0x988   : > { %v6836_v17 = vpack.c.bf16 %v3534_v8, %v3530_v62  ;;  %v3609_v62 = vld [vmem:[#allocation16 + $0x7c8] sm:$0xff] }
 0x989   : > { %v3613_v8 = vld [vmem:[#allocation16 + $0x7e8] sm:$0xff] }
 0x98a   : > { %6801 = vmatpush1.bf16.msra.mxu0 %v6800_v18  ;;  %v6838_v18 = vpack.c.bf16 %v3543_v12, %v3539_v63  ;;  %v6874_v12 = vpack.c.bf16 %v3613_v8, %v3609_v62  ;;  %v3621_v62 = vld [vmem:[#allocation16 + $0x828] sm:$0xff] }
 0x98b   : > { %6803 = vmatprep.subr.bf16.mxu0 %v6802_v21  ;;  %v3538_v21 = vld [vmem:[#allocation16 + $0x590] sm:$0xff] }
 0x98c   : > { %v6840_v29 = vpack.c.bf16 %v3542_v22, %v3538_v21  ;;  %v3555_v21 = vld [vmem:[#allocation16 + $0x618] sm:$0xff] }
 0x98d   : > { %v3559_v22 = vld [vmem:[#allocation16 + $0x638] sm:$0xff] }
 0x98e   : > { %6805 = vmatpush1.bf16.msra.mxu0 %v6804_v23  ;;  %v6842_v23 = vpack.c.bf16 %v3551_v11, %v3547_v28  ;;  %v6878_v11 = vpack.c.bf16 %v3559_v22, %v3555_v21  ;;  %v3629_v21 = vld [vmem:[#allocation16 + $0x868] sm:$0xff] }
 0x98f   : > { %6807 = vmatprep.subr.bf16.mxu0 %v6806_v4  ;;  %v3546_v4 = vld [vmem:[#allocation16 + $0x5d0] sm:$0xff] }
 0x990   : > { %v6844_v35 = vpack.c.bf16 %v3550_v31, %v3546_v4  ;;  %v3563_v4 = vld [vmem:[#allocation16 + $0x658] sm:$0xff] }
 0x991   : > { %v3567_v31 = vld [vmem:[#allocation16 + $0x678] sm:$0xff] }
 0x992   : > { %6809 = vmatpush1.bf16.msra.mxu0 %v6808_v36  ;;  %v6846_v36 = vpack.c.bf16 %v3557_v5, %v3553_v32  ;;  %v4371_v5 = vrot.slane %v9062_v15, 3 }
 0x993   : > { %6811 = vmatprep.subr.bf16.mxu0 %v6810_v40  ;;  %v3552_v40 = vld [vmem:[#allocation16 + $0x600] sm:$0xff] }
 0x994   : > { %v6848_v1 = vpack.c.bf16 %v3556_v41, %v3552_v40  ;;  %v3566_v40 = vld [vmem:[#allocation16 + $0x670] sm:$0xff]  ;;  %v3571_v41 = vld [vmem:[#allocation16 + $0x698] sm:$0xff] }
 0x996   : > { %6813 = vmatpush1.bf16.msra.mxu0 %v6812_v2  ;;  %v6850_v2 = vpack.c.bf16 %v3565_v42, %v3561_v58  ;;  %v3575_v58 = vld [vmem:[#allocation16 + $0x6b8] sm:$0xff] }
 0x997   : > { %6815 = vmatprep.subr.bf16.mxu0 %v6814_v48  ;;  %v3560_v48 = vld [vmem:[#allocation16 + $0x640] sm:$0xff] }
 0x998   : > { %v6852_v9 = vpack.c.bf16 %v3564_v43, %v3560_v48  ;;  %v3574_v48 = vld [vmem:[#allocation16 + $0x6b0] sm:$0xff]  ;;  %v3579_v43 = vld [vmem:[#allocation16 + $0x6d8] sm:$0xff] }
 0x999   : > { %4290 = vmatmul.mubr.f32.vlgmr.msra.gmra.mrb[12].mxu0 %v4223_v46 }
 0x99a   : > { %6817 = vmatpush1.bf16.msra.mxu0 %v6816_v45  ;;  %4360 = vmatprep.mubr.f32.mxu0 %v8012_v0  ;;  %v6854_v45 = vpack.c.bf16 %v3573_v44, %v3569_v52  ;;  %v3583_v52 = vld [vmem:[#allocation16 + $0x6f8] sm:$0xff] }
 0x99b   : > { %6819 = vmatprep.subr.bf16.mxu0 %v6818_v49  ;;  %v3568_v49 = vld [vmem:[#allocation16 + $0x680] sm:$0xff] }
 0x99c   : > { %v6856_v56 = vpack.c.bf16 %v3572_v33, %v3568_v49  ;;  %v3582_v49 = vld [vmem:[#allocation16 + $0x6f0] sm:$0xff]  ;;  %v3587_v33 = vld [vmem:[#allocation16 + $0x718] sm:$0xff] }
 0x99e   : > { %6821 = vmatpush1.bf16.msra.mxu0 %v6820_v24  ;;  %v6858_v24 = vpack.c.bf16 %v3581_v51, %v3577_v50  ;;  %v3591_v50 = vld [vmem:[#allocation16 + $0x738] sm:$0xff] }
 0x99f   : > { %6823 = vmatprep.subr.bf16.mxu0 %v6822_v13  ;;  %v3576_v13 = vld [vmem:[#allocation16 + $0x6c0] sm:$0xff] }
 0x9a2   : > { %6825 = vmatpush1.bf16.msra.mxu0 %v6824_v37  ;;  %v3584_v37 = vld [vmem:[#allocation16 + $0x700] sm:$0xff] }
 0x9a3   : > { %6827 = vmatprep.subr.bf16.mxu0 %v6826_v16  ;;  %v3588_v16 = vld [vmem:[#allocation16 + $0x720] sm:$0xff] }
 0x9a4   : > { %v6864_v38 = vpack.c.bf16 %v3588_v16, %v3584_v37  ;;  %v3598_v37 = vld [vmem:[#allocation16 + $0x770] sm:$0xff]  ;;  %v3603_v16 = vld [vmem:[#allocation16 + $0x798] sm:$0xff] }
 0x9a6   : > { %6829 = vmatpush1.bf16.msra.mxu0 %v6828_v54  ;;  %v3592_v54 = vld [vmem:[#allocation16 + $0x740] sm:$0xff] }
 0x9a7   : > { %6831 = vmatprep.subr.bf16.mxu0 %v6830_v19  ;;  %v3596_v19 = vld [vmem:[#allocation16 + $0x760] sm:$0xff] }
 0x9a8   : > { %v6868_v59 = vpack.c.bf16 %v3596_v19, %v3592_v54  ;;  %v3606_v54 = vld [vmem:[#allocation16 + $0x7b0] sm:$0xff]  ;;  %v3611_v19 = vld [vmem:[#allocation16 + $0x7d8] sm:$0xff] }
 0x9aa   : > { %6833 = vmatpush1.bf16.msra.mxu0 %v6832_v60  ;;  %v3600_v60 = vld [vmem:[#allocation16 + $0x780] sm:$0xff] }
 0x9ab   : > { %6835 = vmatprep.subr.bf16.mxu0 %v6834_v61  ;;  %v3604_v61 = vld [vmem:[#allocation16 + $0x7a0] sm:$0xff] }
 0x9ac   : > { %v6872_v63 = vpack.c.bf16 %v3604_v61, %v3600_v60  ;;  %v3614_v60 = vld [vmem:[#allocation16 + $0x7f0] sm:$0xff]  ;;  %v3617_v61 = vld [vmem:[#allocation16 + $0x808] sm:$0xff] }
 0x9ae   : > { %6837 = vmatpush1.bf16.msra.mxu0 %v6836_v17  ;;  %v3608_v17 = vld [vmem:[#allocation16 + $0x7c0] sm:$0xff] }
 0x9af   : > { %6839 = vmatprep.subr.bf16.mxu0 %v6838_v18  ;;  %v3612_v18 = vld [vmem:[#allocation16 + $0x7e0] sm:$0xff] }
 0x9b0   : > { %v6876_v28 = vpack.c.bf16 %v3612_v18, %v3608_v17  ;;  %v3620_v17 = vld [vmem:[#allocation16 + $0x820] sm:$0xff]  ;;  %v3625_v18 = vld [vmem:[#allocation16 + $0x848] sm:$0xff] }
 0x9b2   : > { %6841 = vmatpush1.bf16.msra.mxu0 %v6840_v29  ;;  %v3554_v29 = vld [vmem:[#allocation16 + $0x610] sm:$0xff] }
 0x9b3   : > { %6843 = vmatprep.subr.bf16.mxu0 %v6842_v23  ;;  %v3558_v23 = vld [vmem:[#allocation16 + $0x630] sm:$0xff] }
 0x9b4   : > { %v6880_v32 = vpack.c.bf16 %v3558_v23, %v3554_v29  ;;  %v3628_v29 = vld [vmem:[#allocation16 + $0x860] sm:$0xff]  ;;  %v3633_v23 = vld [vmem:[#allocation16 + $0x888] sm:$0xff] }
 0x9b6   : > { %6845 = vmatpush1.bf16.msra.mxu0 %v6844_v35  ;;  %v6882_v35 = vpack.c.bf16 %v3567_v31, %v3563_v4  ;;  %v3637_v4 = vld [vmem:[#allocation16 + $0x8a8] sm:$0xff] }
 0x9b7   : > { %6847 = vmatprep.subr.bf16.mxu0 %v6846_v36  ;;  %v3562_v36 = vld [vmem:[#allocation16 + $0x650] sm:$0xff] }
 0x9b8   : > { %v6884_v42 = vpack.c.bf16 %v3566_v40, %v3562_v36  ;;  %v3636_v36 = vld [vmem:[#allocation16 + $0x8a0] sm:$0xff]  ;;  %v3641_v40 = vld [vmem:[#allocation16 + $0x8c8] sm:$0xff] }
 0x9b9   : > { %4361 = vmatmul.mubr.f32.vlgmr.msra.gmra.mrb[14].mxu0 %v4223_v46  ;;  %v6860_v46 = vpack.c.bf16 %v3580_v47, %v3576_v13  ;;  %v3590_v13 = vld [vmem:[#allocation16 + $0x730] sm:$0xff]  ;;  %v3595_v47 = vld [vmem:[#allocation16 + $0x758] sm:$0xff] }
 0x9ba   : > { %6849 = vmatpush1.bf16.msra.mxu0 %v6848_v1  ;;  %4437 = vmatprep.mubr.f32.mxu0 %v8012_v0  ;;  %v6886_v1 = vpack.c.bf16 %v3575_v58, %v3571_v41  ;;  %v3645_v41 = vld [vmem:[#allocation16 + $0x8e8] sm:$0xff] }
 0x9bb   : > { %6851 = vmatprep.subr.bf16.mxu0 %v6850_v2  ;;  %v3570_v2 = vld [vmem:[#allocation16 + $0x690] sm:$0xff] }
 0x9bc   : > { %v6888_v44 = vpack.c.bf16 %v3574_v48, %v3570_v2  ;;  %v3644_v2 = vld [vmem:[#allocation16 + $0x8e0] sm:$0xff]  ;;  %v3649_v48 = vld [vmem:[#allocation16 + $0x908] sm:$0xff] }
 0x9be   : > { %6853 = vmatpush1.bf16.msra.mxu0 %v6852_v9  ;;  %v6890_v9 = vpack.c.bf16 %v3583_v52, %v3579_v43  ;;  %v3653_v43 = vld [vmem:[#allocation16 + $0x928] sm:$0xff] }
 0x9bf   : > { %6855 = vmatprep.subr.bf16.mxu0 %v6854_v45  ;;  %v3578_v45 = vld [vmem:[#allocation16 + $0x6d0] sm:$0xff]  ;;  %v6926_v52 = vpack.c.bf16 %v3653_v43, %v3649_v48  ;;  %v3663_v48 = vld [vmem:[#allocation16 + $0x978] sm:$0xff] }
 0x9c0   : > { %v6892_v51 = vpack.c.bf16 %v3582_v49, %v3578_v45  ;;  %v3657_v45 = vld [vmem:[#allocation16 + $0x948] sm:$0xff] }
 0x9c1   : > { %v3661_v49 = vld [vmem:[#allocation16 + $0x968] sm:$0xff] }
 0x9c2   : > { %6857 = vmatpush1.bf16.msra.mxu0 %v6856_v56  ;;  %v6894_v56 = vpack.c.bf16 %v3591_v50, %v3587_v33  ;;  %v6930_v50 = vpack.c.bf16 %v3661_v49, %v3657_v45  ;;  %v3671_v45 = vld [vmem:[#allocation16 + $0x9b8] sm:$0xff] }
 0x9c3   : > { %6859 = vmatprep.subr.bf16.mxu0 %v6858_v24  ;;  %v3586_v24 = vld [vmem:[#allocation16 + $0x710] sm:$0xff] }
 0x9c4   : > { %v6896_v57 = vpack.c.bf16 %v3590_v13, %v3586_v24  ;;  %v3665_v24 = vld [vmem:[#allocation16 + $0x988] sm:$0xff] }
 0x9c5   : > { %v3669_v13 = vld [vmem:[#allocation16 + $0x9a8] sm:$0xff] }
 0x9c6   : > { %6861 = vmatpush1.bf16.msra.mxu0 %v6860_v46  ;;  %v6898_v46 = vpack.c.bf16 %v3599_v30, %v3595_v47  ;;  %v6934_v30 = vpack.c.bf16 %v3669_v13, %v3665_v24  ;;  %v3679_v24 = vld [vmem:[#allocation16 + $0x9f8] sm:$0xff] }
 0x9c7   : > { %6863 = vmatprep.subr.bf16.mxu0 %v6862_v25  ;;  %v3594_v25 = vld [vmem:[#allocation16 + $0x750] sm:$0xff] }
 0x9c8   : > { %v6900_v39 = vpack.c.bf16 %v3598_v37, %v3594_v25  ;;  %v3673_v25 = vld [vmem:[#allocation16 + $0x9c8] sm:$0xff] }
 0x9c9   : > { %v3677_v37 = vld [vmem:[#allocation16 + $0x9e8] sm:$0xff] }
 0x9ca   : > { %6865 = vmatpush1.bf16.msra.mxu0 %v6864_v38  ;;  %v6902_v38 = vpack.c.bf16 %v3607_v34, %v3603_v16  ;;  %v6938_v34 = vpack.c.bf16 %v3677_v37, %v3673_v25  ;;  %v3685_v25 = vld [vmem:[#allocation16 + $0xa28] sm:$0xff] }
 0x9cb   : > { %6867 = vmatprep.subr.bf16.mxu0 %v6866_v53  ;;  %v3602_v53 = vld [vmem:[#allocation16 + $0x790] sm:$0xff] }
 0x9cc   : > { %v6904_v20 = vpack.c.bf16 %v3606_v54, %v3602_v53  ;;  %v3619_v53 = vld [vmem:[#allocation16 + $0x818] sm:$0xff] }
 0x9cd   : > { %v3623_v54 = vld [vmem:[#allocation16 + $0x838] sm:$0xff] }
 0x9ce   : > { %6869 = vmatpush1.bf16.msra.mxu0 %v6868_v59  ;;  %v6906_v59 = vpack.c.bf16 %v3615_v3, %v3611_v19  ;;  %v6942_v3 = vpack.c.bf16 %v3623_v54, %v3619_v53  ;;  %v3693_v53 = vld [vmem:[#allocation16 + $0xa68] sm:$0xff] }
 0x9cf   : > { %6871 = vmatprep.subr.bf16.mxu0 %v6870_v26  ;;  %v3610_v26 = vld [vmem:[#allocation16 + $0x7d0] sm:$0xff] }
 0x9d0   : > { %v6908_v8 = vpack.c.bf16 %v3614_v60, %v3610_v26  ;;  %v3627_v26 = vld [vmem:[#allocation16 + $0x858] sm:$0xff] }
 0x9d1   : > { %v3631_v60 = vld [vmem:[#allocation16 + $0x878] sm:$0xff] }
 0x9d2   : > { %6873 = vmatpush1.bf16.msra.mxu0 %v6872_v63  ;;  %v6910_v63 = vpack.c.bf16 %v3621_v62, %v3617_v61  ;;  %v4519_v62 = vrot.slane %v9062_v15, 4 }
 0x9d3   : > { %6875 = vmatprep.subr.bf16.mxu0 %v6874_v12  ;;  %v3616_v12 = vld [vmem:[#allocation16 + $0x800] sm:$0xff] }
 0x9d4   : > { %v6912_v22 = vpack.c.bf16 %v3620_v17, %v3616_v12  ;;  %v3630_v12 = vld [vmem:[#allocation16 + $0x870] sm:$0xff]  ;;  %v3635_v17 = vld [vmem:[#allocation16 + $0x898] sm:$0xff] }
 0x9d6   : > { %6877 = vmatpush1.bf16.msra.mxu0 %v6876_v28  ;;  %v6914_v28 = vpack.c.bf16 %v3629_v21, %v3625_v18  ;;  %v3639_v18 = vld [vmem:[#allocation16 + $0x8b8] sm:$0xff] }
 0x9d7   : > { %6879 = vmatprep.subr.bf16.mxu0 %v6878_v11  ;;  %v3624_v11 = vld [vmem:[#allocation16 + $0x840] sm:$0xff] }
 0x9d8   : > { %v6916_v31 = vpack.c.bf16 %v3628_v29, %v3624_v11  ;;  %v3638_v11 = vld [vmem:[#allocation16 + $0x8b0] sm:$0xff]  ;;  %v3643_v29 = vld [vmem:[#allocation16 + $0x8d8] sm:$0xff] }
 0x9d9   : > { %4438 = vmatmul.mubr.f32.vlgmr.msra.gmra.mrb[12].mxu0 %v4371_v5 }
 0x9da   : > { %6881 = vmatpush1.bf16.msra.mxu0 %v6880_v32  ;;  %4508 = vmatprep.mubr.f32.mxu0 %v8012_v0  ;;  %v6918_v32 = vpack.c.bf16 %v3637_v4, %v3633_v23  ;;  %v3647_v23 = vld [vmem:[#allocation16 + $0x8f8] sm:$0xff] }
 0x9db   : > { %6883 = vmatprep.subr.bf16.mxu0 %v6882_v35  ;;  %v3632_v35 = vld [vmem:[#allocation16 + $0x880] sm:$0xff] }
 0x9dc   : > { %v6920_v58 = vpack.c.bf16 %v3636_v36, %v3632_v35  ;;  %v3646_v35 = vld [vmem:[#allocation16 + $0x8f0] sm:$0xff]  ;;  %v3651_v36 = vld [vmem:[#allocation16 + $0x918] sm:$0xff] }
 0x9de   : > { %6885 = vmatpush1.bf16.msra.mxu0 %v6884_v42  ;;  %v6922_v42 = vpack.c.bf16 %v3645_v41, %v3641_v40  ;;  %v3655_v40 = vld [vmem:[#allocation16 + $0x938] sm:$0xff] }
 0x9df   : > { %6887 = vmatprep.subr.bf16.mxu0 %v6886_v1  ;;  %v3640_v1 = vld [vmem:[#allocation16 + $0x8c0] sm:$0xff] }
 0x9e2   : > { %6889 = vmatpush1.bf16.msra.mxu0 %v6888_v44  ;;  %v3648_v44 = vld [vmem:[#allocation16 + $0x900] sm:$0xff] }
 0x9e3   : > { %6891 = vmatprep.subr.bf16.mxu0 %v6890_v9  ;;  %v3652_v9 = vld [vmem:[#allocation16 + $0x920] sm:$0xff] }
 0x9e4   : > { %v6928_v33 = vpack.c.bf16 %v3652_v9, %v3648_v44  ;;  %v3662_v44 = vld [vmem:[#allocation16 + $0x970] sm:$0xff]  ;;  %v3667_v9 = vld [vmem:[#allocation16 + $0x998] sm:$0xff] }
 0x9e6   : > { %6893 = vmatpush1.bf16.msra.mxu0 %v6892_v51  ;;  %v3656_v51 = vld [vmem:[#allocation16 + $0x940] sm:$0xff] }
 0x9e7   : > { %6895 = vmatprep.subr.bf16.mxu0 %v6894_v56  ;;  %v3660_v56 = vld [vmem:[#allocation16 + $0x960] sm:$0xff] }
 0x9e8   : > { %v6932_v47 = vpack.c.bf16 %v3660_v56, %v3656_v51  ;;  %v3670_v51 = vld [vmem:[#allocation16 + $0x9b0] sm:$0xff]  ;;  %v3675_v56 = vld [vmem:[#allocation16 + $0x9d8] sm:$0xff] }
 0x9ea   : > { %6897 = vmatpush1.bf16.msra.mxu0 %v6896_v57  ;;  %v3664_v57 = vld [vmem:[#allocation16 + $0x980] sm:$0xff] }
 0x9eb   : > { %6899 = vmatprep.subr.bf16.mxu0 %v6898_v46  ;;  %v3668_v46 = vld [vmem:[#allocation16 + $0x9a0] sm:$0xff] }
 0x9ec   : > { %v6936_v16 = vpack.c.bf16 %v3668_v46, %v3664_v57  ;;  %v3678_v57 = vld [vmem:[#allocation16 + $0x9f0] sm:$0xff]  ;;  %v3681_v46 = vld [vmem:[#allocation16 + $0xa08] sm:$0xff] }
 0x9ee   : > { %6901 = vmatpush1.bf16.msra.mxu0 %v6900_v39  ;;  %v3672_v39 = vld [vmem:[#allocation16 + $0x9c0] sm:$0xff] }
 0x9ef   : > { %6903 = vmatprep.subr.bf16.mxu0 %v6902_v38  ;;  %v3676_v38 = vld [vmem:[#allocation16 + $0x9e0] sm:$0xff] }
 0x9f0   : > { %v6940_v19 = vpack.c.bf16 %v3676_v38, %v3672_v39  ;;  %v3684_v39 = vld [vmem:[#allocation16 + $0xa20] sm:$0xff]  ;;  %v3689_v38 = vld [vmem:[#allocation16 + $0xa48] sm:$0xff] }
 0x9f2   : > { %6905 = vmatpush1.bf16.msra.mxu0 %v6904_v20  ;;  %v3618_v20 = vld [vmem:[#allocation16 + $0x810] sm:$0xff] }
 0x9f3   : > { %6907 = vmatprep.subr.bf16.mxu0 %v6906_v59  ;;  %v3622_v59 = vld [vmem:[#allocation16 + $0x830] sm:$0xff] }
 0x9f4   : > { %v6944_v61 = vpack.c.bf16 %v3622_v59, %v3618_v20  ;;  %v3692_v20 = vld [vmem:[#allocation16 + $0xa60] sm:$0xff]  ;;  %v3697_v59 = vld [vmem:[#allocation16 + $0xa88] sm:$0xff] }
 0x9f6   : > { %6909 = vmatpush1.bf16.msra.mxu0 %v6908_v8  ;;  %v6946_v8 = vpack.c.bf16 %v3631_v60, %v3627_v26  ;;  %v3701_v26 = vld [vmem:[#allocation16 + $0xaa8] sm:$0xff] }
 0x9f7   : > { %6911 = vmatprep.subr.bf16.mxu0 %v6910_v63  ;;  %v3626_v63 = vld [vmem:[#allocation16 + $0x850] sm:$0xff] }
 0x9f8   : > { %v6948_v21 = vpack.c.bf16 %v3630_v12, %v3626_v63  ;;  %v3700_v63 = vld [vmem:[#allocation16 + $0xaa0] sm:$0xff]  ;;  %v3705_v12 = vld [vmem:[#allocation16 + $0xac8] sm:$0xff] }
 0x9f9   : > { %4509 = vmatmul.mubr.f32.vlgmr.msra.gmra.mrb[14].mxu0 %v4371_v5  ;;  %v6924_v5 = vpack.c.bf16 %v3644_v2, %v3640_v1  ;;  %v3654_v1 = vld [vmem:[#allocation16 + $0x930] sm:$0xff]  ;;  %v3659_v2 = vld [vmem:[#allocation16 + $0x958] sm:$0xff] }
 0x9fa   : > { %6913 = vmatpush1.bf16.msra.mxu0 %v6912_v22  ;;  %4585 = vmatprep.mubr.f32.mxu0 %v8012_v0  ;;  %v6950_v22 = vpack.c.bf16 %v3639_v18, %v3635_v17  ;;  %v3709_v17 = vld [vmem:[#allocation16 + $0xae8] sm:$0xff] }
 0x9fb   : > { %6915 = vmatprep.subr.bf16.mxu0 %v6914_v28  ;;  %v3634_v28 = vld [vmem:[#allocation16 + $0x890] sm:$0xff] }
 0x9fc   : > { %v6952_v4 = vpack.c.bf16 %v3638_v11, %v3634_v28  ;;  %v3708_v28 = vld [vmem:[#allocation16 + $0xae0] sm:$0xff]  ;;  %v3713_v11 = vld [vmem:[#allocation16 + $0xb08] sm:$0xff] }
 0x9fe   : > { %6917 = vmatpush1.bf16.msra.mxu0 %v6916_v31  ;;  %v6954_v31 = vpack.c.bf16 %v3647_v23, %v3643_v29  ;;  %v3717_v29 = vld [vmem:[#allocation16 + $0xb28] sm:$0xff] }
 0x9ff   : > { %6919 = vmatprep.subr.bf16.mxu0 %v6918_v32  ;;  %v3642_v32 = vld [vmem:[#allocation16 + $0x8d0] sm:$0xff]  ;;  %v6990_v23 = vpack.c.bf16 %v3717_v29, %v3713_v11  ;;  %v3727_v11 = vld [vmem:[#allocation16 + $0xb78] sm:$0xff] }
 0xa00   : > { %v6956_v41 = vpack.c.bf16 %v3646_v35, %v3642_v32  ;;  %v3721_v32 = vld [vmem:[#allocation16 + $0xb48] sm:$0xff] }
 0xa01   : > { %v3725_v35 = vld [vmem:[#allocation16 + $0xb68] sm:$0xff] }
 0xa02   : > { %6921 = vmatpush1.bf16.msra.mxu0 %v6920_v58  ;;  %v6958_v58 = vpack.c.bf16 %v3655_v40, %v3651_v36  ;;  %v6994_v40 = vpack.c.bf16 %v3725_v35, %v3721_v32  ;;  %v3735_v32 = vld [vmem:[#allocation16 + $0xbb8] sm:$0xff] }
 0xa03   : > { %6923 = vmatprep.subr.bf16.mxu0 %v6922_v42  ;;  %v3650_v42 = vld [vmem:[#allocation16 + $0x910] sm:$0xff] }
 0xa04   : > { %v6960_v43 = vpack.c.bf16 %v3654_v1, %v3650_v42  ;;  %v3729_v42 = vld [vmem:[#allocation16 + $0xb88] sm:$0xff] }
 0xa05   : > { %v3733_v1 = vld [vmem:[#allocation16 + $0xba8] sm:$0xff] }
 0xa06   : > { %6925 = vmatpush1.bf16.msra.mxu0 %v6924_v5  ;;  %v6962_v5 = vpack.c.bf16 %v3663_v48, %v3659_v2  ;;  %v6998_v48 = vpack.c.bf16 %v3733_v1, %v3729_v42  ;;  %v3743_v42 = vld [vmem:[#allocation16 + $0xbf8] sm:$0xff] }
 0xa07   : > { %6927 = vmatprep.subr.bf16.mxu0 %v6926_v52  ;;  %v3658_v52 = vld [vmem:[#allocation16 + $0x950] sm:$0xff] }
 0xa08   : > { %v6964_v49 = vpack.c.bf16 %v3662_v44, %v3658_v52  ;;  %v3737_v52 = vld [vmem:[#allocation16 + $0xbc8] sm:$0xff] }
 0xa09   : > { %v3741_v44 = vld [vmem:[#allocation16 + $0xbe8] sm:$0xff] }
 0xa0a   : > { %6929 = vmatpush1.bf16.msra.mxu0 %v6928_v33  ;;  %v6966_v33 = vpack.c.bf16 %v3671_v45, %v3667_v9  ;;  %v7002_v45 = vpack.c.bf16 %v3741_v44, %v3737_v52  ;;  %v3749_v52 = vld [vmem:[#allocation16 + $0xc28] sm:$0xff] }
 0xa0b   : > { %6931 = vmatprep.subr.bf16.mxu0 %v6930_v50  ;;  %v3666_v50 = vld [vmem:[#allocation16 + $0x990] sm:$0xff] }
 0xa0c   : > { %v6968_v13 = vpack.c.bf16 %v3670_v51, %v3666_v50  ;;  %v3683_v50 = vld [vmem:[#allocation16 + $0xa18] sm:$0xff] }
 0xa0d   : > { %v3687_v51 = vld [vmem:[#allocation16 + $0xa38] sm:$0xff] }
 0xa0e   : > { %6933 = vmatpush1.bf16.msra.mxu0 %v6932_v47  ;;  %v6970_v47 = vpack.c.bf16 %v3679_v24, %v3675_v56  ;;  %v7006_v24 = vpack.c.bf16 %v3687_v51, %v3683_v50  ;;  %v3757_v50 = vld [vmem:[#allocation16 + $0xc68] sm:$0xff] }
 0xa0f   : > { %6935 = vmatprep.subr.bf16.mxu0 %v6934_v30  ;;  %v3674_v30 = vld [vmem:[#allocation16 + $0x9d0] sm:$0xff] }
 0xa10   : > { %v6972_v37 = vpack.c.bf16 %v3678_v57, %v3674_v30  ;;  %v3691_v30 = vld [vmem:[#allocation16 + $0xa58] sm:$0xff] }
 0xa11   : > { %v3695_v57 = vld [vmem:[#allocation16 + $0xa78] sm:$0xff] }
 0xa12   : > { %6937 = vmatpush1.bf16.msra.mxu0 %v6936_v16  ;;  %v6974_v16 = vpack.c.bf16 %v3685_v25, %v3681_v46  ;;  %v4667_v25 = vrot.slane %v9062_v15, 5 }
 0xa13   : > { %6939 = vmatprep.subr.bf16.mxu0 %v6938_v34  ;;  %v3680_v34 = vld [vmem:[#allocation16 + $0xa00] sm:$0xff] }
 0xa14   : > { %v6976_v54 = vpack.c.bf16 %v3684_v39, %v3680_v34  ;;  %v3694_v34 = vld [vmem:[#allocation16 + $0xa70] sm:$0xff]  ;;  %v3699_v39 = vld [vmem:[#allocation16 + $0xa98] sm:$0xff] }
 0xa16   : > { %6941 = vmatpush1.bf16.msra.mxu0 %v6940_v19  ;;  %v6978_v19 = vpack.c.bf16 %v3693_v53, %v3689_v38  ;;  %v3703_v38 = vld [vmem:[#allocation16 + $0xab8] sm:$0xff] }
 0xa17   : > { %6943 = vmatprep.subr.bf16.mxu0 %v6942_v3  ;;  %v3688_v3 = vld [vmem:[#allocation16 + $0xa40] sm:$0xff] }
 0xa18   : > { %v6980_v60 = vpack.c.bf16 %v3692_v20, %v3688_v3  ;;  %v3702_v3 = vld [vmem:[#allocation16 + $0xab0] sm:$0xff]  ;;  %v3707_v20 = vld [vmem:[#allocation16 + $0xad8] sm:$0xff] }
 0xa19   : > { %4586 = vmatmul.mubr.f32.vlgmr.msra.gmra.mrb[12].mxu0 %v4519_v62 }
 0xa1a   : > { %6945 = vmatpush1.bf16.msra.mxu0 %v6944_v61  ;;  %4656 = vmatprep.mubr.f32.mxu0 %v8012_v0  ;;  %v6982_v61 = vpack.c.bf16 %v3701_v26, %v3697_v59  ;;  %v3711_v59 = vld [vmem:[#allocation16 + $0xaf8] sm:$0xff] }
 0xa1b   : > { %6947 = vmatprep.subr.bf16.mxu0 %v6946_v8  ;;  %v3696_v8 = vld [vmem:[#allocation16 + $0xa80] sm:$0xff] }
 0xa1c   : > { %v6984_v18 = vpack.c.bf16 %v3700_v63, %v3696_v8  ;;  %v3710_v8 = vld [vmem:[#allocation16 + $0xaf0] sm:$0xff]  ;;  %v3715_v63 = vld [vmem:[#allocation16 + $0xb18] sm:$0xff] }
 0xa1e   : > { %6949 = vmatpush1.bf16.msra.mxu0 %v6948_v21  ;;  %v6986_v21 = vpack.c.bf16 %v3709_v17, %v3705_v12  ;;  %v3719_v12 = vld [vmem:[#allocation16 + $0xb38] sm:$0xff] }
 0xa1f   : > { %6951 = vmatprep.subr.bf16.mxu0 %v6950_v22  ;;  %v3704_v22 = vld [vmem:[#allocation16 + $0xac0] sm:$0xff] }
 0xa22   : > { %6953 = vmatpush1.bf16.msra.mxu0 %v6952_v4  ;;  %v3712_v4 = vld [vmem:[#allocation16 + $0xb00] sm:$0xff] }
 0xa23   : > { %6955 = vmatprep.subr.bf16.mxu0 %v6954_v31  ;;  %v3716_v31 = vld [vmem:[#allocation16 + $0xb20] sm:$0xff] }
 0xa24   : > { %v6992_v36 = vpack.c.bf16 %v3716_v31, %v3712_v4  ;;  %v3726_v4 = vld [vmem:[#allocation16 + $0xb70] sm:$0xff]  ;;  %v3731_v31 = vld [vmem:[#allocation16 + $0xb98] sm:$0xff] }
 0xa26   : > { %6957 = vmatpush1.bf16.msra.mxu0 %v6956_v41  ;;  %v3720_v41 = vld [vmem:[#allocation16 + $0xb40] sm:$0xff] }
 0xa27   : > { %6959 = vmatprep.subr.bf16.mxu0 %v6958_v58  ;;  %v3724_v58 = vld [vmem:[#allocation16 + $0xb60] sm:$0xff] }
 0xa28   : > { %v6996_v2 = vpack.c.bf16 %v3724_v58, %v3720_v41  ;;  %v3734_v41 = vld [vmem:[#allocation16 + $0xbb0] sm:$0xff]  ;;  %v3739_v58 = vld [vmem:[#allocation16 + $0xbd8] sm:$0xff] }
 0xa2a   : > { %6961 = vmatpush1.bf16.msra.mxu0 %v6960_v43  ;;  %v3728_v43 = vld [vmem:[#allocation16 + $0xb80] sm:$0xff] }
 0xa2b   : > { %6963 = vmatprep.subr.bf16.mxu0 %v6962_v5  ;;  %v3732_v5 = vld [vmem:[#allocation16 + $0xba0] sm:$0xff] }
 0xa2c   : > { %v7000_v9 = vpack.c.bf16 %v3732_v5, %v3728_v43  ;;  %v3742_v43 = vld [vmem:[#allocation16 + $0xbf0] sm:$0xff]  ;;  %v3745_v5 = vld [vmem:[#allocation16 + $0xc08] sm:$0xff] }
 0xa2e   : > { %6965 = vmatpush1.bf16.msra.mxu0 %v6964_v49  ;;  %v3736_v49 = vld [vmem:[#allocation16 + $0xbc0] sm:$0xff] }
 0xa2f   : > { %6967 = vmatprep.subr.bf16.mxu0 %v6966_v33  ;;  %v3740_v33 = vld [vmem:[#allocation16 + $0xbe0] sm:$0xff] }
 0xa30   : > { %v7004_v56 = vpack.c.bf16 %v3740_v33, %v3736_v49  ;;  %v3748_v49 = vld [vmem:[#allocation16 + $0xc20] sm:$0xff]  ;;  %v3753_v33 = vld [vmem:[#allocation16 + $0xc48] sm:$0xff] }
 0xa32   : > { %6969 = vmatpush1.bf16.msra.mxu0 %v6968_v13  ;;  %v3682_v13 = vld [vmem:[#allocation16 + $0xa10] sm:$0xff] }
 0xa33   : > { %6971 = vmatprep.subr.bf16.mxu0 %v6970_v47  ;;  %v3686_v47 = vld [vmem:[#allocation16 + $0xa30] sm:$0xff] }
 0xa34   : > { %v7008_v46 = vpack.c.bf16 %v3686_v47, %v3682_v13  ;;  %v3756_v13 = vld [vmem:[#allocation16 + $0xc60] sm:$0xff]  ;;  %v3761_v47 = vld [vmem:[#allocation16 + $0xc88] sm:$0xff] }
 0xa36   : > { %6973 = vmatpush1.bf16.msra.mxu0 %v6972_v37  ;;  %v7010_v37 = vpack.c.bf16 %v3695_v57, %v3691_v30  ;;  %v3765_v30 = vld [vmem:[#allocation16 + $0xca8] sm:$0xff] }
 0xa37   : > { %6975 = vmatprep.subr.bf16.mxu0 %v6974_v16  ;;  %v3690_v16 = vld [vmem:[#allocation16 + $0xa50] sm:$0xff] }
 0xa38   : > { %v7012_v53 = vpack.c.bf16 %v3694_v34, %v3690_v16  ;;  %v3764_v16 = vld [vmem:[#allocation16 + $0xca0] sm:$0xff]  ;;  %v3769_v34 = vld [vmem:[#allocation16 + $0xcc8] sm:$0xff] }
 0xa39   : > { %4657 = vmatmul.mubr.f32.vlgmr.msra.gmra.mrb[14].mxu0 %v4519_v62  ;;  %v6988_v62 = vpack.c.bf16 %v3708_v28, %v3704_v22  ;;  %v3718_v22 = vld [vmem:[#allocation16 + $0xb30] sm:$0xff]  ;;  %v3723_v28 = vld [vmem:[#allocation16 + $0xb58] sm:$0xff] }
 0xa3a   : > { %6977 = vmatpush1.bf16.msra.mxu0 %v6976_v54  ;;  %4733 = vmatprep.mubr.f32.mxu0 %v8012_v0  ;;  %v7014_v54 = vpack.c.bf16 %v3703_v38, %v3699_v39  ;;  %v3773_v39 = vld [vmem:[#allocation16 + $0xce8] sm:$0xff] }
 0xa3b   : > { %6979 = vmatprep.subr.bf16.mxu0 %v6978_v19  ;;  %v3698_v19 = vld [vmem:[#allocation16 + $0xa90] sm:$0xff] }
 0xa3c   : > { %v7016_v26 = vpack.c.bf16 %v3702_v3, %v3698_v19  ;;  %v3772_v19 = vld [vmem:[#allocation16 + $0xce0] sm:$0xff]  ;;  %v3777_v3 = vld [vmem:[#allocation16 + $0xd08] sm:$0xff] }
 0xa3e   : > { %6981 = vmatpush1.bf16.msra.mxu0 %v6980_v60  ;;  %v7018_v60 = vpack.c.bf16 %v3711_v59, %v3707_v20  ;;  %v3781_v20 = vld [vmem:[#allocation16 + $0xd28] sm:$0xff] }
 0xa3f   : > { %6983 = vmatprep.subr.bf16.mxu0 %v6982_v61  ;;  %v3706_v61 = vld [vmem:[#allocation16 + $0xad0] sm:$0xff]  ;;  %v7054_v59 = vpack.c.bf16 %v3781_v20, %v3777_v3  ;;  %v3791_v3 = vld [vmem:[#allocation16 + $0xd78] sm:$0xff] }
 0xa40   : > { %v7020_v17 = vpack.c.bf16 %v3710_v8, %v3706_v61  ;;  %v3785_v61 = vld [vmem:[#allocation16 + $0xd48] sm:$0xff] }
 0xa41   : > { %v3789_v8 = vld [vmem:[#allocation16 + $0xd68] sm:$0xff] }
 0xa42   : > { %6985 = vmatpush1.bf16.msra.mxu0 %v6984_v18  ;;  %v7022_v18 = vpack.c.bf16 %v3719_v12, %v3715_v63  ;;  %v7058_v12 = vpack.c.bf16 %v3789_v8, %v3785_v61  ;;  %v3799_v61 = vld [vmem:[#allocation16 + $0xdb8] sm:$0xff] }
 0xa43   : > { %6987 = vmatprep.subr.bf16.mxu0 %v6986_v21  ;;  %v3714_v21 = vld [vmem:[#allocation16 + $0xb10] sm:$0xff] }
 0xa44   : > { %v7024_v29 = vpack.c.bf16 %v3718_v22, %v3714_v21  ;;  %v3793_v21 = vld [vmem:[#allocation16 + $0xd88] sm:$0xff] }
 0xa45   : > { %v3797_v22 = vld [vmem:[#allocation16 + $0xda8] sm:$0xff] }
 0xa46   : > { %6989 = vmatpush1.bf16.msra.mxu0 %v6988_v62  ;;  %v7026_v62 = vpack.c.bf16 %v3727_v11, %v3723_v28  ;;  %v7062_v11 = vpack.c.bf16 %v3797_v22, %v3793_v21  ;;  %v3807_v21 = vld [vmem:[#allocation16 + $0xdf8] sm:$0xff] }
 0xa47   : > { %6991 = vmatprep.subr.bf16.mxu0 %v6990_v23  ;;  %v3722_v23 = vld [vmem:[#allocation16 + $0xb50] sm:$0xff] }
 0xa48   : > { %v7028_v35 = vpack.c.bf16 %v3726_v4, %v3722_v23  ;;  %v3801_v23 = vld [vmem:[#allocation16 + $0xdc8] sm:$0xff] }
 0xa49   : > { %v3805_v4 = vld [vmem:[#allocation16 + $0xde8] sm:$0xff] }
 0xa4a   : > { %6993 = vmatpush1.bf16.msra.mxu0 %v6992_v36  ;;  %v7030_v36 = vpack.c.bf16 %v3735_v32, %v3731_v31  ;;  %v7066_v32 = vpack.c.bf16 %v3805_v4, %v3801_v23  ;;  %v3813_v23 = vld [vmem:[#allocation16 + $0xe28] sm:$0xff] }
 0xa4b   : > { %6995 = vmatprep.subr.bf16.mxu0 %v6994_v40  ;;  %v3730_v40 = vld [vmem:[#allocation16 + $0xb90] sm:$0xff] }
 0xa4c   : > { %v7032_v1 = vpack.c.bf16 %v3734_v41, %v3730_v40  ;;  %v3747_v40 = vld [vmem:[#allocation16 + $0xc18] sm:$0xff] }
 0xa4d   : > { %v3751_v41 = vld [vmem:[#allocation16 + $0xc38] sm:$0xff] }
 0xa4e   : > { %6997 = vmatpush1.bf16.msra.mxu0 %v6996_v2  ;;  %v7034_v2 = vpack.c.bf16 %v3743_v42, %v3739_v58  ;;  %v7070_v42 = vpack.c.bf16 %v3751_v41, %v3747_v40  ;;  %v3821_v40 = vld [vmem:[#allocation16 + $0xe68] sm:$0xff] }
 0xa4f   : > { %6999 = vmatprep.subr.bf16.mxu0 %v6998_v48  ;;  %v3738_v48 = vld [vmem:[#allocation16 + $0xbd0] sm:$0xff] }
 0xa50   : > { %v7036_v44 = vpack.c.bf16 %v3742_v43, %v3738_v48  ;;  %v3755_v48 = vld [vmem:[#allocation16 + $0xc58] sm:$0xff] }
 0xa51   : > { %v3759_v43 = vld [vmem:[#allocation16 + $0xc78] sm:$0xff] }
 0xa52   : > { %7001 = vmatpush1.bf16.msra.mxu0 %v7000_v9  ;;  %v7038_v9 = vpack.c.bf16 %v3749_v52, %v3745_v5  ;;  %v4815_v52 = vrot.slane %v9062_v15, 6 }
 0xa53   : > { %7003 = vmatprep.subr.bf16.mxu0 %v7002_v45  ;;  %v3744_v45 = vld [vmem:[#allocation16 + $0xc00] sm:$0xff] }
 0xa54   : > { %v7040_v51 = vpack.c.bf16 %v3748_v49, %v3744_v45  ;;  %v3758_v45 = vld [vmem:[#allocation16 + $0xc70] sm:$0xff]  ;;  %v3763_v49 = vld [vmem:[#allocation16 + $0xc98] sm:$0xff] }
 0xa56   : > { %7005 = vmatpush1.bf16.msra.mxu0 %v7004_v56  ;;  %v7042_v56 = vpack.c.bf16 %v3757_v50, %v3753_v33  ;;  %v3767_v33 = vld [vmem:[#allocation16 + $0xcb8] sm:$0xff] }
 0xa57   : > { %7007 = vmatprep.subr.bf16.mxu0 %v7006_v24  ;;  %v3752_v24 = vld [vmem:[#allocation16 + $0xc40] sm:$0xff] }
 0xa58   : > { %v7044_v57 = vpack.c.bf16 %v3756_v13, %v3752_v24  ;;  %v3766_v24 = vld [vmem:[#allocation16 + $0xcb0] sm:$0xff]  ;;  %v3771_v13 = vld [vmem:[#allocation16 + $0xcd8] sm:$0xff] }
 0xa59   : > { %4734 = vmatmul.mubr.f32.vlgmr.msra.gmra.mrb[12].mxu0 %v4667_v25 }
 0xa5a   : > { %7009 = vmatpush1.bf16.msra.mxu0 %v7008_v46  ;;  %4804 = vmatprep.mubr.f32.mxu0 %v8012_v0  ;;  %v7046_v46 = vpack.c.bf16 %v3765_v30, %v3761_v47  ;;  %v3775_v47 = vld [vmem:[#allocation16 + $0xcf8] sm:$0xff] }
 0xa5b   : > { %7011 = vmatprep.subr.bf16.mxu0 %v7010_v37  ;;  %v3760_v37 = vld [vmem:[#allocation16 + $0xc80] sm:$0xff] }
 0xa5c   : > { %v7048_v38 = vpack.c.bf16 %v3764_v16, %v3760_v37  ;;  %v3774_v37 = vld [vmem:[#allocation16 + $0xcf0] sm:$0xff]  ;;  %v3779_v16 = vld [vmem:[#allocation16 + $0xd18] sm:$0xff] }
 0xa5e   : > { %7013 = vmatpush1.bf16.msra.mxu0 %v7012_v53  ;;  %v7050_v53 = vpack.c.bf16 %v3773_v39, %v3769_v34  ;;  %v3783_v34 = vld [vmem:[#allocation16 + $0xd38] sm:$0xff] }
 0xa5f   : > { %7015 = vmatprep.subr.bf16.mxu0 %v7014_v54  ;;  %v3768_v54 = vld [vmem:[#allocation16 + $0xcc0] sm:$0xff] }
 0xa62   : > { %7017 = vmatpush1.bf16.msra.mxu0 %v7016_v26  ;;  %v3776_v26 = vld [vmem:[#allocation16 + $0xd00] sm:$0xff] }
 0xa63   : > { %7019 = vmatprep.subr.bf16.mxu0 %v7018_v60  ;;  %v3780_v60 = vld [vmem:[#allocation16 + $0xd20] sm:$0xff] }
 0xa64   : > { %v7056_v63 = vpack.c.bf16 %v3780_v60, %v3776_v26  ;;  %v3790_v26 = vld [vmem:[#allocation16 + $0xd70] sm:$0xff]  ;;  %v3795_v60 = vld [vmem:[#allocation16 + $0xd98] sm:$0xff] }
 0xa66   : > { %7021 = vmatpush1.bf16.msra.mxu0 %v7020_v17  ;;  %v3784_v17 = vld [vmem:[#allocation16 + $0xd40] sm:$0xff] }
 0xa67   : > { %7023 = vmatprep.subr.bf16.mxu0 %v7022_v18  ;;  %v3788_v18 = vld [vmem:[#allocation16 + $0xd60] sm:$0xff] }
 0xa68   : > { %v7060_v28 = vpack.c.bf16 %v3788_v18, %v3784_v17  ;;  %v3798_v17 = vld [vmem:[#allocation16 + $0xdb0] sm:$0xff]  ;;  %v3803_v18 = vld [vmem:[#allocation16 + $0xdd8] sm:$0xff] }
 0xa6a   : > { %7025 = vmatpush1.bf16.msra.mxu0 %v7024_v29  ;;  %v3792_v29 = vld [vmem:[#allocation16 + $0xd80] sm:$0xff] }
 0xa6b   : > { %7027 = vmatprep.subr.bf16.mxu0 %v7026_v62  ;;  %v3796_v62 = vld [vmem:[#allocation16 + $0xda0] sm:$0xff] }
 0xa6c   : > { %v7064_v31 = vpack.c.bf16 %v3796_v62, %v3792_v29  ;;  %v3806_v29 = vld [vmem:[#allocation16 + $0xdf0] sm:$0xff]  ;;  %v3809_v62 = vld [vmem:[#allocation16 + $0xe08] sm:$0xff] }
 0xa6e   : > { %7029 = vmatpush1.bf16.msra.mxu0 %v7028_v35  ;;  %v3800_v35 = vld [vmem:[#allocation16 + $0xdc0] sm:$0xff] }
 0xa6f   : > { %7031 = vmatprep.subr.bf16.mxu0 %v7030_v36  ;;  %v3804_v36 = vld [vmem:[#allocation16 + $0xde0] sm:$0xff] }
 0xa70   : > { %v7068_v58 = vpack.c.bf16 %v3804_v36, %v3800_v35  ;;  %v3812_v35 = vld [vmem:[#allocation16 + $0xe20] sm:$0xff]  ;;  %v3817_v36 = vld [vmem:[#allocation16 + $0xe48] sm:$0xff] }
 0xa72   : > { %7033 = vmatpush1.bf16.msra.mxu0 %v7032_v1  ;;  %v3746_v1 = vld [vmem:[#allocation16 + $0xc10] sm:$0xff] }
 0xa73   : > { %7035 = vmatprep.subr.bf16.mxu0 %v7034_v2  ;;  %v3750_v2 = vld [vmem:[#allocation16 + $0xc30] sm:$0xff] }
 0xa74   : > { %v7072_v5 = vpack.c.bf16 %v3750_v2, %v3746_v1  ;;  %v3820_v1 = vld [vmem:[#allocation16 + $0xe60] sm:$0xff]  ;;  %v3825_v2 = vld [vmem:[#allocation16 + $0xe88] sm:$0xff] }
 0xa76   : > { %7037 = vmatpush1.bf16.msra.mxu0 %v7036_v44  ;;  %v7074_v44 = vpack.c.bf16 %v3759_v43, %v3755_v48  ;;  %v3829_v48 = vld [vmem:[#allocation16 + $0xea8] sm:$0xff]  ;;  %v3824_v43 = vld [vmem:[#allocation16 + $0xe80] sm:$0xff] }
 0xa77   : > { %7039 = vmatprep.subr.bf16.mxu0 %v7038_v9  ;;  %v3754_v9 = vld [vmem:[#allocation16 + $0xc50] sm:$0xff] }
 0xa78   : > { %v7076_v50 = vpack.c.bf16 %v3758_v45, %v3754_v9  ;;  %v5328_v9 = vld [vmem:[%s9391_s14 + $0x88] sm:$0xff]  ;;  %v5311_v45 = vld [vmem:[%s9391_s14] sm:$0xff] }
 0xa79   : > { %4805 = vmatmul.mubr.f32.vlgmr.msra.gmra.mrb[14].mxu0 %v4667_v25  ;;  %v7052_v25 = vpack.c.bf16 %v3772_v19, %v3768_v54  ;;  %v3782_v54 = vld [vmem:[#allocation16 + $0xd30] sm:$0xff]  ;;  %v3787_v19 = vld [vmem:[#allocation16 + $0xd58] sm:$0xff] }
 0xa7a   : > { %7041 = vmatpush1.bf16.msra.mxu0 %v7040_v51  ;;  %4881 = vmatprep.mubr.f32.mxu0 %v8012_v0  ;;  %v7078_v51 = vpack.c.bf16 %v3767_v33, %v3763_v49 }
 0xa7b   : > { %7043 = vmatprep.subr.bf16.mxu0 %v7042_v56  ;;  %v3762_v56 = vld [vmem:[#allocation16 + $0xc90] sm:$0xff] }
 0xa7c   : > { %v7080_v30 = vpack.c.bf16 %v3766_v24, %v3762_v56  ;;  %v7110_v56 = vpack.c.bf16 %v3829_v48, %v3825_v2  ;;  %v3861_v2 = vld [vmem:[#allocation16 + $0xfa8] sm:$0xff] }
 0xa7e   : > { %7045 = vmatpush1.bf16.msra.mxu0 %v7044_v57  ;;  %v7082_v57 = vpack.c.bf16 %v3775_v47, %v3771_v13  ;;  %v5313_v47 = vld [vmem:[%s9391_s14 + $0x10] sm:$0xff] }
 0xa7f   : > { %7047 = vmatprep.subr.bf16.mxu0 %v7046_v46  ;;  %v3770_v46 = vld [vmem:[#allocation16 + $0xcd0] sm:$0xff] }
 0xa80   : > { %v7084_v39 = vpack.c.bf16 %v3774_v37, %v3770_v46  ;;  %v3833_v46 = vld [vmem:[#allocation16 + $0xec8] sm:$0xff] }
 0xa81   : > { %v3837_v37 = vld [vmem:[#allocation16 + $0xee8] sm:$0xff] }
 0xa82   : > { %7049 = vmatpush1.bf16.msra.mxu0 %v7048_v38  ;;  %v7086_v38 = vpack.c.bf16 %v3783_v34, %v3779_v16  ;;  %v5332_v16 = vld [vmem:[%s9391_s14 + $0xa8] sm:$0xff] }
 0xa83   : > { %7051 = vmatprep.subr.bf16.mxu0 %v7050_v53  ;;  %v3778_v53 = vld [vmem:[#allocation16 + $0xd10] sm:$0xff] }
 0xa84   : > { %v7088_v20 = vpack.c.bf16 %v3782_v54, %v3778_v53  ;;  %v5315_v54 = vld [vmem:[%s9391_s14 + $0x20] sm:$0xff] }
 0xa86   : > { %7053 = vmatpush1.bf16.msra.mxu0 %v7052_v25  ;;  %v7090_v25 = vpack.c.bf16 %v3791_v3, %v3787_v19  ;;  %v5316_v19 = vld [vmem:[%s9391_s14 + $0x28] sm:$0xff]  ;;  %v7114_v3 = vpack.c.bf16 %v3837_v37, %v3833_v46 }
 0xa87   : > { %7055 = vmatprep.subr.bf16.mxu0 %v7054_v59  ;;  %v3786_v59 = vld [vmem:[#allocation16 + $0xd50] sm:$0xff] }
 0xa88   : > { %v7092_v8 = vpack.c.bf16 %v3790_v26, %v3786_v59  ;;  %v5334_v59 = vld [vmem:[%s9391_s14 + $0xb8] sm:$0xff]  ;;  %v3841_v26 = vld [vmem:[#allocation16 + $0xf08] sm:$0xff] }
 0xa8a   : > { %7057 = vmatpush1.bf16.msra.mxu0 %v7056_v63  ;;  %v7094_v63 = vpack.c.bf16 %v3799_v61, %v3795_v60  ;;  %v3845_v60 = vld [vmem:[#allocation16 + $0xf28] sm:$0xff]  ;;  %v7240_v61 = vpack.c.bf16 %v5316_v19, %v5315_v54  ;;  %v4963_v54 = vrot.slane %v9062_v15, 7 }
 0xa8b   : > { %7059 = vmatprep.subr.bf16.mxu0 %v7058_v12  ;;  %v3794_v12 = vld [vmem:[#allocation16 + $0xd90] sm:$0xff] }
 0xa8c   : > { %v7096_v22 = vpack.c.bf16 %v3798_v17, %v3794_v12  ;;  %v5317_v17 = vld [vmem:[%s9391_s14 + $0x30] sm:$0xff] }
 0xa8e   : > { %7061 = vmatpush1.bf16.msra.mxu0 %v7060_v28  ;;  %v7098_v28 = vpack.c.bf16 %v3807_v21, %v3803_v18  ;;  %v5318_v18 = vld [vmem:[%s9391_s14 + $0x38] sm:$0xff]  ;;  %v7118_v21 = vpack.c.bf16 %v3845_v60, %v3841_v26 }
 0xa8f   : > { %7063 = vmatprep.subr.bf16.mxu0 %v7062_v11  ;;  %v3802_v11 = vld [vmem:[#allocation16 + $0xdd0] sm:$0xff] }
 0xa90   : > { %v7100_v4 = vpack.c.bf16 %v3806_v29, %v3802_v11  ;;  %v5336_v11 = vld [vmem:[%s9391_s14 + $0xc8] sm:$0xff] }
 0xa91   : > { %v3849_v29 = vld [vmem:[#allocation16 + $0xf48] sm:$0xff] }
 0xa92   : > { %7065 = vmatpush1.bf16.msra.mxu0 %v7064_v31  ;;  %v7102_v31 = vpack.c.bf16 %v3813_v23, %v3809_v62  ;;  %v3853_v62 = vld [vmem:[#allocation16 + $0xf68] sm:$0xff]  ;;  %v7244_v23 = vpack.c.bf16 %v5318_v18, %v5317_v17 }
 0xa93   : > { %7067 = vmatprep.subr.bf16.mxu0 %v7066_v32  ;;  %v3808_v32 = vld [vmem:[#allocation16 + $0xe00] sm:$0xff] }
 0xa94   : > { %v7104_v41 = vpack.c.bf16 %v3812_v35, %v3808_v32  ;;  %v5319_v35 = vld [vmem:[%s9391_s14 + $0x40] sm:$0xff] }
 0xa96   : > { %7069 = vmatpush1.bf16.msra.mxu0 %v7068_v58  ;;  %v7106_v58 = vpack.c.bf16 %v3821_v40, %v3817_v36  ;;  %v5320_v36 = vld [vmem:[%s9391_s14 + $0x48] sm:$0xff]  ;;  %v7122_v40 = vpack.c.bf16 %v3853_v62, %v3849_v29 }
 0xa97   : > { %7071 = vmatprep.subr.bf16.mxu0 %v7070_v42  ;;  %v3816_v42 = vld [vmem:[#allocation16 + $0xe40] sm:$0xff]  ;;  %v7248_v48 = vpack.c.bf16 %v5320_v36, %v5319_v35 }
 0xa98   : > { %v7108_v49 = vpack.c.bf16 %v3820_v1, %v3816_v42  ;;  %v5338_v42 = vld [vmem:[%s9391_s14 + $0xd8] sm:$0xff]  ;;  %v3857_v1 = vld [vmem:[#allocation16 + $0xf88] sm:$0xff] }
 0xa99   : > { %4882 = vmatmul.mubr.f32.vlgmr.msra.gmra.mrb[12].mxu0 %v4815_v52 }
 0xa9a   : > { %7073 = vmatpush1.bf16.msra.mxu0 %v7072_v5  ;;  %4952 = vmatprep.mubr.f32.mxu0 %v8012_v0  ;;  %v3828_v5 = vld [vmem:[#allocation16 + $0xea0] sm:$0xff] }
 0xa9b   : > { %7075 = vmatprep.subr.bf16.mxu0 %v7074_v44  ;;  %v5327_v44 = vld [vmem:[%s9391_s14 + $0x80] sm:$0xff] }
 0xa9c   : > { %v7230_v33 = vpack.c.bf16 %v5328_v9, %v5327_v44  ;;  %v5321_v44 = vld [vmem:[%s9391_s14 + $0x50] sm:$0xff]  ;;  %v5322_v9 = vld [vmem:[%s9391_s14 + $0x58] sm:$0xff] }
 0xa9e   : > { %7077 = vmatpush1.bf16.msra.mxu0 %v7076_v50  ;;  %v5329_v50 = vld [vmem:[%s9391_s14 + $0x90] sm:$0xff]  ;;  %7231 = vmatprep.subr.bf16.mxu1 %v7230_v33  ;;  %v3860_v33 = vld [vmem:[#allocation16 + $0xfa0] sm:$0xff] }
 0xa9f   : > { %7079 = vmatprep.subr.bf16.mxu0 %v7078_v51  ;;  %v5330_v51 = vld [vmem:[%s9391_s14 + $0x98] sm:$0xff] }
 0xaa0   : > { %v7234_v13 = vpack.c.bf16 %v5330_v51, %v5329_v50  ;;  %v3869_v50 = vld [vmem:[#allocation16 + $0xfe8] sm:$0xff]  ;;  %v7252_v51 = vpack.c.bf16 %v5322_v9, %v5321_v44  ;;  %v3871_v44 = vld [vmem:[#allocation16 + $0xff8] sm:$0xff] }
 0xaa2   : > { %7081 = vmatpush1.bf16.msra.mxu0 %v7080_v30  ;;  %v5314_v30 = vld [vmem:[%s9391_s14 + $0x18] sm:$0xff] }
 0xaa3   : > { %7083 = vmatprep.subr.bf16.mxu0 %v7082_v57  ;;  %v5331_v57 = vld [vmem:[%s9391_s14 + $0xa0] sm:$0xff]  ;;  %v7236_v34 = vpack.c.bf16 %v5314_v30, %v5313_v47  ;;  %v3811_v30 = vld [vmem:[#allocation16 + $0xe18] sm:$0xff] }
 0xaa4   : > { %v7238_v53 = vpack.c.bf16 %v5332_v16, %v5331_v57  ;;  %v3868_v47 = vld [vmem:[#allocation16 + $0xfe0] sm:$0xff]  ;;  %v3815_v57 = vld [vmem:[#allocation16 + $0xe38] sm:$0xff]  ;;  %v3810_v16 = vld [vmem:[#allocation16 + $0xe10] sm:$0xff] }
 0xaa5   : > { %v7134_v37 = vpack.c.bf16 %v3815_v57, %v3811_v30  ;;  %v3885_v30 = vld [vmem:[#allocation16 + $0x1068] sm:$0xff] }
 0xaa6   : > { %7085 = vmatpush1.bf16.msra.mxu0 %v7084_v39  ;;  %v7112_v39 = vpack.c.bf16 %v3828_v5, %v3824_v43 }
 0xaa7   : > { %7087 = vmatprep.subr.bf16.mxu0 %v7086_v38  ;;  %v3832_v38 = vld [vmem:[#allocation16 + $0xec0] sm:$0xff] }
 0xaaa   : > { %7089 = vmatpush1.bf16.msra.mxu0 %v7088_v20  ;;  %v3836_v20 = vld [vmem:[#allocation16 + $0xee0] sm:$0xff] }
 0xaab   : > { %7091 = vmatprep.subr.bf16.mxu0 %v7090_v25  ;;  %v5333_v25 = vld [vmem:[%s9391_s14 + $0xb0] sm:$0xff] }
 0xaac   : > { %v7242_v12 = vpack.c.bf16 %v5334_v59, %v5333_v25  ;;  %v3827_v25 = vld [vmem:[#allocation16 + $0xe98] sm:$0xff] }
 0xaad   : > { %v3831_v59 = vld [vmem:[#allocation16 + $0xeb8] sm:$0xff] }
 0xaae   : > { %7093 = vmatpush1.bf16.msra.mxu0 %v7092_v8  ;;  %v7116_v8 = vpack.c.bf16 %v3836_v20, %v3832_v38  ;;  %v3823_v38 = vld [vmem:[#allocation16 + $0xe78] sm:$0xff]  ;;  %v3822_v20 = vld [vmem:[#allocation16 + $0xe70] sm:$0xff]  ;;  %v7142_v60 = vpack.c.bf16 %v3831_v59, %v3827_v25  ;;  %v3901_v25 = vld [vmem:[#allocation16 + $0x10e8] sm:$0xff] }
 0xaaf   : > { %7095 = vmatprep.subr.bf16.mxu0 %v7094_v63  ;;  %v3840_v63 = vld [vmem:[#allocation16 + $0xf00] sm:$0xff] }
 0xab2   : > { %7097 = vmatpush1.bf16.msra.mxu0 %v7096_v22  ;;  %v3844_v22 = vld [vmem:[#allocation16 + $0xf20] sm:$0xff] }
 0xab3   : > { %7099 = vmatprep.subr.bf16.mxu0 %v7098_v28  ;;  %v5335_v28 = vld [vmem:[%s9391_s14 + $0xc0] sm:$0xff] }
 0xab4   : > { %v7246_v32 = vpack.c.bf16 %v5336_v11, %v5335_v28  ;;  %v3843_v28 = vld [vmem:[#allocation16 + $0xf18] sm:$0xff] }
 0xab5   : > { %v3847_v11 = vld [vmem:[#allocation16 + $0xf38] sm:$0xff] }
 0xab6   : > { %7101 = vmatpush1.bf16.msra.mxu0 %v7100_v4  ;;  %v7120_v4 = vpack.c.bf16 %v3844_v22, %v3840_v63  ;;  %v3835_v63 = vld [vmem:[#allocation16 + $0xed8] sm:$0xff]  ;;  %v3838_v22 = vld [vmem:[#allocation16 + $0xef0] sm:$0xff]  ;;  %v7150_v62 = vpack.c.bf16 %v3847_v11, %v3843_v28  ;;  %v3912_v11 = vld [vmem:[#allocation16 + $0x1140] sm:$0xff] }
 0xab7   : > { %7103 = vmatprep.subr.bf16.mxu0 %v7102_v31  ;;  %v3848_v31 = vld [vmem:[#allocation16 + $0xf40] sm:$0xff] }
 0xab9   : > { %4953 = vmatmul.mubr.f32.vlgmr.msra.gmra.mrb[14].mxu0 %v4815_v52  ;;  %v5312_v52 = vld [vmem:[%s9391_s14 + $0x8] sm:$0xff] }
 0xaba   : > { %7105 = vmatpush1.bf16.msra.mxu0 %v7104_v41  ;;  %5029 = vmatprep.mubr.f32.mxu0 %v8012_v0  ;;  %v7232_v24 = vpack.c.bf16 %v5312_v52, %v5311_v45  ;;  %v3852_v41 = vld [vmem:[#allocation16 + $0xf60] sm:$0xff]  ;;  %v7126_v45 = vpack.c.bf16 %v3861_v2, %v3857_v1  ;;  %v3865_v52 = vld [vmem:[#allocation16 + $0xfc8] sm:$0xff] }
 0xabb   : > { %7107 = vmatprep.subr.bf16.mxu0 %v7106_v58  ;;  %v5337_v58 = vld [vmem:[%s9391_s14 + $0xd0] sm:$0xff]  ;;  %v7124_v43 = vpack.c.bf16 %v3852_v41, %v3848_v31 }
 0xabc   : > { %7233 = vmatpush3.bf16.msra.mxu1 %v7232_v24  ;;  %v7250_v5 = vpack.c.bf16 %v5338_v42, %v5337_v58  ;;  %v7130_v24 = vpack.c.bf16 %v3869_v50, %v3865_v52  ;;  %v3851_v31 = vld [vmem:[#allocation16 + $0xf58] sm:$0xff]  ;;  %v3854_v41 = vld [vmem:[#allocation16 + $0xf70] sm:$0xff]  ;;  %v3873_v52 = vld [vmem:[#allocation16 + $0x1008] sm:$0xff] }
 0xabd   : > { %7235 = vmatprep.subr.bf16.mxu1 %v7234_v13  ;;  %v3864_v13 = vld [vmem:[#allocation16 + $0xfc0] sm:$0xff]  ;;  %v3859_v58 = vld [vmem:[#allocation16 + $0xf98] sm:$0xff]  ;;  %v3877_v50 = vld [vmem:[#allocation16 + $0x1028] sm:$0xff] }
 0xabe   : > { %7109 = vmatpush1.bf16.msra.mxu0 %v7108_v49  ;;  %v3856_v49 = vld [vmem:[#allocation16 + $0xf80] sm:$0xff]  ;;  %v7132_v46 = vpack.c.bf16 %v3868_v47, %v3864_v13  ;;  %v3863_v42 = vld [vmem:[#allocation16 + $0xfb8] sm:$0xff]  ;;  %v3881_v47 = vld [vmem:[#allocation16 + $0x1048] sm:$0xff] }
 0xabf   : > { %7111 = vmatprep.subr.bf16.mxu0 %v7110_v56  ;;  %v7128_v56 = vpack.c.bf16 %v3860_v33, %v3856_v49  ;;  %v7158_v2 = vpack.c.bf16 %v3863_v42, %v3859_v58  ;;  %v3866_v49 = vld [vmem:[#allocation16 + $0xfd0] sm:$0xff]  ;;  %v3876_v13 = vld [vmem:[#allocation16 + $0x1020] sm:$0xff] }
 0xac0   : > { %7237 = vmatpush3.bf16.msra.mxu1 %v7236_v34  ;;  %v3814_v34 = vld [vmem:[#allocation16 + $0xe30] sm:$0xff]  ;;  %v3928_v42 = vld [vmem:[#allocation16 + $0x11c0] sm:$0xff] }
 0xac1   : > { %7239 = vmatprep.subr.bf16.mxu1 %v7238_v53  ;;  %v7136_v53 = vpack.c.bf16 %v3814_v34, %v3810_v16  ;;  %v3870_v33 = vld [vmem:[#allocation16 + $0xff0] sm:$0xff]  ;;  %v3884_v16 = vld [vmem:[#allocation16 + $0x1060] sm:$0xff]  ;;  %v3889_v34 = vld [vmem:[#allocation16 + $0x1088] sm:$0xff] }
 0xac2   : > { %7113 = vmatpush1.bf16.msra.mxu0 %v7112_v39  ;;  %v3819_v39 = vld [vmem:[#allocation16 + $0xe58] sm:$0xff] }
 0xac3   : > { %7115 = vmatprep.subr.bf16.mxu0 %v7114_v3  ;;  %v7138_v19 = vpack.c.bf16 %v3823_v38, %v3819_v39  ;;  %v3818_v3 = vld [vmem:[#allocation16 + $0xe50] sm:$0xff]  ;;  %v3893_v39 = vld [vmem:[#allocation16 + $0x10a8] sm:$0xff] }
 0xac4   : > { %7241 = vmatpush3.bf16.msra.mxu1 %v7240_v61  ;;  %v7140_v26 = vpack.c.bf16 %v3822_v20, %v3818_v3  ;;  %v3826_v61 = vld [vmem:[#allocation16 + $0xe90] sm:$0xff]  ;;  %v3892_v3 = vld [vmem:[#allocation16 + $0x10a0] sm:$0xff]  ;;  %v3897_v20 = vld [vmem:[#allocation16 + $0x10c8] sm:$0xff] }
 0xac5   : > { %7243 = vmatprep.subr.bf16.mxu1 %v7242_v12  ;;  %v3839_v12 = vld [vmem:[#allocation16 + $0xef8] sm:$0xff] }
 0xac6   : > { %7117 = vmatpush1.bf16.msra.mxu0 %v7116_v8  ;;  %v3830_v8 = vld [vmem:[#allocation16 + $0xeb0] sm:$0xff]  ;;  %v7146_v18 = vpack.c.bf16 %v3839_v12, %v3835_v63  ;;  %v3909_v63 = vld [vmem:[#allocation16 + $0x1128] sm:$0xff]  ;;  %v3904_v12 = vld [vmem:[#allocation16 + $0x1100] sm:$0xff] }
 0xac7   : > { %7119 = vmatprep.subr.bf16.mxu0 %v7118_v21  ;;  %v7144_v17 = vpack.c.bf16 %v3830_v8, %v3826_v61  ;;  %v3834_v21 = vld [vmem:[#allocation16 + $0xed0] sm:$0xff]  ;;  %v3900_v61 = vld [vmem:[#allocation16 + $0x10e0] sm:$0xff]  ;;  %v3905_v8 = vld [vmem:[#allocation16 + $0x1108] sm:$0xff] }
 0xac8   : > { %7245 = vmatpush3.bf16.msra.mxu1 %v7244_v23  ;;  %v7148_v29 = vpack.c.bf16 %v3838_v22, %v3834_v21  ;;  %v3842_v23 = vld [vmem:[#allocation16 + $0xf10] sm:$0xff]  ;;  %v3917_v21 = vld [vmem:[#allocation16 + $0x1168] sm:$0xff] }
 0xac9   : > { %7247 = vmatprep.subr.bf16.mxu1 %v7246_v32  ;;  %v3855_v32 = vld [vmem:[#allocation16 + $0xf78] sm:$0xff] }
 0xaca   : > { %7121 = vmatpush1.bf16.msra.mxu0 %v7120_v4  ;;  %v3846_v4 = vld [vmem:[#allocation16 + $0xf30] sm:$0xff]  ;;  %v7154_v36 = vpack.c.bf16 %v3855_v32, %v3851_v31  ;;  %v3920_v32 = vld [vmem:[#allocation16 + $0x1180] sm:$0xff] }
 0xacb   : > { %7123 = vmatprep.subr.bf16.mxu0 %v7122_v40  ;;  %v7152_v35 = vpack.c.bf16 %v3846_v4, %v3842_v23  ;;  %v3850_v40 = vld [vmem:[#allocation16 + $0xf50] sm:$0xff]  ;;  %v3925_v23 = vld [vmem:[#allocation16 + $0x11a8] sm:$0xff] }
 0xacc   : > { %7249 = vmatpush3.bf16.msra.mxu1 %v7248_v48  ;;  %v7156_v1 = vpack.c.bf16 %v3854_v41, %v3850_v40  ;;  %v3858_v48 = vld [vmem:[#allocation16 + $0xf90] sm:$0xff]  ;;  %v3933_v40 = vld [vmem:[#allocation16 + $0x11e8] sm:$0xff] }
 0xacd   : > { %7251 = vmatprep.subr.bf16.mxu1 %v7250_v5  ;;  %v3867_v5 = vld [vmem:[#allocation16 + $0xfd8] sm:$0xff] }
 0xace   : > { %7125 = vmatpush1.bf16.msra.mxu0 %v7124_v43  ;;  %v3862_v43 = vld [vmem:[#allocation16 + $0xfb0] sm:$0xff] }
 0xacf   : > { %7127 = vmatprep.subr.bf16.mxu0 %v7126_v45  ;;  %v7160_v9 = vpack.c.bf16 %v3862_v43, %v3858_v48  ;;  %v7162_v45 = vpack.c.bf16 %v3871_v44, %v3867_v5  ;;  %v3879_v48 = vld [vmem:[#allocation16 + $0x1038] sm:$0xff]  ;;  %v3874_v44 = vld [vmem:[#allocation16 + $0x1010] sm:$0xff] }
 0xad0   : > { %7253 = vmatpush3.bf16.msra.mxu1 %v7252_v51  ;;  %v7164_v51 = vpack.c.bf16 %v3870_v33, %v3866_v49  ;;  %v3887_v49 = vld [vmem:[#allocation16 + $0x1078] sm:$0xff] }
 0xad2   : > { %7129 = vmatpush1.bf16.msra.mxu0 %v7128_v56  ;;  %v7166_v56 = vpack.c.bf16 %v3877_v50, %v3873_v52  ;;  %v3882_v50 = vld [vmem:[#allocation16 + $0x1050] sm:$0xff] }
 0xad3   : > { %7131 = vmatprep.subr.bf16.mxu0 %v7130_v24  ;;  %v3872_v24 = vld [vmem:[#allocation16 + $0x1000] sm:$0xff] }
 0xad4   : > { %v7168_v57 = vpack.c.bf16 %v3876_v13, %v3872_v24  ;;  %v3895_v24 = vld [vmem:[#allocation16 + $0x10b8] sm:$0xff] }
 0xad6   : > { %7133 = vmatpush1.bf16.msra.mxu0 %v7132_v46  ;;  %v7170_v46 = vpack.c.bf16 %v3885_v30, %v3881_v47  ;;  %v3890_v30 = vld [vmem:[#allocation16 + $0x1090] sm:$0xff] }
 0xad7   : > { %7135 = vmatprep.subr.bf16.mxu0 %v7134_v37  ;;  %v3880_v37 = vld [vmem:[#allocation16 + $0x1040] sm:$0xff] }
 0xad8   : > { %v7172_v38 = vpack.c.bf16 %v3884_v16, %v3880_v37  ;;  %v3903_v37 = vld [vmem:[#allocation16 + $0x10f8] sm:$0xff] }
 0xad9   : > { %5030 = vmatmul.mubr.f32.vlgmr.msra.gmra.mrb[12].mxu0 %v4963_v54 }
 0xada   : > { %7137 = vmatpush1.bf16.msra.mxu0 %v7136_v53  ;;  %5100 = vmatprep.mubr.f32.mxu0 %v8012_v0  ;;  %v7174_v53 = vpack.c.bf16 %v3893_v39, %v3889_v34  ;;  %v3898_v39 = vld [vmem:[#allocation16 + $0x10d0] sm:$0xff] }
 0xadb   : > { %7139 = vmatprep.subr.bf16.mxu0 %v7138_v19  ;;  %v3888_v19 = vld [vmem:[#allocation16 + $0x1080] sm:$0xff] }
 0xadc   : > { %v7176_v59 = vpack.c.bf16 %v3892_v3, %v3888_v19  ;;  %v3911_v19 = vld [vmem:[#allocation16 + $0x1138] sm:$0xff] }
 0xade   : > { %7141 = vmatpush1.bf16.msra.mxu0 %v7140_v26  ;;  %v7178_v26 = vpack.c.bf16 %v3901_v25, %v3897_v20  ;;  %v3906_v25 = vld [vmem:[#allocation16 + $0x1110] sm:$0xff] }
 0xadf   : > { %7143 = vmatprep.subr.bf16.mxu0 %v7142_v60  ;;  %v3896_v60 = vld [vmem:[#allocation16 + $0x10c0] sm:$0xff] }
 0xae0   : > { %v7180_v15 = vpack.c.bf16 %v3900_v61, %v3896_v60 }
 0xae2   : > { %7145 = vmatpush1.bf16.msra.mxu0 %v7144_v17  ;;  %v3908_v17 = vld [vmem:[#allocation16 + $0x1120] sm:$0xff] }
 0xae3   : > { %7147 = vmatprep.subr.bf16.mxu0 %v7146_v18  ;;  %v3913_v18 = vld [vmem:[#allocation16 + $0x1148] sm:$0xff]  ;;  %v7184_v22 = vpack.c.bf16 %v3908_v17, %v3904_v12 }
 0xae4   : > { %v7186_v28 = vpack.c.bf16 %v3917_v21, %v3913_v18  ;;  %v3922_v18 = vld [vmem:[#allocation16 + $0x1190] sm:$0xff] }
 0xae5   : > { %v3926_v21 = vld [vmem:[#allocation16 + $0x11b0] sm:$0xff] }
 0xae6   : > { %7149 = vmatpush1.bf16.msra.mxu0 %v7148_v29  ;;  %v3916_v29 = vld [vmem:[#allocation16 + $0x1160] sm:$0xff] }
 0xae7   : > { %7151 = vmatprep.subr.bf16.mxu0 %v7150_v62  ;;  %v3921_v62 = vld [vmem:[#allocation16 + $0x1188] sm:$0xff]  ;;  %v7188_v4 = vpack.c.bf16 %v3916_v29, %v3912_v11  ;;  %v7224_v11 = vpack.c.bf16 %v3926_v21, %v3922_v18  ;;  %v5369_v18 = vld [vmem:[%s9391_s14 + $0x1d0] sm:$0xff]  ;;  %v5370_v21 = vld [vmem:[%s9391_s14 + $0x1d8] sm:$0xff] }
 0xae8   : > { %v7190_v31 = vpack.c.bf16 %v3925_v23, %v3921_v62  ;;  %v3930_v62 = vld [vmem:[#allocation16 + $0x11d0] sm:$0xff] }
 0xae9   : > { %v3934_v23 = vld [vmem:[#allocation16 + $0x11f0] sm:$0xff] }
 0xaea   : > { %7153 = vmatpush1.bf16.msra.mxu0 %v7152_v35  ;;  %v3924_v35 = vld [vmem:[#allocation16 + $0x11a0] sm:$0xff] }
 0xaeb   : > { %7155 = vmatprep.subr.bf16.mxu0 %v7154_v36  ;;  %v3929_v36 = vld [vmem:[#allocation16 + $0x11c8] sm:$0xff]  ;;  %v7192_v41 = vpack.c.bf16 %v3924_v35, %v3920_v32 }
 0xaec   : > { %v7194_v58 = vpack.c.bf16 %v3933_v40, %v3929_v36  ;;  %v5340_v32 = vld [vmem:[%s9391_s14 + $0xe8] sm:$0xff]  ;;  %v5323_v36 = vld [vmem:[%s9391_s14 + $0x60] sm:$0xff] }
 0xaed   : > { %v5324_v40 = vld [vmem:[%s9391_s14 + $0x68] sm:$0xff] }
 0xaee   : > { %7157 = vmatpush1.bf16.msra.mxu0 %v7156_v1  ;;  %v3932_v1 = vld [vmem:[#allocation16 + $0x11e0] sm:$0xff] }
 0xaef   : > { %7159 = vmatprep.subr.bf16.mxu0 %v7158_v2  ;;  %v3875_v2 = vld [vmem:[#allocation16 + $0x1018] sm:$0xff]  ;;  %v7196_v43 = vpack.c.bf16 %v3932_v1, %v3928_v42 }
 0xaf0   : > { %v7198_v5 = vpack.c.bf16 %v3879_v48, %v3875_v2  ;;  %v5325_v1 = vld [vmem:[%s9391_s14 + $0x70] sm:$0xff]  ;;  %v5326_v2 = vld [vmem:[%s9391_s14 + $0x78] sm:$0xff] }
 0xaf1   : > { %v7260_v48 = vpack.c.bf16 %v5326_v2, %v5325_v1 }
 0xaf2   : > { %7161 = vmatpush1.bf16.msra.mxu0 %v7160_v9  ;;  %v3878_v9 = vld [vmem:[#allocation16 + $0x1030] sm:$0xff] }
 0xaf3   : > { %7163 = vmatprep.subr.bf16.mxu0 %v7162_v45  ;;  %v3883_v45 = vld [vmem:[#allocation16 + $0x1058] sm:$0xff]  ;;  %v7200_v33 = vpack.c.bf16 %v3878_v9, %v3874_v44  ;;  %v9222_v9 = vld [vmem:[#allocation17] sm:$0xff] }
 0xaf4   : > { %v7202_v52 = vpack.c.bf16 %v3887_v49, %v3883_v45  ;;  %v5262_v45 = vrot.slane %v9222_v9, %v8662_v7  ;;  %v5266_v49 = vrot.slane %v9222_v9, %v8925_v55  ;;  %v5344_v7 = vld [vmem:[%s9391_s14 + $0x108] sm:$0xff] }
 0xaf6   : > { %7165 = vmatpush1.bf16.msra.mxu0 %v7164_v51  ;;  %v3886_v51 = vld [vmem:[#allocation16 + $0x1070] sm:$0xff] }
 0xaf7   : > { %7167 = vmatprep.subr.bf16.mxu0 %v7166_v56  ;;  %v3891_v56 = vld [vmem:[#allocation16 + $0x1098] sm:$0xff]  ;;  %v7204_v13 = vpack.c.bf16 %v3886_v51, %v3882_v50  ;;  %v5290_v50 = vrot.slane %v9222_v9, %v8930_v27 }
 0xaf8   : > { %v7206_v47 = vpack.c.bf16 %v3895_v24, %v3891_v56  ;;  %v5362_v27 = vld [vmem:[%s9391_s14 + $0x198] sm:$0xff] }
 0xaf9   : > { %5101 = vmatmul.mubr.f32.vlgmr.msra.gmra.mrb[14].mxu0 %v4963_v54  ;;  %v7182_v54 = vpack.c.bf16 %v3909_v63, %v3905_v8  ;;  %v3914_v8 = vld [vmem:[#allocation16 + $0x1150] sm:$0xff] }
 0xafa   : > { %7169 = vmatpush1.bf16.msra.mxu0 %v7168_v57  ;;  %5175 = vmatprep.mubr.f32.mxu0 %v8012_v0  ;;  %v3894_v57 = vld [vmem:[#allocation16 + $0x10b0] sm:$0xff] }
 0xafb   : > { %7171 = vmatprep.subr.bf16.mxu0 %v7170_v46  ;;  %v3899_v46 = vld [vmem:[#allocation16 + $0x10d8] sm:$0xff]  ;;  %v7208_v16 = vpack.c.bf16 %v3894_v57, %v3890_v30  ;;  %v3918_v63 = vld [vmem:[#allocation16 + $0x1170] sm:$0xff] }
 0xafc   : > { %v7210_v34 = vpack.c.bf16 %v3903_v37, %v3899_v46  ;;  %v7220_v12 = vpack.c.bf16 %v3918_v63, %v3914_v8  ;;  %v5367_v8 = vld [vmem:[%s9391_s14 + $0x1c0] sm:$0xff]  ;;  %v5368_v63 = vld [vmem:[%s9391_s14 + $0x1c8] sm:$0xff] }
 0xafe   : > { %7173 = vmatpush1.bf16.msra.mxu0 %v7172_v38  ;;  %v3902_v38 = vld [vmem:[#allocation16 + $0x10f0] sm:$0xff] }
 0xaff   : > { %7175 = vmatprep.subr.bf16.mxu0 %v7174_v53  ;;  %v3907_v53 = vld [vmem:[#allocation16 + $0x1118] sm:$0xff]  ;;  %v7212_v3 = vpack.c.bf16 %v3902_v38, %v3898_v39  ;;  %v5363_v39 = vld [vmem:[%s9391_s14 + $0x1a0] sm:$0xff]  ;;  %v5364_v38 = vld [vmem:[%s9391_s14 + $0x1a8] sm:$0xff] }
 0xb00   : > { %v7214_v20 = vpack.c.bf16 %v3911_v19, %v3907_v53  ;;  %v7270_v19 = vpack.c.bf16 %v5364_v38, %v5363_v39 }
 0xb02   : > { %7177 = vmatpush1.bf16.msra.mxu0 %v7176_v59  ;;  %v3915_v59 = vld [vmem:[#allocation16 + $0x1158] sm:$0xff] }
 0xb03   : > { %7179 = vmatprep.subr.bf16.mxu0 %v7178_v26  ;;  %v3919_v26 = vld [vmem:[#allocation16 + $0x1178] sm:$0xff] }
 0xb04   : > { %v7218_v61 = vpack.c.bf16 %v3919_v26, %v3915_v59 }
 0xb06   : > { %7181 = vmatpush1.bf16.msra.mxu0 %v7180_v15  ;;  %v3923_v15 = vld [vmem:[#allocation16 + $0x1198] sm:$0xff] }
 0xb07   : > { %7183 = vmatprep.subr.bf16.mxu0 %v7182_v54  ;;  %v3927_v54 = vld [vmem:[#allocation16 + $0x11b8] sm:$0xff] }
 0xb08   : > { %v7222_v17 = vpack.c.bf16 %v3927_v54, %v3923_v15  ;;  %v7278_v54 = vpack.c.bf16 %v5368_v63, %v5367_v8 }
 0xb0a   : > { %7185 = vmatpush1.bf16.msra.mxu0 %v7184_v22  ;;  %v3931_v22 = vld [vmem:[#allocation16 + $0x11d8] sm:$0xff] }
 0xb0b   : > { %7187 = vmatprep.subr.bf16.mxu0 %v7186_v28  ;;  %v3935_v28 = vld [vmem:[#allocation16 + $0x11f8] sm:$0xff] }
 0xb0c   : > { %v7226_v29 = vpack.c.bf16 %v3935_v28, %v3931_v22  ;;  %v7282_v28 = vpack.c.bf16 %v5370_v21, %v5369_v18 }
 0xb0e   : > { %7189 = vmatpush1.bf16.msra.mxu0 %v7188_v4  ;;  %v7228_v4 = vpack.c.bf16 %v3934_v23, %v3930_v62  ;;  %v5371_v62 = vld [vmem:[%s9391_s14 + $0x1e0] sm:$0xff]  ;;  %v5372_v23 = vld [vmem:[%s9391_s14 + $0x1e8] sm:$0xff] }
 0xb0f   : > { %7191 = vmatprep.subr.bf16.mxu0 %v7190_v31  ;;  %v5339_v31 = vld [vmem:[%s9391_s14 + $0xe0] sm:$0xff] }
 0xb10   : > { %v7254_v35 = vpack.c.bf16 %v5340_v32, %v5339_v31  ;;  %v5273_v32 = vsub.s32 6, %v8659_v6 }
 0xb12   : > { %7193 = vmatpush1.bf16.msra.mxu0 %v7192_v41  ;;  %v7256_v41 = vpack.c.bf16 %v5324_v40, %v5323_v36  ;;  %7255 = vmatprep.subr.bf16.mxu1 %v7254_v35  ;;  %v5293_v35 = vsub.s32 5, %v8659_v6  ;;  %v7286_v36 = vpack.c.bf16 %v5372_v23, %v5371_v62  ;;  %v5355_v40 = vld [vmem:[%s9391_s14 + $0x160] sm:$0xff]  ;;  %v5274_v2 = vrot.slane %v9222_v9, %v5273_v32 }
 0xb13   : > { %7195 = vmatprep.subr.bf16.mxu0 %v7194_v58  ;;  %v5342_v58 = vld [vmem:[%s9391_s14 + $0xf8] sm:$0xff] }
 0xb14   : > { %7257 = vmatpush3.bf16.msra.mxu1 %v7256_v41  ;;  %v5356_v41 = vld [vmem:[%s9391_s14 + $0x168] sm:$0xff] }
 0xb16   : > { %7197 = vmatpush1.bf16.msra.mxu0 %v7196_v43  ;;  %v5359_v43 = vld [vmem:[%s9391_s14 + $0x180] sm:$0xff] }
 0xb17   : > { %7199 = vmatprep.subr.bf16.mxu0 %v7198_v5  ;;  %v5360_v5 = vld [vmem:[%s9391_s14 + $0x188] sm:$0xff] }
 0xb18   : > { %v7262_v44 = vpack.c.bf16 %v5360_v5, %v5359_v43  ;;  %v5294_v43 = vrot.slane %v9222_v9, %v5293_v35 }
 0xb19   : > { %5176 = vmatmul.mubr.f32.vlgmr.msra.gmra.mrb[12].mxu0 %v9060_v14 }
 0xb1a   : > { %7201 = vmatpush1.bf16.msra.mxu0 %v7200_v33  ;;  %5246 = vmatprep.mubr.f32.mxu0 %v8012_v0  ;;  %v3910_v0 = vld [vmem:[#allocation16 + $0x1130] sm:$0xff]  ;;  %v5286_v33 = vrot.slane %v9222_v9, %v8668_v10 }
 0xb1b   : > { %7203 = vmatprep.subr.bf16.mxu0 %v7202_v52  ;;  %v7216_v60 = vpack.c.bf16 %v3910_v0, %v3906_v25  ;;  %v5361_v10 = vld [vmem:[%s9391_s14 + $0x190] sm:$0xff]  ;;  %v5366_v0 = vld [vmem:[%s9391_s14 + $0x1b8] sm:$0xff] }
 0xb1c   : > { %v7266_v37 = vpack.c.bf16 %v5362_v27, %v5361_v10  ;;  %v5365_v25 = vld [vmem:[%s9391_s14 + $0x1b0] sm:$0xff] }
 0xb1d   : > { %v7274_v26 = vpack.c.bf16 %v5366_v0, %v5365_v25 }
 0xb1e   : > { %7205 = vmatpush1.bf16.msra.mxu0 %v7204_v13 }
 0xb1f   : > { %7207 = vmatprep.subr.bf16.mxu0 %v7206_v47  ;;  %v5343_v47 = vld [vmem:[%s9391_s14 + $0x100] sm:$0xff] }
 0xb20   : > { %v7264_v57 = vpack.c.bf16 %v5344_v7, %v5343_v47 }
 0xb22   : > { %7209 = vmatpush1.bf16.msra.mxu0 %v7208_v16  ;;  %v5345_v16 = vld [vmem:[%s9391_s14 + $0x110] sm:$0xff] }
 0xb23   : > { %7211 = vmatprep.subr.bf16.mxu0 %v7210_v34  ;;  %v5346_v34 = vld [vmem:[%s9391_s14 + $0x118] sm:$0xff] }
 0xb24   : > { %v7268_v53 = vpack.c.bf16 %v5346_v34, %v5345_v16 }
 0xb26   : > { %7213 = vmatpush1.bf16.msra.mxu0 %v7212_v3  ;;  %v5347_v3 = vld [vmem:[%s9391_s14 + $0x120] sm:$0xff] }
 0xb27   : > { %7215 = vmatprep.subr.bf16.mxu0 %v7214_v20  ;;  %v5348_v20 = vld [vmem:[%s9391_s14 + $0x128] sm:$0xff] }
 0xb28   : > { %v7272_v59 = vpack.c.bf16 %v5348_v20, %v5347_v3 }
 0xb2a   : > { %7217 = vmatpush1.bf16.msra.mxu0 %v7216_v60  ;;  %v5349_v60 = vld [vmem:[%s9391_s14 + $0x130] sm:$0xff] }
 0xb2b   : > { %7219 = vmatprep.subr.bf16.mxu0 %v7218_v61  ;;  %v5350_v61 = vld [vmem:[%s9391_s14 + $0x138] sm:$0xff] }
 0xb2c   : > { %v7276_v15 = vpack.c.bf16 %v5350_v61, %v5349_v60 }
 0xb2e   : > { %7221 = vmatpush1.bf16.msra.mxu0 %v7220_v12  ;;  %v5351_v12 = vld [vmem:[%s9391_s14 + $0x140] sm:$0xff] }
 0xb2f   : > { %7223 = vmatprep.subr.bf16.mxu0 %v7222_v17  ;;  %v5352_v17 = vld [vmem:[%s9391_s14 + $0x148] sm:$0xff] }
 0xb30   : > { %v7280_v22 = vpack.c.bf16 %v5352_v17, %v5351_v12 }
 0xb32   : > { %7225 = vmatpush1.bf16.msra.mxu0 %v7224_v11  ;;  %v5353_v11 = vld [vmem:[%s9391_s14 + $0x150] sm:$0xff] }
 0xb33   : > { %7227 = vmatprep.subr.bf16.mxu0 %v7226_v29  ;;  %v5354_v29 = vld [vmem:[%s9391_s14 + $0x158] sm:$0xff] }
 0xb34   : > { %v7284_v31 = vpack.c.bf16 %v5354_v29, %v5353_v11 }
 0xb36   : > { %7229 = vmatpush1.bf16.msra.mxu0 %v7228_v4  ;;  %v5269_v4 = vsub.s32 4, %v8659_v6 }
 0xb38   : > { %v5270_v1 = vrot.slane %v9222_v9, %v5269_v4 }
 0xb39   : > { %5247 = vmatmul.mubr.f32.vlgmr.msra.gmra.mrb[14].mxu0 %v9060_v14  ;;  %v5341_v14 = vld [vmem:[%s9391_s14 + $0xf0] sm:$0xff] }
 0xb3a   : > { %v7258_v42 = vpack.c.bf16 %v5342_v58, %v5341_v14  ;;  %v5297_v14 = vsub.s32 7, %v8659_v6  ;;  %v5373_v58 = vld [vmem:[%s9391_s14 + $0x1f0] sm:$0xff] }
 0xb3b   : > { %v5357_v6 = vld [vmem:[%s9391_s14 + $0x170] sm:$0xff] }
 0xb3c   : > { %7259 = vmatprep.subr.bf16.mxu1 %v7258_v42  ;;  %v5374_v42 = vld [vmem:[%s9391_s14 + $0x1f8] sm:$0xff] }
 0xb3d   : > { %7261 = vmatpush3.bf16.msra.mxu1 %v7260_v48  ;;  %v7288_v48 = vpack.c.bf16 %v5356_v41, %v5355_v40  ;;  %v7290_v5 = vpack.c.bf16 %v5374_v42, %v5373_v58 }
 0xb3e   : > { %7263 = vmatprep.subr.bf16.mxu1 %v7262_v44  ;;  %v5358_v44 = vld [vmem:[%s9391_s14 + $0x178] sm:$0xff] }
 0xbec   : > { %v5177_v52 = vpop.f32.mrb[12].mxu0 }
 0xbed   : > { %v5279_v51 = vmul.f32 %v5262_v45, %v5177_v52  ;;  %v5179_v56 = vpop.f32.mrb[13].mxu0 }
 0xbee   : > { %v5280_v24 = vmul.f32 %v5266_v49, %v5179_v56  ;;  %v5298_v49 = vrot.slane %v9222_v9, %v5297_v14  ;;  %v5375_v9 = vld [vmem:[#allocation19] sm:$0x1] }
 0xbef   : > { %v5303_v13 = vadd.f32 %v5286_v33, %v5279_v51  ;;  %v7292_v51 = vpack.c.bf16 %v5358_v44, %v5357_v6 }
 0xbf0   : > { %v5304_v55 = vadd.f32 %v5290_v50, %v5280_v24 }
 0xbf1   : > { %v5307_v46 = vmax.f32 %v5303_v13, 0.0 }
 0xbf2   : > { %v5308_v30 = vmax.f32 %v5304_v55, 0.0 }
 0xbf4   : > { %5440 = vmatprep.mubr.f32.mxu1 %v5308_v30 }
 0xbf5   : > { %5441 = vmatmul.mubr.f32.vlgmr.msra.gmra.mrb[72].mxu1 %v5307_v46 }
 0xbf6   : > { %7265 = vmatpush3.bf16.msra.mxu1 %v7264_v57 }
 0xbf7   : > { %7267 = vmatprep.subr.bf16.mxu1 %v7266_v37 }
 0xbfa   : > { %7269 = vmatpush3.bf16.msra.mxu1 %v7268_v53 }
 0xbfb   : > { %7271 = vmatprep.subr.bf16.mxu1 %v7270_v19 }
 0xbfe   : > { %7273 = vmatpush3.bf16.msra.mxu1 %v7272_v59 }
 0xbff   : > { %7275 = vmatprep.subr.bf16.mxu1 %v7274_v26 }
 0xc02   : > { %7277 = vmatpush3.bf16.msra.mxu1 %v7276_v15 }
 0xc03   : > { %7279 = vmatprep.subr.bf16.mxu1 %v7278_v54 }
 0xc06   : > { %7281 = vmatpush3.bf16.msra.mxu1 %v7280_v22 }
 0xc07   : > { %7283 = vmatprep.subr.bf16.mxu1 %v7282_v28 }
 0xc0a   : > { %7285 = vmatpush3.bf16.msra.mxu1 %v7284_v31 }
 0xc0b   : > { %7287 = vmatprep.subr.bf16.mxu1 %v7286_v36 }
 0xc0c   : > { %v5248_v45 = vpop.f32.mrb[14].mxu0 }
 0xc0d   : > { %v5281_v33 = vmul.f32 %v5270_v1, %v5248_v45  ;;  %v5250_v52 = vpop.f32.mrb[15].mxu0 }
 0xc0e   : > { %v5282_v50 = vmul.f32 %v5274_v2, %v5250_v52  ;;  %7289 = vmatpush3.bf16.msra.mxu1 %v7288_v48 }
 0xc0f   : > { %v5305_v56 = vadd.f32 %v5294_v43, %v5281_v33  ;;  %7291 = vmatprep.subr.bf16.mxu1 %v7290_v5 }
 0xc10   : > { %v5306_v24 = vadd.f32 %v5298_v49, %v5282_v50 }
 0xc11   : > { %v5309_v47 = vmax.f32 %v5305_v56, 0.0 }
 0xc12   : > { %v5310_v13 = vmax.f32 %v5306_v24, 0.0  ;;  %7293 = vmatpush3.bf16.msra.mxu1 %v7292_v51 }
 0xc14   : > { %5510 = vmatprep.mubr.f32.mxu1 %v5310_v13 }
 0xc15   : > { %5511 = vmatmul.mubr.f32.vlgmr.msra.gmra.mrb[74].mxu1 %v5309_v47 }
 0xcc8   : > { %v6033_v7 = vpop.f32.mrb[72].mxu1 }
 0xcc9   : > { %v6034_v55 = vpop.f32.mrb[73].mxu1 }
 0xcca   : > { %v6035_v10 = vadd.f32 %v6034_v55, %v6033_v7 }
 0xccc   : > { %v5443_v57 = vadd.f32 %v6035_v10, %v5375_v9 }
 0xce8   : > { %v6068_v27 = vpop.f32.mrb[74].mxu1 }
 0xce9   : > { %v6069_v30 = vpop.f32.mrb[75].mxu1 }
 0xcea   : > { %v6070_v46 = vadd.f32 %v6069_v30, %v6068_v27 }
 0xcec   : > { %v5513_v37 = vadd.f32 %v6070_v46, %v5443_v57 }
 0xcee   : > { %5517 = vst.msk [vmem:[%s661_s4] sm:$0x1] %vm5516_vm14, %v5513_v37 }
 0xcef   : > { %7920 = shalt.err (!%p7917_p10)
}
 0xcf0   : > { %s7921_s29 = scalar_lea.hbm %s9335_s20, 16  ;;  %s7925_s23 = scalar_lea.hbm %s9450_s17, 32 }
 0xcf1   : > { %p7922_p2 = scmp.ne.s32.totalorder %s9335_s20, %s7921_s29  ;;  %p7926_p7 = scmp.lt.u32.totalorder %s9335_s20, %s9450_s17 }
 0xcf2   : > { %p7927_p8 = scmp.lt.u32.totalorder %s7925_s23, %s7921_s29  ;;  %p7929_p13 = scmp.lt.u32.totalorder %s7921_s29, %s9335_s20 }
 0xcf3   : > { %p7923_p3 = pnand %p7922_p2, %p9451_p1 }
 0xcf4   : > { %p7928_p11 = por %p7927_p8, %p7926_p7 }
 0xcf5   : > { %p7924_p4 = pneg %p7923_p3 }
 0xcf6   : > { %p7930_p0 = por %p7929_p13, %p7928_p11 }
 0xcf8   : > { %p7931_p6 = pnand %p7930_p0, %p7924_p4 }
 0xcfa   : > { %7934 = shalt.err (!%p7931_p6)
}
 0xcfb   : > { %7483 = dma.vmem_to_hbm [thread:$0]  (%p9451_p1), %s9337_s9, 16, %s9335_s20, %s5519_s30  }
 0xcfc PF: > { %s9452_s0 = sld [smem:[#allocation31_spill]]  ;;  %s9453_s21 = sld [smem:[#allocation28_spill]] }
 0xcfd   : > { %s9454_s4 = sld [smem:[#allocation35_spill]] }
 0xd02   : > { %p7545_p5 = scmp.ge.s32.totalorder %s9452_s0, 2  ;;  %s5543_s7 = sand.u32 1, %s9453_s21  }
 0xd03   : > { %p9455_p9 = scmp.ne.s32.totalorder %s9454_s4, 0  ;;  %s5544_s5 = scalar_lea.sflag [#allocation4], %s5543_s7 }
 0xd05   : > { %p7520_p12 = pnand %p7545_p5, %p9455_p9 }
 0xd07   : > { %7976 = dma.done.wait (!%p7520_p12), %s5544_s5, 16  }
 0xd08   : > { %7978 = vsyncadd (!%p7520_p12), %s5544_s5, 4294967280  ;;  %s9456_s24 = sld [smem:[#allocation32_spill]]  ;;  %s9457_s21 = sld [smem:[#allocation29_spill]] }
 0xd09   : > { %s9458_s22 = sld [smem:[#allocation30_spill]]  ;;  %s9459_s23 = sld [smem:[#allocation33_spill]] }
 0xd0e   : > { %p32_p10 = scmp.ge.s32.totalorder %s9456_s24, 4  }
 0xd10   :  { %34 = sbr.rel (!%p32_p10) target bundleno = 16 (0x10), region = 164 }
 0xd17   :  { %5548 = vsyncpa [#allocation3], 1 }
 0xd18   :  { %5550 = vsyncpa [#allocation3 + $0x1], 1 }
 0xd19   :  { %5551 = vsyncpa [#allocation6], 1 }
 0xd1a   :  { %5552 = vsyncpa [#allocation9], 1 }
 0xd1b   :  { %5553 = vsyncpa [#allocation12], 1 }
 0xd1c   :  { %5554 = vsyncpa [#allocation15], 1 }
 0xd1d   :  { %5555 = vsyncpa [#allocation18], 1 }
 0xd1e   :  { %5556 = vsyncpa [#allocation4], 1 }
 0xd1f   :  { %5558 = vsyncpa [#allocation4 + $0x1], 1 }

</bundles_post_ra>
